<compile_context>
chip_gen: v7x
topology: tpu7x:2x2x1
jax: 0.10.0
libtpu: 0.0.40
codegen_flags: <defaults>
</compile_context>

<pallas_src>
import functools

import numpy as np
import jax
import jax.numpy as jnp
from jax.experimental import pallas as pl
from jax.experimental.pallas import tpu as pltpu

EPS = 1e-5          # nn.InstanceNorm2d default eps
NEG_SLOPE = 0.01    # nn.LeakyReLU default negative_slope


# --------------------------------------------------------------------------------
# Pallas kernel: whole DecoderResidualBlock, one grid step per batch block (Bt samples)
# --------------------------------------------------------------------------------
def _decoder_block_kernel(x_ref, pn_ref, wplain_ref, w1u_ref, we_ref, wo_ref,
                          o_ref, *, num_plain, Bt, H):
    WC = x_ref.shape[2]
    M = Bt * H                                # rows of the lane-dense activation slab

    pn = pn_ref[...]                          # (WC, WC) channel-match matrix / (H*W), f32

    row_idx = jax.lax.broadcasted_iota(jnp.int32, (M, WC), 0)
    sample_row = row_idx % H                  # per-sample row index
    top_mask = sample_row == 0
    bot_mask = sample_row == (H - 1)

    def shift_down(v):                        # s[h] = v[h-1], 0 at each sample's top row
        return jnp.where(top_mask, 0.0, pltpu.roll(v, shift=1, axis=0))

    def shift_up(v):                          # s[h] = v[h+1], 0 at each sample's bottom row
        # roll by M-1 == roll by -1 (pltpu.roll requires a non-negative shift);
        # wrapped / cross-sample rows are killed by bot_mask.
        return jnp.where(bot_mask, 0.0, pltpu.roll(v, shift=M - 1, axis=0))

    def in_lrelu(v):
        # Per-sample, per-channel InstanceNorm2d (biased var, no affine) + LeakyReLU,
        # in the lane-dense (M, W*C) layout.  Row-sum first (sublane reduce), then one
        # tiny (Bt, WC) x (WC, WC) matmul broadcasts per-channel stats back to lanes.
        v3 = v.reshape(Bt, H, WC)
        m = jnp.dot(jnp.sum(v3, axis=1), pn,
                    preferred_element_type=jnp.float32)          # (Bt, WC) means
        vc3 = v3 - m[:, None, :]
        var = jnp.dot(jnp.sum(vc3 * vc3, axis=1), pn,
                      preferred_element_type=jnp.float32)        # (Bt, WC) biased var
        vn = (vc3 * jax.lax.rsqrt(var[:, None, :] + EPS)).reshape(M, WC)
        return jnp.where(vn >= 0.0, vn, NEG_SLOPE * vn)

    def conv3x3(v, band_bf16):
        # band_bf16: (3*WC, W*Cout) bf16 — kh-stacked banded weight.  One MXU matmul.
        lhs = jnp.concatenate([shift_down(v), v, shift_up(v)], axis=-1)   # (M, 3*WC)
        return jnp.dot(lhs.astype(jnp.bfloat16), band_bf16,
                       preferred_element_type=jnp.float32)

    x = x_ref[...].reshape(M, WC).astype(jnp.float32)

    # ----- non-upsampling residual layers, fused ----------------------------------
    for i in range(num_plain):
        a1 = in_lrelu(x)
        h = conv3x3(a1, wplain_ref[2 * i])
        a2 = in_lrelu(h)
        x = conv3x3(a2, wplain_ref[2 * i + 1]) + x

    # ----- last layer: upsample=True -----------------------------------------------
    a1 = in_lrelu(x)                          # shared with the identity (1x1 convT) branch
    h = conv3x3(a1, w1u_ref[...])
    a2 = in_lrelu(h)

    # ConvTranspose2d(k=3, s=2, p=1, output_padding=1) + identity ConvTranspose2d(k=1, s=2)
    # as two K-concatenated banded matmuls emitting column-interleaved output rows:
    #   even out row 2r   = [a2[r]   | a1[r]          ] @ we     (we = [bt_kh1 ; bu_1x1])
    #   odd  out row 2r+1 = [a2[r]   | a2[r+1]        ] @ wo     (wo = [bt_kh2 ; bt_kh0])
    even = jnp.dot(jnp.concatenate([a2, a1], axis=-1).astype(jnp.bfloat16),
                   we_ref[...], preferred_element_type=jnp.float32)
    odd = jnp.dot(jnp.concatenate([a2, shift_up(a2)], axis=-1).astype(jnp.bfloat16),
                  wo_ref[...], preferred_element_type=jnp.float32)

    out = jnp.concatenate([even, odd], axis=-1)            # (M, 2*Lout), lane-dense
    o_ref[...] = out.reshape(Bt, H, out.shape[-1]).astype(o_ref.dtype)


# --------------------------------------------------------------------------------
# Host-side weight preparation (PyTorch layouts -> banded matrices, bf16)
# --------------------------------------------------------------------------------
def prepare_params(torch_params, H, W):
    """Build banded kernel weights from PyTorch-layout weights.

    torch_params:
      "plain": list of (w1, w2), each (Ch, Ch, 3, 3)   [Conv2d layout (Cout,Cin,kh,kw)]
      "up":    (w1, wt, wup) with
               w1  (Ch, Ch, 3, 3)  Conv2d layout,
               wt  (Ch, Co, 3, 3)  ConvTranspose2d layout (Cin, Cout, kh, kw),
               wup (Ch, Co, 1, 1)  ConvTranspose2d layout.
    """
    plain = torch_params["plain"]
    w1_up, wt_up, wup = torch_params["up"]
    Ch = int(w1_up.shape[0])
    WC = W * Ch

    def conv_banded(w):             # (Cout, Cin, 3, 3) -> (3*W*Cin, W*Cout), kh-stacked
        Cout, Cin = int(w.shape[0]), int(w.shape[1])
        wn = np.asarray(w, np.float32)
        b = np.zeros((3, W * Cin, W * Cout), np.float32)
        for kh in range(3):
            for kw in range(3):
                blk = wn[:, :, kh, kw].T                       # (Cin, Cout)
                for c in range(W):                             # c = output column
                    src = c + kw - 1
                    if 0 <= src < W:
                        b[kh, src * Cin:(src + 1) * Cin, c * Cout:(c + 1) * Cout] = blk
        return b.reshape(3 * W * Cin, W * Cout)

    def convT3_banded(wt):          # (Cin, Cout, 3, 3) -> (3, W*Cin, 2*W*Cout)
        Cin, Cout = int(wt.shape[0]), int(wt.shape[1])
        wtn = np.asarray(wt, np.float32)
        b = np.zeros((3, W * Cin, 2 * W * Cout), np.float32)

        def put(which, iw, kh, kw, oc):
            if 0 <= iw < W:
                b[which, iw * Cin:(iw + 1) * Cin, oc * Cout:(oc + 1) * Cout] += wtn[:, :, kh, kw]

        # out[oh, ow]: oh = 2*ih - 1 + kh, ow = 2*iw - 1 + kw  (stride 2, pad 1).
        for c in range(W):
            put(0, c,     1, 1, 2 * c)        # even rows (kh=1)
            put(0, c + 1, 1, 0, 2 * c + 1)
            put(0, c,     1, 2, 2 * c + 1)
            put(1, c,     2, 1, 2 * c)        # odd rows, from input row r (kh=2)
            put(1, c + 1, 2, 0, 2 * c + 1)
            put(1, c,     2, 2, 2 * c + 1)
            put(2, c,     0, 1, 2 * c)        # odd rows, from input row r+1 (kh=0)
            put(2, c + 1, 0, 0, 2 * c + 1)
            put(2, c,     0, 2, 2 * c + 1)
        return b

    def convT1_banded(wu):          # (Cin, Cout, 1, 1) -> (W*Cin, 2*W*Cout)
        Cin, Cout = int(wu.shape[0]), int(wu.shape[1])
        blk = np.asarray(wu, np.float32)[:, :, 0, 0]
        b = np.zeros((W * Cin, 2 * W * Cout), np.float32)
        for c in range(W):
            b[c * Cin:(c + 1) * Cin, (2 * c) * Cout:(2 * c + 1) * Cout] = blk
        return b

    # Channel-match matrix for InstanceNorm stat broadcast, pre-scaled by 1/(H*W).
    lanes = np.arange(WC)
    pn = (lanes[:, None] % Ch == lanes[None, :] % Ch).astype(np.float32) / float(H * W)

    if plain:
        wplain = np.stack([conv_banded(w) for pair in plain for w in pair], axis=0)
    else:
        wplain = np.zeros((1, 3 * WC, WC), np.float32)        # dummy, never read

    bt = convT3_banded(wt_up)                                  # (3, WC, 2*W*Co)
    bu = convT1_banded(wup)                                    # (WC, 2*W*Co)
    we = np.concatenate([bt[0], bu], axis=0)                   # (2*WC, Lout): lhs [a2 | a1]
    wo = np.concatenate([bt[1], bt[2]], axis=0)                # (2*WC, Lout): lhs [a2 | up(a2)]

    return {
        "pn": jnp.asarray(pn, jnp.float32),                    # stats stay f32
        "wplain": jnp.asarray(wplain, jnp.bfloat16),           # (2*num_plain, 3*WC, WC)
        "w1u": jnp.asarray(conv_banded(w1_up), jnp.bfloat16),  # (3*WC, WC)
        "we": jnp.asarray(we, jnp.bfloat16),                   # (2*WC, Lout)
        "wo": jnp.asarray(wo, jnp.bfloat16),                   # (2*WC, Lout)
    }


# --------------------------------------------------------------------------------
# Forward wrapper
# --------------------------------------------------------------------------------
def decoder_residual_block(x_nchw, prep, *, num_plain, block_batch=None):
    """Full DecoderResidualBlock forward.  Input/output in NCHW (PyTorch convention)."""
    B, C, H, W = x_nchw.shape
    WC = W * C
    Lout = prep["we"].shape[1]            # 2 * W * Cout
    Co = Lout // (2 * W)

    # Batch-block so each matmul has M = Bt*H rows (~MXU height).  128//H targets v5e's
    # 128-deep MXU; on v6e/v7x 256//H is also a good choice (keep >= 2 grid steps so the
    # "parallel" axis can split across v7x's two TensorCores).
    if block_batch is None:
        block_batch = max(1, min(B, 128 // H))
    while B % block_batch:
        block_batch -= 1
    Bt = block_batch

    # NCHW -> NHWC -> lane-dense (B, H, W*C)  (pure reshape after the transpose)
    x_flat = jnp.transpose(x_nchw, (0, 2, 3, 1)).reshape(B, H, WC)

    kernel = functools.partial(_decoder_block_kernel, num_plain=num_plain, Bt=Bt, H=H)

    out_flat = pl.pallas_call(
        kernel,
        out_shape=jax.ShapeDtypeStruct((B, H, 2 * Lout), x_nchw.dtype),
        grid_spec=pltpu.PrefetchScalarGridSpec(
            num_scalar_prefetch=0,
            grid=(B // Bt,),
            in_specs=[
                pl.BlockSpec((Bt, H, WC), lambda b: (b, 0, 0)),
                # constant block index -> weights DMA'd into VMEM once, never refetched
                pl.BlockSpec(prep["pn"].shape, lambda b: (0, 0)),
                pl.BlockSpec(prep["wplain"].shape, lambda b: (0, 0, 0)),
                pl.BlockSpec(prep["w1u"].shape, lambda b: (0, 0)),
                pl.BlockSpec(prep["we"].shape, lambda b: (0, 0)),
                pl.BlockSpec(prep["wo"].shape, lambda b: (0, 0)),
            ],
            out_specs=pl.BlockSpec((Bt, H, 2 * Lout), lambda b: (b, 0, 0)),
        ),
        compiler_params=pltpu.CompilerParams(
            dimension_semantics=("parallel",)),
    )(x_flat, prep["pn"], prep["wplain"], prep["w1u"], prep["we"], prep["wo"])

    # Lanes of the merged output are [parity(2), out_col(2W), channel(Co)]:
    # de-interleave with pure reshapes (fuses into the required NHWC->NCHW transpose).
    out = out_flat.reshape(B, H, 2, 2 * W, Co).reshape(B, 2 * H, 2 * W, Co)
    return jnp.transpose(out, (0, 3, 1, 2))


# --------------------------------------------------------------------------------
# NumPy reference (direct PyTorch semantics, PyTorch weight layouts, pure f32)
# --------------------------------------------------------------------------------
def np_in_lrelu(x):
    m = x.mean(axis=(1, 2), keepdims=True)
    v = ((x - m) ** 2).mean(axis=(1, 2), keepdims=True)
    xn = (x - m) / np.sqrt(v + EPS)
    return np.where(xn >= 0, xn, NEG_SLOPE * xn).astype(np.float32)


def np_conv3x3(x, w):                  # x NHWC, w (Cout, Cin, 3, 3), pad 1, no bias
    B, H, W, Cin = x.shape
    Cout = w.shape[0]
    xp = np.zeros((B, H + 2, W + 2, Cin), np.float32)
    xp[:, 1:H + 1, 1:W + 1, :] = x
    out = np.zeros((B, H, W, Cout), np.float32)
    for kh in range(3):
        for kw in range(3):
            out += np.einsum("bhwc,dc->bhwd",
                             xp[:, kh:kh + H, kw:kw + W, :], w[:, :, kh, kw])
    return out


def np_convT3_s2(x, wt):               # wt (Cin, Cout, 3, 3); s=2, p=1, output_padding=1
    B, H, W, Cin = x.shape
    Cout = wt.shape[1]
    out = np.zeros((B, 2 * H, 2 * W, Cout), np.float32)
    for kh in range(3):
        for kw in range(3):
            contrib = np.einsum("bhwc,cd->bhwd", x, wt[:, :, kh, kw])
            for ih in range(H):
                oh = 2 * ih - 1 + kh
                if not (0 <= oh < 2 * H):
                    continue
                for iw in range(W):
                    ow = 2 * iw - 1 + kw
                    if not (0 <= ow < 2 * W):
                        continue
                    out[:, oh, ow, :] += contrib[:, ih, iw, :]
    return out


def np_convT1_s2(x, wu):               # wu (Cin, Cout, 1, 1); s=2, output_padding=1
    B, H, W, Cin = x.shape
    Cout = wu.shape[1]
    out = np.zeros((B, 2 * H, 2 * W, Cout), np.float32)
    out[:, ::2, ::2, :] = np.einsum("bhwc,cd->bhwd", x, wu[:, :, 0, 0])
    return out


def np_decoder_block(x_nchw, torch_params):
    x = np.transpose(np.asarray(x_nchw, np.float32), (0, 2, 3, 1))
    for (w1, w2) in torch_params["plain"]:
        a1 = np_in_lrelu(x)
        h = np_conv3x3(a1, np.asarray(w1))
        a2 = np_in_lrelu(h)
        x = np_conv3x3(a2, np.asarray(w2)) + x
    w1, wt, wup = torch_params["up"]
    a1 = np_in_lrelu(x)
    h = np_conv3x3(a1, np.asarray(w1))
    a2 = np_in_lrelu(h)
    x = np_convT3_s2(a2, np.asarray(wt)) + np_convT1_s2(a1, np.asarray(wup))
    return np.transpose(x, (0, 3, 1, 2))


# --------------------------------------------------------------------------------
if __name__ == "__main__":
    B, Hs, Ws = 16, 16, 16        # B=16, Bt=8 -> M=128 rows/matmul, 2 grid steps
    hidden_channels = 8           # W * C = 128 -> lane-dense layout
    output_channels = 8
    layers = 2

    key = jax.random.PRNGKey(0)
    keys = jax.random.split(key, 2 * (layers - 1) + 4)

    # Synthetic weights in PyTorch layouts.
    plain = []
    for i in range(layers - 1):
        w1 = 0.15 * jax.random.normal(keys[2 * i],
                                      (hidden_channels, hidden_channels, 3, 3), jnp.float32)
        w2 = 0.15 * jax.random.normal(keys[2 * i + 1],
                                      (hidden_channels, hidden_channels, 3, 3), jnp.float32)
        plain.append((w1, w2))
    w1_up = 0.15 * jax.random.normal(keys[-4], (hidden_channels, hidden_channels, 3, 3), jnp.float32)
    wt_up = 0.15 * jax.random.normal(keys[-3], (hidden_channels, output_channels, 3, 3), jnp.float32)
    wup = 0.15 * jax.random.normal(keys[-2], (hidden_channels, output_channels, 1, 1), jnp.float32)
    torch_params = {"plain": plain, "up": (w1_up, wt_up, wup)}

    prep = prepare_params(torch_params, Hs, Ws)

    x = jax.random.normal(keys[-1], (B, hidden_channels, Hs, Ws), jnp.float32)   # NCHW

    fwd = jax.jit(decoder_residual_block, static_argnames=("num_plain",))
    out = fwd(x, prep, num_plain=layers - 1)
    out = jax.block_until_ready(out)

    ref = np_decoder_block(np.asarray(x), jax.tree_util.tree_map(np.asarray, torch_params))
    assert out.shape == (B, output_channels, 2 * Hs, 2 * Ws), out.shape
    # Tolerance accounts for bf16 matmul operands (f32 accumulation) vs. the pure-f32 reference.
    np.testing.assert_allclose(np.asarray(out), ref, rtol=5e-2, atol=5e-2)

    print("KERNEL_OK")
</pallas_src>

<mosaic_0001>
module attributes {stable_mosaic.version = 11 : i64} {
  func.func @_decoder_block_kernel(%arg0: i32, %arg1: memref<8x16x128xf32, #tpu.memory_space<vmem>>, %arg2: memref<128x128xf32, #tpu.memory_space<vmem>>, %arg3: memref<2x384x128xbf16, #tpu.memory_space<vmem>>, %arg4: memref<384x128xbf16, #tpu.memory_space<vmem>>, %arg5: memref<256x256xbf16, #tpu.memory_space<vmem>>, %arg6: memref<256x256xbf16, #tpu.memory_space<vmem>>, %arg7: memref<8x16x512xf32, #tpu.memory_space<vmem>>) attributes {dimension_semantics = [#tpu.dimension_semantics<parallel>], iteration_bounds = array<i64: 2>, scalar_prefetch = 0 : i64, scratch_operands = 0 : i64, tpu.core_type = #tpu.core_type<tc>, window_params = [{transform_indices = @transform_0, window_bounds = array<i64: 8, 16, 128>}, {pipeline_mode = #tpu.pipeline_mode<synchronous>, transform_indices = @transform_1, window_bounds = array<i64: 128, 128>}, {pipeline_mode = #tpu.pipeline_mode<synchronous>, transform_indices = @transform_2, window_bounds = array<i64: 2, 384, 128>}, {pipeline_mode = #tpu.pipeline_mode<synchronous>, transform_indices = @transform_3, window_bounds = array<i64: 384, 128>}, {pipeline_mode = #tpu.pipeline_mode<synchronous>, transform_indices = @transform_4, window_bounds = array<i64: 256, 256>}, {pipeline_mode = #tpu.pipeline_mode<synchronous>, transform_indices = @transform_5, window_bounds = array<i64: 256, 256>}, {transform_indices = @transform_6, window_bounds = array<i64: 8, 16, 512>}]} {
    %c0 = arith.constant 0 : index
    %c0_0 = arith.constant 0 : index
    %0 = vector.load %arg2[%c0, %c0_0] : memref<128x128xf32, #tpu.memory_space<vmem>>, vector<128x128xf32>
    %1 = tpu.iota {dimensions = array<i32: 0>} : vector<128x128xi32>
    %c16_i32 = arith.constant 16 : i32
    %c0_i32 = arith.constant 0 : i32
    %2 = arith.cmpi eq, %c16_i32, %c0_i32 : i32
    %c1_i32 = arith.constant 1 : i32
    %3 = arith.select %2, %c1_i32, %c16_i32 : i32
    %4 = vector.broadcast %3 : i32 to vector<128x128xi32>
    %5 = arith.remsi %1, %4 : vector<128x128xi32>
    %c0_i32_1 = arith.constant 0 : i32
    %6 = vector.broadcast %c0_i32_1 : i32 to vector<128x128xi32>
    %7 = arith.cmpi ne, %5, %6 : vector<128x128xi32>
    %c0_i32_2 = arith.constant 0 : i32
    %8 = vector.broadcast %c0_i32_2 : i32 to vector<128x128xi32>
    %9 = arith.cmpi slt, %5, %8 : vector<128x128xi32>
    %c0_i32_3 = arith.constant 0 : i32
    %10 = arith.cmpi slt, %3, %c0_i32_3 : i32
    %11 = vector.broadcast %10 : i1 to vector<128x128xi1>
    %12 = vector.broadcast %11 : vector<128x128xi1> to vector<128x128xi1>
    %13 = arith.xori %9, %12 : vector<128x128xi1>
    %14 = arith.andi %13, %7 : vector<128x128xi1>
    %15 = vector.broadcast %3 : i32 to vector<128x128xi32>
    %16 = arith.addi %5, %15 : vector<128x128xi32>
    %17 = arith.select %14, %16, %5 : vector<128x128xi1>, vector<128x128xi32>
    %c0_i32_4 = arith.constant 0 : i32
    %18 = vector.broadcast %c0_i32_4 : i32 to vector<128x128xi32>
    %19 = arith.cmpi eq, %17, %18 : vector<128x128xi32>
    %c15_i32 = arith.constant 15 : i32
    %20 = vector.broadcast %c15_i32 : i32 to vector<128x128xi32>
    %21 = arith.cmpi eq, %17, %20 : vector<128x128xi32>
    %c0_5 = arith.constant 0 : index
    %c0_6 = arith.constant 0 : index
    %c0_7 = arith.constant 0 : index
    %22 = vector.load %arg1[%c0_5, %c0_6, %c0_7] : memref<8x16x128xf32, #tpu.memory_space<vmem>>, vector<8x16x128xf32>
    %23 = vector.shape_cast %22 : vector<8x16x128xf32> to vector<128x128xf32>
    %24 = vector.shape_cast %23 : vector<128x128xf32> to vector<8x16x128xf32>
    %cst = arith.constant dense<0.000000e+00> : vector<8x128xf32>
    %25 = vector.multi_reduction <add>, %24, %cst [1] : vector<8x16x128xf32> to vector<8x128xf32>
    %cst_8 = arith.constant dense<0.000000e+00> : vector<8x128xf32>
    %26 = tpu.matmul %25, %0, %cst_8 {dimension_numbers = #tpu.dot_dimension_numbers<[1], [0], [0], [1], [0, 0, 1, 1], [], []>} : vector<8x128xf32>, vector<128x128xf32>, vector<8x128xf32> -> vector<8x128xf32>
    %27 = vector.shape_cast %26 : vector<8x128xf32> to vector<8x1x128xf32>
    %28 = vector.broadcast %27 : vector<8x1x128xf32> to vector<8x16x128xf32>
    %29 = arith.subf %24, %28 : vector<8x16x128xf32>
    %30 = arith.mulf %29, %29 : vector<8x16x128xf32>
    %cst_9 = arith.constant dense<0.000000e+00> : vector<8x128xf32>
    %31 = vector.multi_reduction <add>, %30, %cst_9 [1] : vector<8x16x128xf32> to vector<8x128xf32>
    %cst_10 = arith.constant dense<0.000000e+00> : vector<8x128xf32>
    %32 = tpu.matmul %31, %0, %cst_10 {dimension_numbers = #tpu.dot_dimension_numbers<[1], [0], [0], [1], [0, 0, 1, 1], [], []>} : vector<8x128xf32>, vector<128x128xf32>, vector<8x128xf32> -> vector<8x128xf32>
    %33 = vector.shape_cast %32 : vector<8x128xf32> to vector<8x1x128xf32>
    %cst_11 = arith.constant 9.99999974E-6 : f32
    %34 = vector.broadcast %cst_11 : f32 to vector<8x1x128xf32>
    %35 = arith.addf %33, %34 : vector<8x1x128xf32>
    %36 = math.rsqrt %35 : vector<8x1x128xf32>
    %37 = vector.broadcast %36 : vector<8x1x128xf32> to vector<8x16x128xf32>
    %38 = arith.mulf %29, %37 : vector<8x16x128xf32>
    %39 = vector.shape_cast %38 : vector<8x16x128xf32> to vector<128x128xf32>
    %cst_12 = arith.constant 0.000000e+00 : f32
    %40 = vector.broadcast %cst_12 : f32 to vector<128x128xf32>
    %41 = arith.cmpf oge, %39, %40 : vector<128x128xf32>
    %cst_13 = arith.constant 0.00999999977 : f32
    %42 = vector.broadcast %cst_13 : f32 to vector<128x128xf32>
    %43 = arith.mulf %42, %39 : vector<128x128xf32>
    %44 = arith.select %41, %39, %43 : vector<128x128xi1>, vector<128x128xf32>
    %c0_14 = arith.constant 0 : index
    %c0_15 = arith.constant 0 : index
    %c0_16 = arith.constant 0 : index
    %45 = vector.load %arg3[%c0_14, %c0_15, %c0_16] : memref<2x384x128xbf16, #tpu.memory_space<vmem>>, vector<1x384x128xbf16>
    %46 = vector.shape_cast %45 : vector<1x384x128xbf16> to vector<384x128xbf16>
    %c1_i32_17 = arith.constant 1 : i32
    %47 = tpu.dynamic_rotate %44 by %c1_i32_17 dim 0 : vector<128x128xf32>, i32 -> vector<128x128xf32>
    %cst_18 = arith.constant 0.000000e+00 : f32
    %48 = vector.broadcast %cst_18 : f32 to vector<128x128xf32>
    %49 = arith.select %19, %48, %47 : vector<128x128xi1>, vector<128x128xf32>
    %c127_i32 = arith.constant 127 : i32
    %50 = tpu.dynamic_rotate %44 by %c127_i32 dim 0 : vector<128x128xf32>, i32 -> vector<128x128xf32>
    %cst_19 = arith.constant 0.000000e+00 : f32
    %51 = vector.broadcast %cst_19 : f32 to vector<128x128xf32>
    %52 = arith.select %21, %51, %50 : vector<128x128xi1>, vector<128x128xf32>
    %53 = tpu.concatenate %49, %44, %52 in 1 : vector<128x128xf32>, vector<128x128xf32>, vector<128x128xf32> -> vector<128x384xf32>
    %54 = arith.truncf %53 : vector<128x384xf32> to vector<128x384xbf16>
    %cst_20 = arith.constant dense<0.000000e+00> : vector<128x128xf32>
    %55 = tpu.matmul %54, %46, %cst_20 {dimension_numbers = #tpu.dot_dimension_numbers<[1], [0], [0], [1], [0, 0, 1, 1], [], []>} : vector<128x384xbf16>, vector<384x128xbf16>, vector<128x128xf32> -> vector<128x128xf32>
    %56 = vector.shape_cast %55 : vector<128x128xf32> to vector<8x16x128xf32>
    %cst_21 = arith.constant dense<0.000000e+00> : vector<8x128xf32>
    %57 = vector.multi_reduction <add>, %56, %cst_21 [1] : vector<8x16x128xf32> to vector<8x128xf32>
    %cst_22 = arith.constant dense<0.000000e+00> : vector<8x128xf32>
    %58 = tpu.matmul %57, %0, %cst_22 {dimension_numbers = #tpu.dot_dimension_numbers<[1], [0], [0], [1], [0, 0, 1, 1], [], []>} : vector<8x128xf32>, vector<128x128xf32>, vector<8x128xf32> -> vector<8x128xf32>
    %59 = vector.shape_cast %58 : vector<8x128xf32> to vector<8x1x128xf32>
    %60 = vector.broadcast %59 : vector<8x1x128xf32> to vector<8x16x128xf32>
    %61 = arith.subf %56, %60 : vector<8x16x128xf32>
    %62 = arith.mulf %61, %61 : vector<8x16x128xf32>
    %cst_23 = arith.constant dense<0.000000e+00> : vector<8x128xf32>
    %63 = vector.multi_reduction <add>, %62, %cst_23 [1] : vector<8x16x128xf32> to vector<8x128xf32>
    %cst_24 = arith.constant dense<0.000000e+00> : vector<8x128xf32>
    %64 = tpu.matmul %63, %0, %cst_24 {dimension_numbers = #tpu.dot_dimension_numbers<[1], [0], [0], [1], [0, 0, 1, 1], [], []>} : vector<8x128xf32>, vector<128x128xf32>, vector<8x128xf32> -> vector<8x128xf32>
    %65 = vector.shape_cast %64 : vector<8x128xf32> to vector<8x1x128xf32>
    %cst_25 = arith.constant 9.99999974E-6 : f32
    %66 = vector.broadcast %cst_25 : f32 to vector<8x1x128xf32>
    %67 = arith.addf %65, %66 : vector<8x1x128xf32>
    %68 = math.rsqrt %67 : vector<8x1x128xf32>
    %69 = vector.broadcast %68 : vector<8x1x128xf32> to vector<8x16x128xf32>
    %70 = arith.mulf %61, %69 : vector<8x16x128xf32>
    %71 = vector.shape_cast %70 : vector<8x16x128xf32> to vector<128x128xf32>
    %cst_26 = arith.constant 0.000000e+00 : f32
    %72 = vector.broadcast %cst_26 : f32 to vector<128x128xf32>
    %73 = arith.cmpf oge, %71, %72 : vector<128x128xf32>
    %cst_27 = arith.constant 0.00999999977 : f32
    %74 = vector.broadcast %cst_27 : f32 to vector<128x128xf32>
    %75 = arith.mulf %74, %71 : vector<128x128xf32>
    %76 = arith.select %73, %71, %75 : vector<128x128xi1>, vector<128x128xf32>
    %c1 = arith.constant 1 : index
    %c0_28 = arith.constant 0 : index
    %c0_29 = arith.constant 0 : index
    %77 = vector.load %arg3[%c1, %c0_28, %c0_29] : memref<2x384x128xbf16, #tpu.memory_space<vmem>>, vector<1x384x128xbf16>
    %78 = vector.shape_cast %77 : vector<1x384x128xbf16> to vector<384x128xbf16>
    %c1_i32_30 = arith.constant 1 : i32
    %79 = tpu.dynamic_rotate %76 by %c1_i32_30 dim 0 : vector<128x128xf32>, i32 -> vector<128x128xf32>
    %cst_31 = arith.constant 0.000000e+00 : f32
    %80 = vector.broadcast %cst_31 : f32 to vector<128x128xf32>
    %81 = arith.select %19, %80, %79 : vector<128x128xi1>, vector<128x128xf32>
    %c127_i32_32 = arith.constant 127 : i32
    %82 = tpu.dynamic_rotate %76 by %c127_i32_32 dim 0 : vector<128x128xf32>, i32 -> vector<128x128xf32>
    %cst_33 = arith.constant 0.000000e+00 : f32
    %83 = vector.broadcast %cst_33 : f32 to vector<128x128xf32>
    %84 = arith.select %21, %83, %82 : vector<128x128xi1>, vector<128x128xf32>
    %85 = tpu.concatenate %81, %76, %84 in 1 : vector<128x128xf32>, vector<128x128xf32>, vector<128x128xf32> -> vector<128x384xf32>
    %86 = arith.truncf %85 : vector<128x384xf32> to vector<128x384xbf16>
    %cst_34 = arith.constant dense<0.000000e+00> : vector<128x128xf32>
    %87 = tpu.matmul %86, %78, %cst_34 {dimension_numbers = #tpu.dot_dimension_numbers<[1], [0], [0], [1], [0, 0, 1, 1], [], []>} : vector<128x384xbf16>, vector<384x128xbf16>, vector<128x128xf32> -> vector<128x128xf32>
    %88 = arith.addf %87, %23 : vector<128x128xf32>
    %89 = vector.shape_cast %88 : vector<128x128xf32> to vector<8x16x128xf32>
    %cst_35 = arith.constant dense<0.000000e+00> : vector<8x128xf32>
    %90 = vector.multi_reduction <add>, %89, %cst_35 [1] : vector<8x16x128xf32> to vector<8x128xf32>
    %cst_36 = arith.constant dense<0.000000e+00> : vector<8x128xf32>
    %91 = tpu.matmul %90, %0, %cst_36 {dimension_numbers = #tpu.dot_dimension_numbers<[1], [0], [0], [1], [0, 0, 1, 1], [], []>} : vector<8x128xf32>, vector<128x128xf32>, vector<8x128xf32> -> vector<8x128xf32>
    %92 = vector.shape_cast %91 : vector<8x128xf32> to vector<8x1x128xf32>
    %93 = vector.broadcast %92 : vector<8x1x128xf32> to vector<8x16x128xf32>
    %94 = arith.subf %89, %93 : vector<8x16x128xf32>
    %95 = arith.mulf %94, %94 : vector<8x16x128xf32>
    %cst_37 = arith.constant dense<0.000000e+00> : vector<8x128xf32>
    %96 = vector.multi_reduction <add>, %95, %cst_37 [1] : vector<8x16x128xf32> to vector<8x128xf32>
    %cst_38 = arith.constant dense<0.000000e+00> : vector<8x128xf32>
    %97 = tpu.matmul %96, %0, %cst_38 {dimension_numbers = #tpu.dot_dimension_numbers<[1], [0], [0], [1], [0, 0, 1, 1], [], []>} : vector<8x128xf32>, vector<128x128xf32>, vector<8x128xf32> -> vector<8x128xf32>
    %98 = vector.shape_cast %97 : vector<8x128xf32> to vector<8x1x128xf32>
    %cst_39 = arith.constant 9.99999974E-6 : f32
    %99 = vector.broadcast %cst_39 : f32 to vector<8x1x128xf32>
    %100 = arith.addf %98, %99 : vector<8x1x128xf32>
    %101 = math.rsqrt %100 : vector<8x1x128xf32>
    %102 = vector.broadcast %101 : vector<8x1x128xf32> to vector<8x16x128xf32>
    %103 = arith.mulf %94, %102 : vector<8x16x128xf32>
    %104 = vector.shape_cast %103 : vector<8x16x128xf32> to vector<128x128xf32>
    %cst_40 = arith.constant 0.000000e+00 : f32
    %105 = vector.broadcast %cst_40 : f32 to vector<128x128xf32>
    %106 = arith.cmpf oge, %104, %105 : vector<128x128xf32>
    %cst_41 = arith.constant 0.00999999977 : f32
    %107 = vector.broadcast %cst_41 : f32 to vector<128x128xf32>
    %108 = arith.mulf %107, %104 : vector<128x128xf32>
    %109 = arith.select %106, %104, %108 : vector<128x128xi1>, vector<128x128xf32>
    %c0_42 = arith.constant 0 : index
    %c0_43 = arith.constant 0 : index
    %110 = vector.load %arg4[%c0_42, %c0_43] : memref<384x128xbf16, #tpu.memory_space<vmem>>, vector<384x128xbf16>
    %c1_i32_44 = arith.constant 1 : i32
    %111 = tpu.dynamic_rotate %109 by %c1_i32_44 dim 0 : vector<128x128xf32>, i32 -> vector<128x128xf32>
    %cst_45 = arith.constant 0.000000e+00 : f32
    %112 = vector.broadcast %cst_45 : f32 to vector<128x128xf32>
    %113 = arith.select %19, %112, %111 : vector<128x128xi1>, vector<128x128xf32>
    %c127_i32_46 = arith.constant 127 : i32
    %114 = tpu.dynamic_rotate %109 by %c127_i32_46 dim 0 : vector<128x128xf32>, i32 -> vector<128x128xf32>
    %cst_47 = arith.constant 0.000000e+00 : f32
    %115 = vector.broadcast %cst_47 : f32 to vector<128x128xf32>
    %116 = arith.select %21, %115, %114 : vector<128x128xi1>, vector<128x128xf32>
    %117 = tpu.concatenate %113, %109, %116 in 1 : vector<128x128xf32>, vector<128x128xf32>, vector<128x128xf32> -> vector<128x384xf32>
    %118 = arith.truncf %117 : vector<128x384xf32> to vector<128x384xbf16>
    %cst_48 = arith.constant dense<0.000000e+00> : vector<128x128xf32>
    %119 = tpu.matmul %118, %110, %cst_48 {dimension_numbers = #tpu.dot_dimension_numbers<[1], [0], [0], [1], [0, 0, 1, 1], [], []>} : vector<128x384xbf16>, vector<384x128xbf16>, vector<128x128xf32> -> vector<128x128xf32>
    %120 = vector.shape_cast %119 : vector<128x128xf32> to vector<8x16x128xf32>
    %cst_49 = arith.constant dense<0.000000e+00> : vector<8x128xf32>
    %121 = vector.multi_reduction <add>, %120, %cst_49 [1] : vector<8x16x128xf32> to vector<8x128xf32>
    %cst_50 = arith.constant dense<0.000000e+00> : vector<8x128xf32>
    %122 = tpu.matmul %121, %0, %cst_50 {dimension_numbers = #tpu.dot_dimension_numbers<[1], [0], [0], [1], [0, 0, 1, 1], [], []>} : vector<8x128xf32>, vector<128x128xf32>, vector<8x128xf32> -> vector<8x128xf32>
    %123 = vector.shape_cast %122 : vector<8x128xf32> to vector<8x1x128xf32>
    %124 = vector.broadcast %123 : vector<8x1x128xf32> to vector<8x16x128xf32>
    %125 = arith.subf %120, %124 : vector<8x16x128xf32>
    %126 = arith.mulf %125, %125 : vector<8x16x128xf32>
    %cst_51 = arith.constant dense<0.000000e+00> : vector<8x128xf32>
    %127 = vector.multi_reduction <add>, %126, %cst_51 [1] : vector<8x16x128xf32> to vector<8x128xf32>
    %cst_52 = arith.constant dense<0.000000e+00> : vector<8x128xf32>
    %128 = tpu.matmul %127, %0, %cst_52 {dimension_numbers = #tpu.dot_dimension_numbers<[1], [0], [0], [1], [0, 0, 1, 1], [], []>} : vector<8x128xf32>, vector<128x128xf32>, vector<8x128xf32> -> vector<8x128xf32>
    %129 = vector.shape_cast %128 : vector<8x128xf32> to vector<8x1x128xf32>
    %cst_53 = arith.constant 9.99999974E-6 : f32
    %130 = vector.broadcast %cst_53 : f32 to vector<8x1x128xf32>
    %131 = arith.addf %129, %130 : vector<8x1x128xf32>
    %132 = math.rsqrt %131 : vector<8x1x128xf32>
    %133 = vector.broadcast %132 : vector<8x1x128xf32> to vector<8x16x128xf32>
    %134 = arith.mulf %125, %133 : vector<8x16x128xf32>
    %135 = vector.shape_cast %134 : vector<8x16x128xf32> to vector<128x128xf32>
    %cst_54 = arith.constant 0.000000e+00 : f32
    %136 = vector.broadcast %cst_54 : f32 to vector<128x128xf32>
    %137 = arith.cmpf oge, %135, %136 : vector<128x128xf32>
    %cst_55 = arith.constant 0.00999999977 : f32
    %138 = vector.broadcast %cst_55 : f32 to vector<128x128xf32>
    %139 = arith.mulf %138, %135 : vector<128x128xf32>
    %140 = arith.select %137, %135, %139 : vector<128x128xi1>, vector<128x128xf32>
    %141 = tpu.concatenate %140, %109 in 1 : vector<128x128xf32>, vector<128x128xf32> -> vector<128x256xf32>
    %142 = arith.truncf %141 : vector<128x256xf32> to vector<128x256xbf16>
    %c0_56 = arith.constant 0 : index
    %c0_57 = arith.constant 0 : index
    %143 = vector.load %arg5[%c0_56, %c0_57] : memref<256x256xbf16, #tpu.memory_space<vmem>>, vector<256x256xbf16>
    %cst_58 = arith.constant dense<0.000000e+00> : vector<128x256xf32>
    %144 = tpu.matmul %142, %143, %cst_58 {dimension_numbers = #tpu.dot_dimension_numbers<[1], [0], [0], [1], [0, 0, 1, 1], [], []>} : vector<128x256xbf16>, vector<256x256xbf16>, vector<128x256xf32> -> vector<128x256xf32>
    %c127_i32_59 = arith.constant 127 : i32
    %145 = tpu.dynamic_rotate %140 by %c127_i32_59 dim 0 : vector<128x128xf32>, i32 -> vector<128x128xf32>
    %cst_60 = arith.constant 0.000000e+00 : f32
    %146 = vector.broadcast %cst_60 : f32 to vector<128x128xf32>
    %147 = arith.select %21, %146, %145 : vector<128x128xi1>, vector<128x128xf32>
    %148 = tpu.concatenate %140, %147 in 1 : vector<128x128xf32>, vector<128x128xf32> -> vector<128x256xf32>
    %149 = arith.truncf %148 : vector<128x256xf32> to vector<128x256xbf16>
    %c0_61 = arith.constant 0 : index
    %c0_62 = arith.constant 0 : index
    %150 = vector.load %arg6[%c0_61, %c0_62] : memref<256x256xbf16, #tpu.memory_space<vmem>>, vector<256x256xbf16>
    %cst_63 = arith.constant dense<0.000000e+00> : vector<128x256xf32>
    %151 = tpu.matmul %149, %150, %cst_63 {dimension_numbers = #tpu.dot_dimension_numbers<[1], [0], [0], [1], [0, 0, 1, 1], [], []>} : vector<128x256xbf16>, vector<256x256xbf16>, vector<128x256xf32> -> vector<128x256xf32>
    %152 = tpu.concatenate %144, %151 in 1 : vector<128x256xf32>, vector<128x256xf32> -> vector<128x512xf32>
    %153 = vector.shape_cast %152 : vector<128x512xf32> to vector<8x16x512xf32>
    %c0_64 = arith.constant 0 : index
    %c0_65 = arith.constant 0 : index
    %c0_66 = arith.constant 0 : index
    %154 = vector.load %arg7[%c0_64, %c0_65, %c0_66] : memref<8x16x512xf32, #tpu.memory_space<vmem>>, vector<8x16x512xf32>
    tpu.vector_store %arg7[%c0_64, %c0_65, %c0_66], %153 {strides = array<i32>} : memref<8x16x512xf32, #tpu.memory_space<vmem>>, vector<8x16x512xf32>,
    return
  }
  func.func @transform_0(%arg0: i32) -> (i32, i32, i32) {
    %c0_i32 = arith.constant 0 : i32
    %c0_i32_0 = arith.constant 0 : i32
    %c0_i32_1 = arith.constant 0 : i32
    return %arg0, %c0_i32, %c0_i32_0 : i32, i32, i32
  }
  func.func @transform_1(%arg0: i32) -> (i32, i32) {
    %c0_i32 = arith.constant 0 : i32
    %c0_i32_0 = arith.constant 0 : i32
    %c0_i32_1 = arith.constant 0 : i32
    return %c0_i32, %c0_i32_0 : i32, i32
  }
  func.func @transform_2(%arg0: i32) -> (i32, i32, i32) {
    %c0_i32 = arith.constant 0 : i32
    %c0_i32_0 = arith.constant 0 : i32
    %c0_i32_1 = arith.constant 0 : i32
    %c0_i32_2 = arith.constant 0 : i32
    return %c0_i32, %c0_i32_0, %c0_i32_1 : i32, i32, i32
  }
  func.func @transform_3(%arg0: i32) -> (i32, i32) {
    %c0_i32 = arith.constant 0 : i32
    %c0_i32_0 = arith.constant 0 : i32
    %c0_i32_1 = arith.constant 0 : i32
    return %c0_i32, %c0_i32_0 : i32, i32
  }
  func.func @transform_4(%arg0: i32) -> (i32, i32) {
    %c0_i32 = arith.constant 0 : i32
    %c0_i32_0 = arith.constant 0 : i32
    %c0_i32_1 = arith.constant 0 : i32
    return %c0_i32, %c0_i32_0 : i32, i32
  }
  func.func @transform_5(%arg0: i32) -> (i32, i32) {
    %c0_i32 = arith.constant 0 : i32
    %c0_i32_0 = arith.constant 0 : i32
    %c0_i32_1 = arith.constant 0 : i32
    return %c0_i32, %c0_i32_0 : i32, i32
  }
  func.func @transform_6(%arg0: i32) -> (i32, i32, i32) {
    %c0_i32 = arith.constant 0 : i32
    %c0_i32_0 = arith.constant 0 : i32
    %c0_i32_1 = arith.constant 0 : i32
    return %arg0, %c0_i32, %c0_i32_0 : i32, i32, i32
  }
}

</mosaic_0001>

<bundles_post_ra>
// kernel: decoder_residual_block.1
= control target key start
LH: loop header
LB: loop body
LE: loop exit
PB: predicated region body
PF: predicated region fallthrough
CT: control target
= control target key end

     0   :  { %11 = vsyncpa [#allocation3], 0  ;;  %s9504_s0 = inlined_call_operand.vmem [shape: f32[16,16,128], index: 0, kind: input, shape index: {}]   ;;  %s9505_s1 = inlined_call_operand.hbm [shape: f32[128,128], index: 1, kind: input, shape index: {}]   ;;  %s9506_s2 = inlined_call_operand.hbm [shape: bf16[2,384,128], index: 2, kind: input, shape index: {}]   ;;  %s9507_s3 = inlined_call_operand.hbm [shape: bf16[384,128], index: 3, kind: input, shape index: {}]   ;;  %s9508_s4 = inlined_call_operand.hbm [shape: bf16[256,256], index: 4, kind: input, shape index: {}]   ;;  %s9509_s5 = inlined_call_operand.hbm [shape: bf16[256,256], index: 5, kind: input, shape index: {}]   ;;  %s9510_s6 = inlined_call_operand.vmem [shape: f32[16,16,512], index: 6, kind: output, shape index: {}]  }
   0x1   :  { %12 = vsyncpa [#allocation5], 0 }
   0x2   :  { %13 = vsyncpa [#allocation8], 0  ;;  %s7251_s21 = smov 0  }
   0x3 LB: > { %s7202_s22 = smov [#allocation4]   ;;  %s5349_s24 = sadd.s32 4294967295, %s7200_s21   ;;  %s7200_s21 = sphi %s7251_s21, %s19_s21  }
   0x4   : > { %s206_s23 = sshll.u32 %s7202_s22, 4  ;;  %p5351_p0 = scmp.ge.s32.totalorder %s7200_s21, 1  ;;  %s7265_s23 = int_to_ptr.vmem [resolvable:$true] %s206_s23 }
   0x5   : > { %p181_p1 = scmp.lt.s32.totalorder %s7200_s21, 3  ;;  %p7261_p2 = scmp.eq.s32.totalorder %s5349_s24, 0 }
   0x6   : > { %s7203_s28 = smov [#allocation7]   ;;  %s7204_s30 = smov [#allocation2]  }
   0x7   : > { %s9601_s25 = scalar_select %p7261_p2, 1, 0 }
   0x8   : > { %p7267_p3 = pnand %p5351_p0, %p181_p1  ;;  %s232_s29 = sshll.u32 %s7203_s28, 4  ;;  %s7279_s29 = int_to_ptr.vmem [resolvable:$true] %s232_s29 }
   0x9   : > { %s193_s7 = sshll.u32 %s7204_s30, 4  ;;  %s7042_s10 = scalar_lea.hbm %s9506_s2, 6144  ;;  %s7281_s7 = int_to_ptr.vmem [resolvable:$true] %s193_s7 }
   0xa   : > { %s9602_s26 = scalar_select %p7267_p3, 1, 0 }
   0xb   : > { %p6746_p4 = pneg %p7267_p3  ;;  %p7043_p6 = scmp.ne.s32.totalorder %s9506_s2, %s7042_s10 }
   0xc   : > { %p7049_p10 = scmp.lt.u32.totalorder %s7042_s10, %s9506_s2 }
   0xd   : > { %p7275_p5 = pnand %p7261_p2, %p6746_p4 }
   0xf   : > { %p7291_p7 = pneg %p7275_p5 }
  0x11   : > { %p7045_p8 = pnand %p7291_p7, %p7043_p6 }
  0x13   : > { %p7046_p9 = pneg %p7045_p8 }
  0x15   : > { %p7051_p11 = pnand %p7049_p10, %p7046_p9 }
  0x17   : > { %7054 = shalt.err (!%p7051_p11)
}
  0x18   : > { %s7055_s16 = scalar_lea.vmem %s7265_s23, 6144  ;;  %p7063_p1 = scmp.lt.s32.totalorder %s7265_s23, %s7265_s23 }
  0x19   : > { %p7056_p12 = scmp.ne.s32.totalorder %s7265_s23, %s7055_s16  ;;  %p7064_p4 = scmp.lt.s32.totalorder %s7055_s16, %s7055_s16 }
  0x1b   : > { %p7058_p13 = pnand %p7056_p12, %p7291_p7  ;;  %p7065_p6 = por %p7064_p4, %p7063_p1 }
  0x1d   : > { %p7059_p0 = pneg %p7058_p13 }
  0x1f   : > { %p7066_p8 = pnand %p7065_p6, %p7059_p0 }
  0x21   : > { %7069 = shalt.err (!%p7066_p8)
}
  0x22   : > { %s7205_s17 = smov 64   ;;  %s7206_s18 = smov 4  }
  0x23   : > { %6752 = dma.hbm_to_vmem [thread:$0]  (!%p7275_p5), %s9506_s2, 6144, %s7265_s23, [#allocation5], %s7205_s17, %s7205_s17, %s7206_s18  }
  0x24   : > { %s7070_s30 = scalar_lea.hbm %s9508_s4, 4096 }
  0x25   : > { %p7071_p9 = scmp.ne.s32.totalorder %s9508_s4, %s7070_s30  ;;  %p7077_p12 = scmp.lt.u32.totalorder %s7070_s30, %s9508_s4 }
  0x27   : > { %p7073_p10 = pnand %p7071_p9, %p7291_p7 }
  0x29   : > { %p7074_p11 = pneg %p7073_p10 }
  0x2b   : > { %p7079_p13 = pnand %p7077_p12, %p7074_p11 }
  0x2d   : > { %7082 = shalt.err (!%p7079_p13)
}
  0x2e   : > { %s7083_s23 = scalar_lea.vmem %s7279_s29, 4096  ;;  %p7091_p6 = scmp.lt.s32.totalorder %s7279_s29, %s7279_s29 }
  0x2f   : > { %p7084_p0 = scmp.ne.s32.totalorder %s7279_s29, %s7083_s23  ;;  %p7092_p8 = scmp.lt.s32.totalorder %s7083_s23, %s7083_s23 }
  0x31   : > { %p7086_p1 = pnand %p7084_p0, %p7291_p7  ;;  %p7093_p9 = por %p7092_p8, %p7091_p6 }
  0x33   : > { %p7087_p4 = pneg %p7086_p1 }
  0x35   : > { %p7094_p10 = pnand %p7093_p9, %p7087_p4 }
  0x37   : > { %7097 = shalt.err (!%p7094_p10)
}
  0x38   : > { %s7207_s12 = smov 128   ;;  %s7208_s14 = smov 8  }
  0x39   : > { %6758 = dma.hbm_to_vmem [thread:$0]  (!%p7275_p5), %s9508_s4, 4096, %s7279_s29, [#allocation8], %s7207_s12, %s7207_s12, %s7208_s14  }
  0x3a   : > { %s7098_s22 = scalar_lea.hbm %s9505_s1, 2048 }
  0x3b   : > { %p7099_p11 = scmp.ne.s32.totalorder %s9505_s1, %s7098_s22  ;;  %p7105_p0 = scmp.lt.u32.totalorder %s7098_s22, %s9505_s1 }
  0x3d   : > { %p7101_p12 = pnand %p7099_p11, %p7291_p7 }
  0x3f   : > { %p7102_p13 = pneg %p7101_p12 }
  0x41   : > { %p7107_p1 = pnand %p7105_p0, %p7102_p13 }
  0x43   : > { %7110 = shalt.err (!%p7107_p1)
}
  0x44   : > { %s7111_s29 = scalar_lea.vmem %s7281_s7, 2048  ;;  %p7119_p9 = scmp.lt.s32.totalorder %s7281_s7, %s7281_s7 }
  0x45   : > { %p7112_p4 = scmp.ne.s32.totalorder %s7281_s7, %s7111_s29  ;;  %p7120_p10 = scmp.lt.s32.totalorder %s7111_s29, %s7111_s29 }
  0x47   : > { %p7114_p6 = pnand %p7112_p4, %p7291_p7  ;;  %p7121_p11 = por %p7120_p10, %p7119_p9 }
  0x49   : > { %p7115_p8 = pneg %p7114_p6 }
  0x4b   : > { %p7122_p12 = pnand %p7121_p11, %p7115_p8 }
  0x4d   : > { %7125 = shalt.err (!%p7122_p12)
}
  0x4e   : > { %6749 = dma.hbm_to_vmem [thread:$0]  (!%p7275_p5), %s9505_s1, 2048, %s7281_s7, [#allocation3], %s7207_s12, %s7207_s12, %s7208_s14  }
  0x4f   : > { %s7209_s23 = smov [#allocation6]   ;;  %s7210_s16 = smov [#allocation9]  }
  0x50   : > { %s219_s15 = sshll.u32 %s7209_s23, 4  ;;  %s245_s19 = sshll.u32 %s7210_s16, 4  ;;  %s220_s15 = int_to_ptr.vmem [resolvable:$true] %s219_s15  ;;  %s7367_s19 = int_to_ptr.vmem [resolvable:$true] %s245_s19 }
  0x51   : > { %s7126_s28 = scalar_lea.hbm %s9507_s3, 3072 }
  0x52   : > { %p7127_p13 = scmp.ne.s32.totalorder %s9507_s3, %s7126_s28  ;;  %p7133_p4 = scmp.lt.u32.totalorder %s7126_s28, %s9507_s3 }
  0x54   : > { %p7129_p0 = pnand %p7127_p13, %p7291_p7 }
  0x56   : > { %p7130_p1 = pneg %p7129_p0 }
  0x58   : > { %p7135_p6 = pnand %p7133_p4, %p7130_p1 }
  0x5a   : > { %7138 = shalt.err (!%p7135_p6)
}
  0x5b   : > { %s7139_s29 = scalar_lea.vmem %s220_s15, 3072  ;;  %p7147_p11 = scmp.lt.s32.totalorder %s220_s15, %s220_s15 }
  0x5c   : > { %p7140_p8 = scmp.ne.s32.totalorder %s220_s15, %s7139_s29  ;;  %p7148_p12 = scmp.lt.s32.totalorder %s7139_s29, %s7139_s29 }
  0x5e   : > { %p7142_p9 = pnand %p7140_p8, %p7291_p7  ;;  %p7149_p2 = por %p7148_p12, %p7147_p11 }
  0x60   : > { %p7143_p10 = pneg %p7142_p9 }
  0x62   : > { %p7150_p3 = pnand %p7149_p2, %p7143_p10 }
  0x64   : > { %7153 = shalt.err (!%p7150_p3)
}
  0x65   : > { %6755 = dma.hbm_to_vmem [thread:$0]  (!%p7275_p5), %s9507_s3, 3072, %s220_s15, [#allocation5], %s7205_s17, %s7205_s17, %s7206_s18  }
  0x66   : > { %s7154_s20 = scalar_lea.hbm %s9509_s5, 4096 }
  0x67   : > { %p7155_p13 = scmp.ne.s32.totalorder %s9509_s5, %s7154_s20  ;;  %p7161_p0 = scmp.lt.u32.totalorder %s7154_s20, %s9509_s5 }
  0x69   : > { %p7157_p2 = pnand %p7155_p13, %p7291_p7 }
  0x6b   : > { %p7158_p3 = pneg %p7157_p2 }
  0x6d   : > { %p7163_p1 = pnand %p7161_p0, %p7158_p3 }
  0x6f   : > { %7166 = shalt.err (!%p7163_p1)
}
  0x70   : > { %s7167_s17 = scalar_lea.vmem %s7367_s19, 4096  ;;  %p7175_p9 = scmp.lt.s32.totalorder %s7367_s19, %s7367_s19 }
  0x71   : > { %p7168_p4 = scmp.ne.s32.totalorder %s7367_s19, %s7167_s17  ;;  %p7176_p10 = scmp.lt.s32.totalorder %s7167_s17, %s7167_s17 }
  0x73   : > { %p7170_p6 = pnand %p7168_p4, %p7291_p7  ;;  %p7177_p11 = por %p7176_p10, %p7175_p9 }
  0x75   : > { %p7171_p8 = pneg %p7170_p6 }
  0x77   : > { %p7178_p12 = pnand %p7177_p11, %p7171_p8 }
  0x79   : > { %7181 = shalt.err (!%p7178_p12)
}
  0x7a   : > { %6761 = dma.hbm_to_vmem [thread:$0]  (!%p7275_p5), %s9509_s5, 4096, %s7367_s19, [#allocation8], %s7207_s12, %s7207_s12, %s7208_s14  }
  0x7b   : > { %p9605_p13 = scmp.ne.s32.totalorder %s9602_s26, 0 }
  0x7d   : > { %271 = sbr.rel (%p9605_p13) target bundleno = 3327 (0xcff), region = 44 }
  0x84   : > { %p9606_p7 = scmp.ne.s32.totalorder %s9601_s25, 0 }
  0x86   : > { %7187 = dma.done.wait (%p9606_p7), [#allocation3], 2048  }
  0x87   : > { %7189 = vsyncadd (%p9606_p7), [#allocation3], 4294965248 }
  0x88   : > { %7191 = dma.done.wait (%p9606_p7), [#allocation5], 9216  }
  0x89   : > { %7193 = vsyncadd (%p9606_p7), [#allocation5], 4294958080 }
  0x8a   : > { %7195 = dma.done.wait (%p9606_p7), [#allocation8], 8192  }
  0x8b   : > { %7197 = vsyncadd (%p9606_p7), [#allocation8], 4294959104  ;;  %s5364_s26 = sshll.u32 %s5349_s24, 3  ;;  %v9535_v0 = vmov 0.0|0.0   ;;  %vm9524_vm0 = vmmov 0   ;;  %v9514_v1 = vmov 0.0  }
  0x8c   : > { %6502 = vmatprep.subr.bf16.mxu0 %v9535_v0  ;;  %6158 = vmatprep.mubr.msk.f32.mxu0 %vm9524_vm0, %v9514_v1  ;;  %p320_p5 = scmp.lt.s32.totalorder %s5364_s26, 15  ;;  %v334_v2 = vld [vmem:[#allocation2] sm:$0xff]  ;;  %v335_v3 = vld [vmem:[#allocation2 + $0x8] sm:$0xff]  ;;  %v336_v4 = vld [vmem:[#allocation2 + $0x10] sm:$0xff]  ;;  %vm9523_vm1 = vcmask 1041409   ;;  %vm9522_vm2 = vcmask 1042434  }
  0x8d   : > { %6526 = vmatprep.subr.bf16.mxu1 %v9535_v0  ;;  %6193 = vmatprep.mubr.msk.f32.mxu1 %vm9524_vm0, %v9514_v1  ;;  %v7441_v5 = vpack.c.bf16 %v335_v3, %v334_v2  ;;  %v337_v6 = vld [vmem:[#allocation2 + $0x18] sm:$0xff]  ;;  %v338_v7 = vld [vmem:[#allocation2 + $0x20] sm:$0xff]  ;;  %v339_v9 = vld [vmem:[#allocation2 + $0x28] sm:$0xff]  ;;  %vm9521_vm3 = vcmask 1043459   ;;  %vm9519_vm4 = vcmask 1044484   ;;  %vm9518_vm5 = vcmask 1045509  }
  0x8e   : > { %s9877_s26 = smov (!%p320_p5, %s5364_s26), 15  ;;  %v7449_v8 = vpack.c.bf16 %v337_v6, %v336_v4  ;;  %v340_v10 = vld [vmem:[#allocation2 + $0x30] sm:$0xff]  ;;  %v341_v11 = vld [vmem:[#allocation2 + $0x38] sm:$0xff]  ;;  %v342_v12 = vld [vmem:[#allocation2 + $0x40] sm:$0xff]  ;;  %v7472_v22 = vpack.c.bf16 %v339_v9, %v338_v7  ;;  %vm9517_vm6 = vcmask 1046534   ;;  %vm9516_vm7 = vcmask 1047559  }
  0x8f   : > { %s5732_s25 = sshll.u32 %s9877_s26, 4  ;;  %6504 = vmatpush3.bf16.msra.mxu0 %v7441_v5  ;;  %6528 = vmatpush3.bf16.msra.mxu1 %v7441_v5  ;;  %v343_v13 = vld [vmem:[#allocation2 + $0x48] sm:$0xff]  ;;  %v344_v14 = vld [vmem:[#allocation2 + $0x50] sm:$0xff]  ;;  %v345_v15 = vld [vmem:[#allocation2 + $0x58] sm:$0xff]  ;;  %v7487_v27 = vpack.c.bf16 %v341_v11, %v340_v10  ;;  %s5733_s12 = sshll.u32 %s9877_s26, 6 }
  0x90   : > { %s7446_s13 = scalar_lea.vmem %s9504_s0, %s5732_s25  ;;  %6505 = vmatprep.subr.bf16.mxu0 %v9535_v0  ;;  %6529 = vmatprep.subr.bf16.mxu1 %v9535_v0  ;;  %v7503_v34 = vpack.c.bf16 %v343_v13, %v342_v12  ;;  %v7505_v35 = vpack.c.bf16 %v345_v15, %v344_v14  ;;  %v346_v15 = vld [vmem:[#allocation2 + $0x60] sm:$0xff]  ;;  %s9435_s9 = scalar_lea.vmem %s9510_s6, %s5733_s12 }
  0x91   : > { %v7455_v16 = vld [vmem:[%s7446_s13] sm:$0xff]  ;;  %v7458_v17 = vld [vmem:[%s7446_s13 + $0x8] sm:$0xff]  ;;  %v7461_v18 = vld [vmem:[%s7446_s13 + $0x10] sm:$0xff]  ;;  %9607 = vst [vmem:[#allocation13_spill] sm:$0xff] %v7487_v27 }
  0x92   : > { %v7464_v19 = vld [vmem:[%s7446_s13 + $0x18] sm:$0xff]  ;;  %v7467_v20 = vld [vmem:[%s7446_s13 + $0x20] sm:$0xff]  ;;  %v607_v21 = vadd.f32 %v7458_v17, %v7455_v16  ;;  %v7475_v23 = vld [vmem:[%s7446_s13 + $0x28] sm:$0xff]  ;;  %9608 = vst [vmem:[#allocation14_spill] sm:$0xff] %v7503_v34 }
  0x93   : > { %6507 = vmatpush3.bf16.msra.mxu0 %v7449_v8  ;;  %v7478_v24 = vld [vmem:[%s7446_s13 + $0x30] sm:$0xff]  ;;  %v7481_v25 = vld [vmem:[%s7446_s13 + $0x38] sm:$0xff]  ;;  %v614_v26 = vadd.f32 %v7464_v19, %v7461_v18  ;;  %6531 = vmatpush3.bf16.msra.mxu1 %v7449_v8  ;;  %v7490_v28 = vld [vmem:[%s7446_s13 + $0x40] sm:$0xff]  ;;  %v621_v32 = vadd.f32 %v7475_v23, %v7467_v20  ;;  %9609 = vst [vmem:[#allocation15_spill] sm:$0xff] %v7505_v35 }
  0x94   : > { %6508 = vmatprep.subr.bf16.mxu0 %v9535_v0  ;;  %v7493_v29 = vld [vmem:[%s7446_s13 + $0x48] sm:$0xff]  ;;  %v7496_v30 = vld [vmem:[%s7446_s13 + $0x50] sm:$0xff]  ;;  %v608_v31 = vrot.slane %v607_v21, 4  ;;  %v628_v33 = vadd.f32 %v7481_v25, %v7478_v24  ;;  %6532 = vmatprep.subr.bf16.mxu1 %v9535_v0  ;;  %v7508_v36 = vld [vmem:[%s7446_s13 + $0x58] sm:$0xff] }
  0x95   : > { %v7511_v37 = vld [vmem:[%s7446_s13 + $0x60] sm:$0xff]  ;;  %v7514_v38 = vld [vmem:[%s7446_s13 + $0x68] sm:$0xff]  ;;  %v615_v39 = vrot.slane %v614_v26, 4  ;;  %v635_v40 = vadd.f32 %v7493_v29, %v7490_v28  ;;  %v7519_v41 = vld [vmem:[%s7446_s13 + $0x70] sm:$0xff]  ;;  %v622_v44 = vrot.slane %v621_v32, 4  ;;  %v642_v46 = vadd.f32 %v7508_v36, %v7496_v30 }
  0x96   : > { %v7522_v42 = vld [vmem:[%s7446_s13 + $0x78] sm:$0xff]  ;;  %v609_v43 = vadd.f32 %v608_v31, %v607_v21  ;;  %v629_v45 = vrot.slane %v628_v33, 4  ;;  %v649_v49 = vadd.f32 %v7514_v38, %v7511_v37  ;;  %v347_v21 = vld [vmem:[#allocation2 + $0x68] sm:$0xff] }
  0x97   : > { %6510 = vmatpush3.bf16.msra.mxu0 %v7472_v22  ;;  %v616_v47 = vadd.f32 %v615_v39, %v614_v26  ;;  %v636_v48 = vrot.slane %v635_v40, 4  ;;  %v656_v50 = vadd.f32 %v7522_v42, %v7519_v41  ;;  %6534 = vmatpush3.bf16.msra.mxu1 %v7472_v22  ;;  %v623_v52 = vadd.f32 %v622_v44, %v621_v32 }
  0x98   : > { %6511 = vmatprep.subr.bf16.mxu0 %v9535_v0  ;;  %v610_v51 = vrot.slane %v609_v43, 2  ;;  %v630_v53 = vadd.f32 %v629_v45, %v628_v33  ;;  %v643_v54 = vrot.slane %v642_v46, 4  ;;  %6535 = vmatprep.subr.bf16.mxu1 %v9535_v0  ;;  %v650_v57 = vrot.slane %v649_v49, 4 }
  0x99   : > { %v617_v55 = vrot.slane %v616_v47, 2  ;;  %v637_v56 = vadd.f32 %v636_v48, %v635_v40  ;;  %v657_v58 = vrot.slane %v656_v50, 4  ;;  %v624_v60 = vrot.slane %v623_v52, 2 }
  0x9a   : > { %v611_v59 = vadd.f32 %v610_v51, %v609_v43  ;;  %v631_v61 = vrot.slane %v630_v53, 2  ;;  %v644_v62 = vadd.f32 %v643_v54, %v642_v46  ;;  %v651_v3 = vadd.f32 %v650_v57, %v649_v49 }
  0x9b   : > { %6513 = vmatpush3.bf16.msra.mxu0 %v7487_v27  ;;  %v618_v63 = vadd.f32 %v617_v55, %v616_v47  ;;  %v638_v2 = vrot.slane %v637_v56, 2  ;;  %v658_v4 = vadd.f32 %v657_v58, %v656_v50  ;;  %6537 = vmatpush3.bf16.msra.mxu1 %v7487_v27  ;;  %v625_v7 = vadd.f32 %v624_v60, %v623_v52  ;;  %v348_v52 = vld [vmem:[#allocation2 + $0x70] sm:$0xff] }
  0x9c   : > { %6514 = vmatprep.subr.bf16.mxu0 %v9535_v0  ;;  %v612_v6 = vrot.slane %v611_v59, 1  ;;  %v632_v9 = vadd.f32 %v631_v61, %v630_v53  ;;  %v645_v10 = vrot.slane %v644_v62, 2  ;;  %6538 = vmatprep.subr.bf16.mxu1 %v9535_v0  ;;  %v652_v13 = vrot.slane %v651_v3, 2  ;;  %v349_v53 = vld [vmem:[#allocation2 + $0x78] sm:$0xff] }
  0x9d   : > { %v619_v11 = vrot.slane %v618_v63, 1  ;;  %v639_v12 = vadd.f32 %v638_v2, %v637_v56  ;;  %v659_v14 = vrot.slane %v658_v4, 2  ;;  %v626_v31 = vrot.slane %v625_v7, 1 }
  0x9e   : > { %v613_v26 = vadd.f32 %v612_v6, %v611_v59  ;;  %v633_v32 = vrot.slane %v632_v9, 1  ;;  %v646_v33 = vadd.f32 %v645_v10, %v644_v62  ;;  %v653_v43 = vadd.f32 %v652_v13, %v651_v3 }
  0x9f   : > { %6516 = vmatpush3.bf16.msra.mxu0 %v7503_v34  ;;  %v620_v39 = vadd.f32 %v619_v11, %v618_v63  ;;  %v640_v40 = vrot.slane %v639_v12, 1  ;;  %v660_v44 = vadd.f32 %v659_v14, %v658_v4  ;;  %6540 = vmatpush3.bf16.msra.mxu1 %v7503_v34  ;;  %v627_v45 = vadd.f32 %v626_v31, %v625_v7 }
  0xa0   : > { %6517 = vmatprep.subr.bf16.mxu0 %v9535_v0  ;;  %v634_v46 = vadd.f32 %v633_v32, %v632_v9  ;;  %v647_v47 = vrot.slane %v646_v33, 1  ;;  %6541 = vmatprep.subr.bf16.mxu1 %v9535_v0  ;;  %v654_v49 = vrot.slane %v653_v43, 1  ;;  %v7545_v56 = vpack.c.bf16 %v347_v21, %v346_v15 }
  0xa1   : > { %v641_v48 = vadd.f32 %v640_v40, %v639_v12  ;;  %v661_v50 = vrot.slane %v660_v44, 1  ;;  %v672_v51 = vsel %vm9523_vm1, %v620_v39, %v613_v26  ;;  %v7554_v61 = vpack.c.bf16 %v349_v53, %v348_v52 }
  0xa2   : > { %v648_v54 = vadd.f32 %v647_v47, %v646_v33  ;;  %v674_v55 = vsel %vm9522_vm2, %v627_v45, %v672_v51  ;;  %9610 = vst [vmem:[#allocation16_spill] sm:$0xff] %v7545_v56  ;;  %v655_v58 = vadd.f32 %v654_v49, %v653_v43  ;;  %v350_v3 = vlaneseq }
  0xa3   : > { %6519 = vmatpush3.bf16.msra.mxu0 %v7505_v35  ;;  %v676_v57 = vsel %vm9521_vm3, %v634_v46, %v674_v55  ;;  %6543 = vmatpush3.bf16.msra.mxu1 %v7505_v35  ;;  %9611 = vst [vmem:[#allocation17_spill] sm:$0xff] %v7554_v61  ;;  %v662_v62 = vadd.f32 %v661_v50, %v660_v44  ;;  %v7214_v4 = vmov 1966171168  }
  0xa4   : > { %6520 = vmatprep.subr.bf16.mxu0 %v9535_v0  ;;  %v678_v59 = vsel %vm9519_vm4, %v641_v48, %v676_v57  ;;  %6544 = vmatprep.subr.bf16.mxu1 %v9535_v0  ;;  %v759_v6 = vunpack.c.l.s4 %v7214_v4  ;;  %v7563_v7 = vshrl.u32 %v350_v3, 7 }
  0xa5   : > { %v680_v60 = vsel %vm9518_vm5, %v648_v54, %v678_v59 }
  0xa6   : > { %v682_v63 = vsel %vm9517_vm6, %v655_v58, %v680_v60  ;;  %v760_v9 = vunpack.c.0.s8 %v759_v6  ;;  %v7570_v15 = vsub.s32 0, %v7563_v7  ;;  %vm9526_vm8 = vcmp.lt.s32.totalorder %v7563_v7, 7 }
  0xa7   : > { %6522 = vmatpush3.bf16.msra.mxu0 %v7545_v56  ;;  %6546 = vmatpush3.bf16.msra.mxu1 %v7545_v56  ;;  %v684_v2 = vsel %vm9516_vm7, %v662_v62, %v682_v63  ;;  %vm9556_vm13 = vcmp.lt.s32.totalorder %v7563_v7, 1 }
  0xa8   : > { %6523 = vmatprep.subr.bf16.mxu0 %v9535_v0  ;;  %6547 = vmatprep.subr.bf16.mxu1 %v9535_v0  ;;  %v7566_v10 = vsub.s32 %v760_v9, %v7563_v7 }
  0xab   : > { %6525 = vmatpush3.bf16.msra.mxu0 %v7554_v61  ;;  %6549 = vmatpush3.bf16.msra.mxu1 %v7554_v61 }
  0xae   : > { %6159 = vmatmul.mubr.f32.vlgmr.msra.gmra.mrb[0].mxu0 %v684_v2 }
 0x181   : > { %v752_v11 = vpop.f32.mrb[0].mxu0 }
 0x182   : > { %v757_v12 = vcombine.high %v752_v11, %v752_v11  ;;  %v764_v13 = vrot.slane %v752_v11, %v7566_v10  ;;  %v6160_v14 = vpop.f32.mrb[1].mxu0 }
 0x184   : > { %v771_v21 = vrot.slane %v757_v12, %v7566_v10  ;;  %v772_v26 = vcombine.high %v764_v13, %v764_v13  ;;  %v780_v31 = vrot.slane %v764_v13, %v7566_v10 }
 0x186   : > { %v773_v32 = vcombine.high %v771_v21, %v771_v21  ;;  %v787_v33 = vrot.slane %v771_v21, %v7566_v10  ;;  %v794_v39 = vrot.slane %v772_v26, %v7566_v10  ;;  %v802_v40 = vcombine.high %v780_v31, %v780_v31 }
 0x187   : > { %v809_v43 = vrot.slane %v780_v31, %v7570_v15 }
 0x188   : > { %v801_v44 = vrot.slane %v773_v32, %v7566_v10  ;;  %v803_v45 = vcombine.high %v787_v33, %v787_v33  ;;  %v804_v46 = vcombine.high %v794_v39, %v794_v39  ;;  %v813_v47 = vrot.slane %v794_v39, %v7570_v15 }
 0x189   : > { %v817_v48 = vrot.slane %v802_v40, %v7570_v15  ;;  %v825_v49 = vrot.slane %v787_v33, %v7570_v15  ;;  %v7582_v50 = vsub.f32 %v7455_v16, %v809_v43  ;;  %v7585_v51 = vsub.f32 %v7458_v17, %v809_v43 }
 0x18a   : > { %v805_v52 = vcombine.high %v801_v44, %v801_v44  ;;  %v821_v53 = vrot.slane %v804_v46, %v7570_v15  ;;  %v829_v54 = vrot.slane %v801_v44, %v7570_v15  ;;  %v833_v55 = vrot.slane %v803_v45, %v7570_v15 }
 0x18b   : > { %v7591_v57 = vsub.f32 %v7461_v18, %v813_v47  ;;  %v7594_v58 = vsub.f32 %v7464_v19, %v813_v47  ;;  %v7597_v59 = vsub.f32 %v7467_v20, %v817_v48  ;;  %v7600_v16 = vsub.f32 %v7475_v23, %v817_v48 }
 0x18c   : > { %v837_v17 = vrot.slane %v805_v52, %v7570_v15  ;;  %v7604_v60 = vsub.f32 %v7478_v24, %v821_v53  ;;  %v7607_v62 = vsub.f32 %v7481_v25, %v821_v53  ;;  %v7610_v18 = vsub.f32 %v7490_v28, %v825_v49 }
 0x18d   : > { %v7613_v19 = vsub.f32 %v7493_v29, %v825_v49  ;;  %v7616_v20 = vsub.f32 %v7496_v30, %v829_v54  ;;  %v7619_v23 = vsub.f32 %v7508_v36, %v829_v54  ;;  %v7622_v63 = vsub.f32 %v7511_v37, %v833_v55 }
 0x18e   : > { %v7625_v24 = vsub.f32 %v7514_v38, %v833_v55  ;;  %v7628_v25 = vsub.f32 %v7519_v41, %v837_v17  ;;  %v7631_v28 = vsub.f32 %v7522_v42, %v837_v17  ;;  %v862_v29 = vmul.f32 %v7582_v50, %v7582_v50 }
 0x18f   : > { %v863_v30 = vmul.f32 %v7585_v51, %v7585_v51  ;;  %v864_v36 = vmul.f32 %v7591_v57, %v7591_v57  ;;  %v865_v37 = vmul.f32 %v7594_v58, %v7594_v58  ;;  %v866_v38 = vmul.f32 %v7597_v59, %v7597_v59 }
 0x190   : > { %v867_v41 = vmul.f32 %v7600_v16, %v7600_v16  ;;  %v868_v42 = vmul.f32 %v7604_v60, %v7604_v60  ;;  %v869_v2 = vmul.f32 %v7607_v62, %v7607_v62  ;;  %v870_v3 = vmul.f32 %v7610_v18, %v7610_v18 }
 0x191   : > { %v871_v4 = vmul.f32 %v7613_v19, %v7613_v19  ;;  %v872_v6 = vmul.f32 %v7616_v20, %v7616_v20  ;;  %v873_v9 = vmul.f32 %v7619_v23, %v7619_v23  ;;  %v874_v11 = vmul.f32 %v7622_v63, %v7622_v63 }
 0x192   : > { %v875_v12 = vmul.f32 %v7625_v24, %v7625_v24  ;;  %v878_v13 = vadd.f32 %v863_v30, %v862_v29  ;;  %v885_v14 = vadd.f32 %v865_v37, %v864_v36  ;;  %v892_v21 = vadd.f32 %v867_v41, %v866_v38 }
 0x193   : > { %v899_v26 = vadd.f32 %v869_v2, %v868_v42  ;;  %v906_v31 = vadd.f32 %v871_v4, %v870_v3  ;;  %v913_v32 = vadd.f32 %v873_v9, %v872_v6  ;;  %v876_v33 = vmul.f32 %v7628_v25, %v7628_v25 }
 0x194   : > { %v879_v39 = vrot.slane %v878_v13, 4  ;;  %v886_v40 = vrot.slane %v885_v14, 4  ;;  %v893_v43 = vrot.slane %v892_v21, 4  ;;  %v877_v44 = vmul.f32 %v7631_v28, %v7631_v28 }
 0x195   : > { %v900_v45 = vrot.slane %v899_v26, 4  ;;  %v907_v46 = vrot.slane %v906_v31, 4  ;;  %v914_v47 = vrot.slane %v913_v32, 4  ;;  %v920_v48 = vadd.f32 %v875_v12, %v874_v11 }
 0x196   : > { %v880_v49 = vadd.f32 %v879_v39, %v878_v13  ;;  %v887_v52 = vadd.f32 %v886_v40, %v885_v14  ;;  %v894_v53 = vadd.f32 %v893_v43, %v892_v21  ;;  %v927_v54 = vadd.f32 %v877_v44, %v876_v33 }
 0x197   : > { %v901_v55 = vadd.f32 %v900_v45, %v899_v26  ;;  %v908_v17 = vadd.f32 %v907_v46, %v906_v31  ;;  %v915_v29 = vadd.f32 %v914_v47, %v913_v32  ;;  %v921_v30 = vrot.slane %v920_v48, 4 }
 0x198   : > { %v881_v36 = vrot.slane %v880_v49, 2  ;;  %v888_v37 = vrot.slane %v887_v52, 2  ;;  %v895_v38 = vrot.slane %v894_v53, 2  ;;  %v928_v41 = vrot.slane %v927_v54, 4 }
 0x199   : > { %v902_v42 = vrot.slane %v901_v55, 2  ;;  %v909_v2 = vrot.slane %v908_v17, 2  ;;  %v916_v3 = vrot.slane %v915_v29, 2  ;;  %v922_v4 = vadd.f32 %v921_v30, %v920_v48 }
 0x19a   : > { %v882_v6 = vadd.f32 %v881_v36, %v880_v49  ;;  %v889_v9 = vadd.f32 %v888_v37, %v887_v52  ;;  %v896_v1 = vadd.f32 %v895_v38, %v894_v53  ;;  %v929_v11 = vadd.f32 %v928_v41, %v927_v54 }
 0x19b   : > { %v903_v12 = vadd.f32 %v902_v42, %v901_v55  ;;  %v910_v13 = vadd.f32 %v909_v2, %v908_v17  ;;  %v917_v14 = vadd.f32 %v916_v3, %v915_v29  ;;  %v923_v21 = vrot.slane %v922_v4, 2  ;;  %v6794_v2 = vld [vmem:[#allocation4 + $0x80] sm:$0xff]  }
 0x19c   : > { %v883_v26 = vrot.slane %v882_v6, 1  ;;  %v890_v31 = vrot.slane %v889_v9, 1  ;;  %v897_v32 = vrot.slane %v896_v1, 1  ;;  %v930_v33 = vrot.slane %v929_v11, 2  ;;  %6196 = vmatprep.subr.bf16.mxu1 %v6794_v2  ;;  %v6795_v3 = vld [vmem:[#allocation4 + $0x40] sm:$0xff]  }
 0x19d   : > { %v904_v39 = vrot.slane %v903_v12, 1  ;;  %v911_v40 = vrot.slane %v910_v13, 1  ;;  %v918_v43 = vrot.slane %v917_v14, 1  ;;  %v924_v44 = vadd.f32 %v923_v21, %v922_v4  ;;  %v6796_v4 = vld [vmem:[#allocation4] sm:$0xff]   ;;  %5784 = vmatprep.subr.bf16.mxu0 %v6795_v3  ;;  %v6803_v21 = vld [vmem:[#allocation4 + $0x98] sm:$0xff]  }
 0x19e   : > { %v884_v45 = vadd.f32 %v883_v26, %v882_v6  ;;  %v891_v46 = vadd.f32 %v890_v31, %v889_v9  ;;  %v898_v47 = vadd.f32 %v897_v32, %v896_v1  ;;  %v931_v48 = vadd.f32 %v930_v33, %v929_v11  ;;  %v6797_v6 = vld [vmem:[#allocation4 + $0x88] sm:$0xff]   ;;  %5785 = vmatpush3.bf16.msra.mxu0 %v6796_v4  ;;  %v6804_v26 = vld [vmem:[#allocation4 + $0x58] sm:$0xff]   ;;  %v6806_v32 = vld [vmem:[#allocation4 + $0xa0] sm:$0xff]  }
 0x19f   : > { %v905_v49 = vadd.f32 %v904_v39, %v903_v12  ;;  %v925_v52 = vrot.slane %v924_v44, 1  ;;  %v912_v55 = vadd.f32 %v911_v40, %v910_v13  ;;  %v919_v29 = vadd.f32 %v918_v43, %v917_v14  ;;  %v6798_v9 = vld [vmem:[#allocation4 + $0x48] sm:$0xff]   ;;  %v6800_v12 = vld [vmem:[#allocation4 + $0x90] sm:$0xff]   ;;  %v6805_v31 = vld [vmem:[#allocation4 + $0x18] sm:$0xff]  }
 0x1a0   : > { %v932_v53 = vrot.slane %v931_v48, 1  ;;  %v942_v54 = vsel %vm9523_vm1, %v891_v46, %v884_v45  ;;  %v6799_v11 = vld [vmem:[#allocation4 + $0x8] sm:$0xff]   ;;  %5786 = vmatprep.subr.bf16.mxu0 %v6798_v9  ;;  %v6801_v13 = vld [vmem:[#allocation4 + $0x50] sm:$0xff]   ;;  %v6807_v33 = vld [vmem:[#allocation4 + $0x60] sm:$0xff]  }
 0x1a1   : > { %v943_v17 = vsel %vm9522_vm2, %v898_v47, %v942_v54  ;;  %v926_v36 = vadd.f32 %v925_v52, %v924_v44  ;;  %v6802_v14 = vld [vmem:[#allocation4 + $0x10] sm:$0xff]   ;;  %v6808_v39 = vld [vmem:[#allocation4 + $0x20] sm:$0xff]   ;;  %v6809_v40 = vld [vmem:[#allocation4 + $0xa8] sm:$0xff]  }
 0x1a2   : > { %v944_v30 = vsel %vm9521_vm3, %v905_v49, %v943_v17  ;;  %v933_v38 = vadd.f32 %v932_v53, %v931_v48  ;;  %5787 = vmatpush3.bf16.msra.mxu0 %v6799_v11  ;;  %v6810_v43 = vld [vmem:[#allocation4 + $0x68] sm:$0xff]   ;;  %v6812_v45 = vld [vmem:[#allocation4 + $0xb0] sm:$0xff]   ;;  %v6815_v48 = vld [vmem:[#allocation4 + $0xb8] sm:$0xff]  }
 0x1a3   : > { %v945_v37 = vsel %vm9519_vm4, %v912_v55, %v944_v30  ;;  %5788 = vmatprep.subr.bf16.mxu0 %v6801_v13  ;;  %v6811_v44 = vld [vmem:[#allocation4 + $0x28] sm:$0xff]   ;;  %v6813_v46 = vld [vmem:[#allocation4 + $0x70] sm:$0xff]   ;;  %v6816_v49 = vld [vmem:[#allocation4 + $0x78] sm:$0xff]  }
 0x1a4   : > { %v946_v41 = vsel %vm9518_vm5, %v919_v29, %v945_v37  ;;  %v6814_v47 = vld [vmem:[#allocation4 + $0x30] sm:$0xff]   ;;  %v6817_v52 = vld [vmem:[#allocation4 + $0x38] sm:$0xff]   ;;  %vm7215_vm5 = vmmov 1  }
 0x1a5   : > { %v947_v1 = vsel %vm9517_vm6, %v926_v36, %v946_v41 }
 0x1a6   : > { %v948_v42 = vsel %vm9516_vm7, %v933_v38, %v947_v1  ;;  %5789 = vmatpush3.bf16.msra.mxu0 %v6802_v14 }
 0x1a7   : > { %6194 = vmatmul.mubr.f32.vlgmr.msra.gmra.mrb[0].mxu1 %v948_v42  ;;  %5790 = vmatprep.subr.bf16.mxu0 %v6804_v26 }
 0x1a8   : > { %6197 = vmatpush3.bf16.msra.mxu1 %v6794_v2 }
 0x1a9   : > { %6198 = vmatprep.subr.bf16.mxu1 %v6797_v6 }
 0x1aa   : > { %5791 = vmatpush3.bf16.msra.mxu0 %v6805_v31  ;;  %v352_v31 = vadd.s32 8, %v7563_v7 }
 0x1ab   : > { %5792 = vmatprep.subr.bf16.mxu0 %v6807_v33  ;;  %v356_v33 = vadd.s32 40, %v7563_v7 }
 0x1ac   : > { %6199 = vmatpush3.bf16.msra.mxu1 %v6797_v6 }
 0x1ad   : > { %6200 = vmatprep.subr.bf16.mxu1 %v6800_v12 }
 0x1ae   : > { %5793 = vmatpush3.bf16.msra.mxu0 %v6808_v39  ;;  %v7684_v39 = vadd.s32 56, %v7563_v7 }
 0x1af   : > { %5794 = vmatprep.subr.bf16.mxu0 %v6810_v43  ;;  %v7690_v43 = vadd.s32 16, %v7563_v7 }
 0x1b0   : > { %6201 = vmatpush3.bf16.msra.mxu1 %v6800_v12 }
 0x1b1   : > { %6202 = vmatprep.subr.bf16.mxu1 %v6803_v21 }
 0x1b2   : > { %5795 = vmatpush3.bf16.msra.mxu0 %v6811_v44 }
 0x1b3   : > { %5796 = vmatprep.subr.bf16.mxu0 %v6813_v46  ;;  %v7693_v46 = vadd.s32 88, %v7563_v7 }
 0x1b4   : > { %6203 = vmatpush3.bf16.msra.mxu1 %v6803_v21 }
 0x1b5   : > { %6204 = vmatprep.subr.bf16.mxu1 %v6806_v32 }
 0x1b6   : > { %5797 = vmatpush3.bf16.msra.mxu0 %v6814_v47  ;;  %v7696_v47 = vadd.s32 104, %v7563_v7 }
 0x1b7   : > { %5798 = vmatprep.subr.bf16.mxu0 %v6816_v49 }
 0x1b8   : > { %6205 = vmatpush3.bf16.msra.mxu1 %v6806_v32  ;;  %v354_v32 = vadd.s32 24, %v7563_v7 }
 0x1b9   : > { %6206 = vmatprep.subr.bf16.mxu1 %v6809_v40 }
 0x1ba   : > { %5799 = vmatpush3.bf16.msra.mxu0 %v6817_v52  ;;  %v392_v49 = vand.u32 15, %v354_v32 }
 0x1bb   : > { %6574 = vmatprep.subr.bf16.mxu0 %v9535_v0 }
 0x1bc   : > { %6207 = vmatpush3.bf16.msra.mxu1 %v6809_v40  ;;  %v7687_v40 = vadd.s32 72, %v7563_v7  ;;  %vm7721_vm12 = vcmp.ne.s32.totalorder %v392_v49, 15 }
 0x1bd   : > { %6208 = vmatprep.subr.bf16.mxu1 %v6812_v45 }
 0x1c0   : > { %6209 = vmatpush3.bf16.msra.mxu1 %v6812_v45  ;;  %v378_v45 = vand.u32 15, %v352_v31 }
 0x1c1   : > { %6210 = vmatprep.subr.bf16.mxu1 %v6815_v48 }
 0x1c2   : > { %vm7708_vm9 = vcmp.ne.s32.totalorder %v378_v45, 15 }
 0x1c3   : > { %vm7785_vm4 = vmpackc.low %vm7708_vm9, %vm7215_vm5 }
 0x1c4   : > { %6211 = vmatpush3.bf16.msra.mxu1 %v6815_v48  ;;  %vm7804_vm9 = vmpackc.low %vm7721_vm12, %vm7215_vm5 }
 0x1c5   : > { %6550 = vmatprep.subr.bf16.mxu1 %v9535_v0 }
 0x27a   : > { %v1016_v53 = vpop.f32.mrb[0].mxu1 }
 0x27b   : > { %v1021_v54 = vcombine.high %v1016_v53, %v1016_v53  ;;  %v1028_v55 = vrot.slane %v1016_v53, %v7566_v10  ;;  %v6195_v17 = vpop.f32.mrb[1].mxu1  ;;  %v406_v53 = vand.u32 15, %v356_v33 }
 0x27c   : > { %v434_v17 = vand.u32 15, %v7687_v40 }
 0x27d   : > { %v1035_v29 = vrot.slane %v1021_v54, %v7566_v10  ;;  %v1036_v30 = vcombine.high %v1028_v55, %v1028_v55  ;;  %v1044_v36 = vrot.slane %v1028_v55, %v7566_v10  ;;  %v371_v54 = vand.u32 15, %v7563_v7 }
 0x27e   : > { %v420_v55 = vand.u32 15, %v7684_v39  ;;  %vm7743_vm7 = vcmp.ne.s32.totalorder %v406_v53, 15 }
 0x27f   : > { %v1037_v37 = vcombine.high %v1035_v29, %v1035_v29  ;;  %v1051_v38 = vrot.slane %v1035_v29, %v7566_v10  ;;  %v1058_v41 = vrot.slane %v1036_v30, %v7566_v10  ;;  %v1066_v1 = vcombine.high %v1044_v36, %v1044_v36 }
 0x280   : > { %v1078_v42 = vadd.f32 1e-05, %v1044_v36  ;;  %vm7753_vm6 = vcmp.ne.s32.totalorder %v371_v54, 0 }
 0x281   : > { %v1065_v2 = vrot.slane %v1037_v37, %v7566_v10  ;;  %v1067_v3 = vcombine.high %v1051_v38, %v1051_v38  ;;  %v1068_v4 = vcombine.high %v1058_v41, %v1058_v41  ;;  %v1079_v6 = vadd.f32 1e-05, %v1058_v41 }
 0x282   : > { %v1080_v9 = vadd.f32 1e-05, %v1066_v1  ;;  %6962 = vrsqrt.f32 %v1078_v42  ;;  %v1082_v13 = vadd.f32 1e-05, %v1051_v38  ;;  %v385_v38 = vand.u32 15, %v7690_v43 }
 0x283   : > { %v1069_v11 = vcombine.high %v1065_v2, %v1065_v2  ;;  %v1081_v12 = vadd.f32 1e-05, %v1068_v4  ;;  %v1083_v14 = vadd.f32 1e-05, %v1065_v2  ;;  %6964 = vrsqrt.f32 %v1079_v6 }
 0x284   : > { %v1084_v21 = vadd.f32 1e-05, %v1067_v3  ;;  %6966 = vrsqrt.f32 %v1080_v9  ;;  %v448_v2 = vand.u32 15, %v7693_v46  ;;  %v462_v3 = vand.u32 15, %v7696_v47 }
 0x285   : > { %v1085_v26 = vadd.f32 1e-05, %v1069_v11  ;;  %6968 = vrsqrt.f32 %v1081_v12  ;;  %v7715_v4 = vadd.s32 32, %v7563_v7  ;;  %vm7827_vm12 = vcmp.ne.s32.totalorder %v385_v38, 0 }
 0x286   : > { %6970 = vrsqrt.f32 %v1082_v13 }
 0x287   : > { %6972 = vrsqrt.f32 %v1083_v14 }
 0x288   : > { %6974 = vrsqrt.f32 %v1084_v21 }
 0x289   : > { %6976 = vrsqrt.f32 %v1085_v26 }
 0x28c   : > { %v6963_v44 = vpop.eup %6962 }
 0x28d   : > { %v1105_v48 = vrot.slane %v6963_v44, %v7570_v15  ;;  %v6965_v52 = vpop.eup %6964 }
 0x28e   : > { %v6967_v29 = vpop.eup %6966  ;;  %v1109_v30 = vrot.slane %v6965_v52, %v7570_v15 }
 0x28f   : > { %v1142_v36 = vmul.f32 %v1105_v48, %v7582_v50  ;;  %v1143_v37 = vmul.f32 %v1105_v48, %v7585_v51  ;;  %v6969_v41 = vpop.eup %6968  ;;  %v1113_v1 = vrot.slane %v6967_v29, %v7570_v15 }
 0x290   : > { %v6971_v6 = vpop.eup %6970  ;;  %v7718_v50 = vrot.slane %v6969_v41, %v7570_v15  ;;  %v1145_v51 = vmul.f32 %v1109_v30, %v7594_v58  ;;  %v1144_v58 = vmul.f32 %v1109_v30, %v7591_v57 }
 0x291   : > { %vm1158_vm10 = vcmp.ge.f32.partialorder %v1142_v36, 0.0  ;;  %vm1159_vm11 = vcmp.ge.f32.partialorder %v1143_v37, 0.0  ;;  %v6973_v11 = vpop.eup %6972  ;;  %v7726_v12 = vrot.slane %v6971_v6, %v7570_v15  ;;  %v1146_v13 = vmul.f32 %v1113_v1, %v7597_v59 }
 0x292   : > { %v1174_v14 = vmul.f32 0.01, %v1142_v36  ;;  %v1175_v21 = vmul.f32 0.01, %v1143_v37  ;;  %v6975_v26 = vpop.eup %6974  ;;  %v7731_v31 = vrot.slane %v6973_v11, %v7570_v15  ;;  %vm1161_vm14 = vcmp.ge.f32.partialorder %v1145_v51, 0.0 }
 0x293   : > { %v1177_v32 = vmul.f32 0.01, %v1145_v51  ;;  %v6977_v33 = vpop.eup %6976  ;;  %v7735_v44 = vrot.slane %v6975_v26, %v7570_v15  ;;  %vm1162_vm15 = vcmp.ge.f32.partialorder %v1146_v13, 0.0  ;;  %v1178_v6 = vmul.f32 0.01, %v1146_v13 }
 0x294   : > { %v7738_v45 = vsel %vm1158_vm10, %v1142_v36, %v1174_v14  ;;  %v7741_v59 = vsel %vm1159_vm11, %v1143_v37, %v1175_v21  ;;  %v7748_v49 = vrot.slane %v6977_v33, %v7570_v15  ;;  %vm1160_vm10 = vcmp.ge.f32.partialorder %v1144_v58, 0.0 }
 0x295   : > { %v1254_v57 = vrot.slane %v7738_v45, 7  ;;  %v1255_v52 = vrot.slane %v7741_v59, 7  ;;  %v9520_v29 = vrot.slane %v7738_v45, 1  ;;  %v1304_v36 = vrot.slane %v7741_v59, 1 }
 0x296   : > { %v1353_v53 = vpack.c.bf16 %v7741_v59, %v7738_v45  ;;  %v1176_v37 = vmul.f32 0.01, %v1144_v58  ;;  %v1157_v41 = vmul.f32 %v7748_v49, %v7631_v28  ;;  %v7763_v11 = vsel %vm1161_vm14, %v1145_v51, %v1177_v32 }
 0x297   : > { %v1147_v14 = vmul.f32 %v1113_v1, %v7600_v16  ;;  %v1334_v21 = vsel %vm9526_vm8, %v9520_v29, %v1304_v36  ;;  %v1306_v26 = vrot.slane %v7763_v11, 1  ;;  %v1148_v33 = vmul.f32 %v7718_v50, %v7604_v60 }
 0x298   : > { %1552 = vmatprep.mubr.bf16.mxu0 %v1353_v53  ;;  %v7766_v54 = vsel %vm1160_vm10, %v1144_v58, %v1176_v37  ;;  %v7777_v51 = vsel %vm1162_vm15, %v1146_v13, %v1178_v6  ;;  %vm1173_vm10 = vcmp.ge.f32.partialorder %v1157_v41, 0.0  ;;  %v1189_v37 = vmul.f32 0.01, %v1157_v41 }
 0x299   : > { %v1305_v28 = vrot.slane %v7766_v54, 1  ;;  %vm1163_vm11 = vcmp.ge.f32.partialorder %v1147_v14, 0.0  ;;  %v1179_v16 = vmul.f32 0.01, %v1147_v14  ;;  %v1307_v1 = vrot.slane %v7777_v51, 1 }
 0x29a   : > { %vm1164_vm14 = vcmp.ge.f32.partialorder %v1148_v33, 0.0  ;;  %v1180_v58 = vmul.f32 0.01, %v1148_v33  ;;  %vm7795_vm15 = vcmp.ne.s32.totalorder %v420_v55, 15  ;;  %v1285_v9 = vsel %vm9556_vm13, %v1254_v57, %v1255_v52 }
 0x29b   : > { %v1333_v32 = vsel %vm9526_vm8, %v1304_v36, %v1305_v28  ;;  %v1332_v13 = vsel %vm9526_vm8, %v1305_v28, %v1306_v26  ;;  %v7791_v53 = vsel %vm1163_vm11, %v1147_v14, %v1179_v16  ;;  %v1331_v42 = vsel %vm9526_vm8, %v1306_v26, %v1307_v1 }
 0x29c   : > { %v5428_v36 = vpack.c.bf16 %v1333_v32, %v1334_v21  ;;  %v7808_v14 = vsel %vm1164_vm14, %v1148_v33, %v1180_v58  ;;  %v1308_v28 = vrot.slane %v7791_v53, 1  ;;  %vm7813_vm11 = vcmp.ne.s32.totalorder %v434_v17, 15  ;;  %vm7847_vm14 = vmpackc.low %vm7743_vm7, %vm7215_vm5 }
 0x29d   : > { %v5432_v55 = vpack.c.bf16 %v1331_v42, %v1332_v13  ;;  %v1309_v21 = vrot.slane %v7808_v14, 1  ;;  %v7819_v26 = vsel %vm1173_vm10, %v1157_v41, %v1189_v37  ;;  %v1356_v41 = vpack.c.bf16 %v7763_v11, %v7766_v54  ;;  %vm7864_vm7 = vmpackc.low %vm7215_vm5, %vm7753_vm6 }
 0x29e   : > { %6212 = vmatprep.mubr.msk.bf16.mxu1 %vm7785_vm4, %v5428_v36  ;;  %v1330_v40 = vsel %vm9526_vm8, %v1307_v1, %v1308_v28  ;;  %v1269_v17 = vrot.slane %v7819_v26, 7  ;;  %v1149_v16 = vmul.f32 %v7718_v50, %v7607_v62  ;;  %v1150_v1 = vmul.f32 %v7726_v12, %v7610_v18 }
 0x29f   : > { %6213 = vmatmul.mubr.msk.bf16.vlgmr.msra.gmra.mrb[4].mxu1 %vm7804_vm9, %v5432_v55  ;;  %v1329_v43 = vsel %vm9526_vm8, %v1308_v28, %v1309_v21  ;;  %v1151_v58 = vmul.f32 %v7726_v12, %v7613_v19  ;;  %v1152_v62 = vmul.f32 %v7731_v31, %v7616_v20  ;;  %v1256_v36 = vrot.slane %v7766_v54, 7 }
 0x2a0   : > { %v5436_v50 = vpack.c.bf16 %v1329_v43, %v1330_v40  ;;  %v1286_v32 = vsel %vm9556_vm13, %v1269_v17, %v1254_v57  ;;  %vm1165_vm10 = vcmp.ge.f32.partialorder %v1149_v16, 0.0  ;;  %v1181_v18 = vmul.f32 0.01, %v1149_v16  ;;  %6552 = vmatpush3.bf16.msra.mxu1 %v7441_v5 }
 0x2a1   : > { %v5396_v19 = vpack.c.bf16 %v1285_v9, %v1286_v32  ;;  %vm1166_vm3 = vcmp.ge.f32.partialorder %v1150_v1, 0.0  ;;  %v1182_v20 = vmul.f32 0.01, %v1150_v1  ;;  %vm1167_vm2 = vcmp.ge.f32.partialorder %v1151_v58, 0.0  ;;  %6553 = vmatprep.subr.bf16.mxu1 %v9535_v0 }
 0x2a2   : > { %6216 = vmatprep.mubr.msk.bf16.mxu1 %vm7847_vm14, %v5436_v50  ;;  %v7872_v12 = vsel %vm1165_vm10, %v1149_v16, %v1181_v18  ;;  %vm1168_vm1 = vcmp.ge.f32.partialorder %v1152_v62, 0.0  ;;  %v1183_v57 = vmul.f32 0.01, %v1151_v58  ;;  %v1184_v30 = vmul.f32 0.01, %v1152_v62 }
 0x2a3   : > { %5397 = vmatmul.mubr.msk.bf16.vlgmr.msra.gmra.mrb[4].mxu0 %vm7864_vm7, %v5396_v19  ;;  %v7876_v13 = vsel %vm1166_vm3, %v1150_v1, %v1182_v20  ;;  %v1310_v37 = vrot.slane %v7872_v12, 1  ;;  %v1257_v42 = vrot.slane %v7763_v11, 7  ;;  %vm7883_vm6 = vcmp.ne.s32.totalorder %v448_v2, 15  ;;  %vm7936_vm3 = vmpackc.low %vm7215_vm5, %vm7827_vm12 }
 0x2a4   : > { %1560 = vmatprep.mubr.bf16.mxu0 %v1356_v41  ;;  %v1311_v55 = vrot.slane %v7876_v13, 1  ;;  %v7888_v9 = vsel %vm1167_vm2, %v1151_v58, %v1183_v57  ;;  %v7890_v40 = vsel %vm1168_vm1, %v1152_v62, %v1184_v30  ;;  %v399_v16 = vand.u32 15, %v7715_v4  ;;  %6555 = vmatpush3.bf16.msra.mxu1 %v7449_v8  ;;  %vm7909_vm1 = vmpackc.low %vm7795_vm15, %vm7215_vm5 }
 0x2a5   : > { %v1328_v54 = vsel %vm9526_vm8, %v1309_v21, %v1310_v37  ;;  %v1312_v46 = vrot.slane %v7888_v9, 1  ;;  %v1313_v2 = vrot.slane %v7890_v40, 1  ;;  %v1283_v41 = vsel %vm9556_vm13, %v1256_v36, %v1257_v42  ;;  %6556 = vmatprep.subr.bf16.mxu1 %v9535_v0  ;;  %6576 = vmatpush3.bf16.msra.mxu0 %v7441_v5  ;;  %vm7929_vm2 = vmpackc.low %vm7813_vm11, %vm7215_vm5 }
 0x2a6   : > { %v1327_v4 = vsel %vm9526_vm8, %v1310_v37, %v1311_v55  ;;  %v1284_v43 = vsel %vm9556_vm13, %v1255_v52, %v1256_v36  ;;  %v1153_v1 = vmul.f32 %v7731_v31, %v7619_v23  ;;  %v1154_v58 = vmul.f32 %v7735_v44, %v7622_v63  ;;  %6577 = vmatprep.subr.bf16.mxu0 %v9535_v0  ;;  %vm7984_vm0 = vmpackc.low %vm7883_vm6, %vm7215_vm5 }
 0x2a7   : > { %v5440_v62 = vpack.c.bf16 %v1327_v4, %v1328_v54  ;;  %v1325_v6 = vsel %vm9526_vm8, %v1312_v46, %v1313_v2  ;;  %v1326_v50 = vsel %vm9526_vm8, %v1311_v55, %v1312_v46  ;;  %v9638_v59 = vmov 0 }
 0x2a8   : > { %v9639_v59 = vsel %vm7929_vm2, 4294967295, %v9638_v59  ;;  %v5400_v23 = vpack.c.bf16 %v1283_v41, %v1284_v43  ;;  %v5444_v31 = vpack.c.bf16 %v1325_v6, %v1326_v50  ;;  %v9641_v63 = vmov 0  ;;  %6558 = vmatpush3.bf16.msra.mxu1 %v7472_v22 }
 0x2a9   : > { %9640 = vst [vmem:[#allocation18_spill] sm:$0xff] %v9639_v59  ;;  %v9642_v63 = vsel %vm7936_vm3, 4294967295, %v9641_v63  ;;  %vm1169_vm15 = vcmp.ge.f32.partialorder %v1153_v1, 0.0  ;;  %vm1170_vm10 = vcmp.ge.f32.partialorder %v1154_v58, 0.0  ;;  %v1185_v52 = vmul.f32 0.01, %v1153_v1  ;;  %6217 = vmatmul.mubr.msk.bf16.gmra.mrb[8].mxu1 %vm7909_vm1, %v5440_v62  ;;  %6559 = vmatprep.subr.bf16.mxu1 %v9535_v0 }
 0x2aa   : > { %9643 = vst [vmem:[#allocation19_spill] sm:$0xff] %v9642_v63  ;;  %v1186_v39 = vmul.f32 0.01, %v1154_v58  ;;  %v1155_v32 = vmul.f32 %v7735_v44, %v7625_v24  ;;  %v1156_v33 = vmul.f32 %v7748_v49, %v7628_v25  ;;  %v1258_v18 = vrot.slane %v7777_v51, 7  ;;  %6220 = vmatprep.mubr.msk.bf16.mxu1 %vm7929_vm2, %v5444_v31  ;;  %6579 = vmatpush3.bf16.msra.mxu0 %v7449_v8 }
 0x2ab   : > { %v1359_v19 = vpack.c.bf16 %v7791_v53, %v7777_v51  ;;  %v7953_v20 = vsel %vm1169_vm15, %v1153_v1, %v1185_v52  ;;  %v1259_v57 = vrot.slane %v7791_v53, 7  ;;  %v366_v30 = vadd.s32 120, %v7563_v7  ;;  %5401 = vmatmul.mubr.msk.bf16.gmra.mrb[8].mxu0 %vm7936_vm3, %v5400_v23  ;;  %6580 = vmatprep.subr.bf16.mxu0 %v9535_v0 }
 0x2ac   : > { %v7961_v24 = vsel %vm1170_vm10, %v1154_v58, %v1186_v39  ;;  %v1314_v25 = vrot.slane %v7953_v20, 1  ;;  %vm1171_vm11 = vcmp.ge.f32.partialorder %v1155_v32, 0.0  ;;  %vm1172_vm12 = vcmp.ge.f32.partialorder %v1156_v33, 0.0  ;;  %6561 = vmatpush3.bf16.msra.mxu1 %v7487_v27 }
 0x2ad   : > { %1568 = vmatprep.mubr.bf16.mxu0 %v1359_v19  ;;  %v1315_v44 = vrot.slane %v7961_v24, 1  ;;  %v1187_v49 = vmul.f32 0.01, %v1155_v32  ;;  %v1188_v51 = vmul.f32 0.01, %v1156_v33  ;;  %vm7968_vm15 = vcmp.ne.s32.totalorder %v462_v3, 15  ;;  %6562 = vmatprep.subr.bf16.mxu1 %v9535_v0 }
 0x2ae   : > { %v1324_v37 = vsel %vm9526_vm8, %v1313_v2, %v1314_v25  ;;  %v1281_v36 = vsel %vm9556_vm13, %v1258_v18, %v1259_v57  ;;  %vm5736_vm10 = vcmp.ne.s32.totalorder %v399_v16, 0  ;;  %v357_v55 = vadd.s32 48, %v7563_v7  ;;  %6582 = vmatpush3.bf16.msra.mxu0 %v7472_v22 }
 0x2af   : > { %v1323_v47 = vsel %vm9526_vm8, %v1314_v25, %v1315_v44  ;;  %v9646_v3 = vmov 0  ;;  %v7989_v54 = vsel %vm1171_vm11, %v1155_v32, %v1187_v49  ;;  %v7992_v46 = vsel %vm1172_vm12, %v1156_v33, %v1188_v51  ;;  %6583 = vmatprep.subr.bf16.mxu0 %v9535_v0  ;;  %vm8003_vm6 = vmpackc.low %vm7215_vm5, %vm5736_vm10 }
 0x2b0   : > { %v9647_v3 = vsel %vm7984_vm0, 4294967295, %v9646_v3  ;;  %v1282_v16 = vsel %vm9556_vm13, %v1257_v42, %v1258_v18  ;;  %v5448_v2 = vpack.c.bf16 %v1323_v47, %v1324_v37  ;;  %v1316_v28 = vrot.slane %v7989_v54, 1  ;;  %6564 = vmatpush3.bf16.msra.mxu1 %v7503_v34  ;;  %vm8018_vm11 = vmpackc.low %vm7968_vm15, %vm7215_vm5 }
 0x2b1   : > { %9648 = vst [vmem:[#allocation20_spill] sm:$0xff] %v9647_v3  ;;  %v1317_v41 = vrot.slane %v7992_v46, 1  ;;  %v476_v4 = vand.u32 15, %v366_v30  ;;  %v9649_v43 = vmov 0  ;;  %v1318_v11 = vrot.slane %v7819_v26, 1  ;;  %6565 = vmatprep.subr.bf16.mxu1 %v9535_v0 }
 0x2b2   : > { %v9650_v43 = vsel %vm8003_vm6, 4294967295, %v9649_v43  ;;  %6221 = vmatmul.mubr.msk.bf16.gmra.mrb[12].mxu1 %vm7984_vm0, %v5448_v2  ;;  %v1322_v1 = vsel %vm9526_vm8, %v1315_v44, %v1316_v28  ;;  %v9652_v58 = vmov 0  ;;  %v5404_v62 = vpack.c.bf16 %v1281_v36, %v1282_v16  ;;  %6585 = vmatpush3.bf16.msra.mxu0 %v7487_v27 }
 0x2b3   : > { %9651 = vst [vmem:[#allocation21_spill] sm:$0xff] %v9650_v43  ;;  %v1321_v42 = vsel %vm9526_vm8, %v1316_v28, %v1317_v41  ;;  %v9653_v58 = vsel %vm8018_vm11, 4294967295, %v9652_v58  ;;  %v413_v6 = vand.u32 15, %v357_v55  ;;  %v1362_v23 = vpack.c.bf16 %v7872_v12, %v7808_v14  ;;  %6586 = vmatprep.subr.bf16.mxu0 %v9535_v0 }
 0x2b4   : > { %9654 = vst [vmem:[#allocation22_spill] sm:$0xff] %v9653_v58  ;;  %v5452_v50 = vpack.c.bf16 %v1321_v42, %v1322_v1  ;;  %v1260_v31 = vrot.slane %v7808_v14, 7  ;;  %v1261_v52 = vrot.slane %v7872_v12, 7  ;;  %5405 = vmatmul.mubr.msk.bf16.gmra.mrb[12].mxu0 %vm8003_vm6, %v5404_v62  ;;  %vm5749_vm12 = vcmp.ne.s32.totalorder %v476_v4, 15  ;;  %6567 = vmatpush3.bf16.msra.mxu1 %v7505_v35 }
 0x2b5   : > { %1576 = vmatprep.mubr.bf16.mxu0 %v1362_v23  ;;  %v1320_v39 = vsel %vm9526_vm8, %v1317_v41, %v1318_v11  ;;  %v9655_v32 = vrot.slane %v7738_v45, 1  ;;  %vm5737_vm15 = vcmp.ne.s32.totalorder %v413_v6, 0  ;;  %v359_v12 = vadd.s32 64, %v7563_v7  ;;  %vm8041_vm10 = vmpackc.low %vm5749_vm12, %vm7215_vm5  ;;  %6568 = vmatprep.subr.bf16.mxu1 %v9535_v0 }
 0x2b6   : > { %6224 = vmatprep.mubr.msk.bf16.mxu1 %vm8018_vm11, %v5452_v50  ;;  %v9656_v33 = vmov 0  ;;  %v1279_v18 = vsel %vm9556_vm13, %v1260_v31, %v1261_v52  ;;  %v1280_v45 = vsel %vm9556_vm13, %v1259_v57, %v1260_v31  ;;  %v9659_v30 = vmov 0  ;;  %6588 = vmatpush3.bf16.msra.mxu0 %v7503_v34 }
 0x2b7   : > { %v1335_v14 = vsel %vm9526_vm8, %v1318_v11, %v9655_v32  ;;  %v9657_v33 = vsel %vm8041_vm10, 4294967295, %v9656_v33  ;;  %vm8052_vm8 = vmpackc.low %vm7215_vm5, %vm5737_vm15  ;;  %v5408_v25 = vpack.c.bf16 %v1279_v18, %v1280_v45  ;;  %v427_v44 = vand.u32 15, %v359_v12  ;;  %6589 = vmatprep.subr.bf16.mxu0 %v9535_v0 }
 0x2b8   : > { %9658 = vst [vmem:[#allocation23_spill] sm:$0xff] %v9657_v33  ;;  %v5456_v19 = vpack.c.bf16 %v1335_v14, %v1320_v39  ;;  %v9660_v30 = vsel %vm8052_vm8, 4294967295, %v9659_v30  ;;  %v1365_v57 = vpack.c.bf16 %v7888_v9, %v7876_v13  ;;  %6570 = vmatpush3.bf16.msra.mxu1 %v7545_v56  ;;  %v9662_v49 = vmov 0.0  }
 0x2b9   : > { %9661 = vst [vmem:[#allocation24_spill] sm:$0xff] %v9660_v30  ;;  %vm9663_vm12 = vmmov 0   ;;  %6571 = vmatprep.subr.bf16.mxu1 %v9535_v0  ;;  %v1262_v51 = vrot.slane %v7876_v13, 7  ;;  %v1263_v53 = vrot.slane %v7888_v9, 7  ;;  %vm5738_vm15 = vcmp.ne.s32.totalorder %v427_v44, 0 }
 0x2ba   : > { %6225 = vmatmul.mubr.msk.bf16.gmra.mrb[16].mxu1 %vm8041_vm10, %v5456_v19  ;;  %v361_v37 = vadd.s32 80, %v7563_v7  ;;  %6591 = vmatpush3.bf16.msra.mxu0 %v7505_v35  ;;  %v9664_v13 = vmov 0  ;;  %v1368_v16 = vpack.c.bf16 %v7953_v20, %v7890_v40  ;;  %v1264_v2 = vrot.slane %v7890_v40, 7 }
 0x2bb   : > { %6260 = vmatprep.mubr.msk.f32.mxu1 %vm9663_vm12, %v9662_v49  ;;  %v1278_v36 = vsel %vm9556_vm13, %v1261_v52, %v1262_v51  ;;  %6592 = vmatprep.subr.bf16.mxu0 %v9535_v0  ;;  %v1277_v55 = vsel %vm9556_vm13, %v1262_v51, %v1263_v53  ;;  %v1265_v28 = vrot.slane %v7953_v20, 7  ;;  %v363_v41 = vadd.s32 96, %v7563_v7 }
 0x2bc   : > { %5409 = vmatmul.mubr.msk.bf16.gmra.mrb[16].mxu0 %vm8052_vm8, %v5408_v25  ;;  %6573 = vmatpush3.bf16.msra.mxu1 %v7554_v61  ;;  %vm8079_vm8 = vmpackc.low %vm7215_vm5, %vm5738_vm15  ;;  %v5412_v9 = vpack.c.bf16 %v1277_v55, %v1278_v36  ;;  %v441_v47 = vand.u32 15, %v361_v37  ;;  %v1276_v11 = vsel %vm9556_vm13, %v1263_v53, %v1264_v2  ;;  %v9667_v40 = vmov 0 }
 0x2bd   : > { %1584 = vmatprep.mubr.bf16.mxu0 %v1365_v57  ;;  %v9665_v13 = vsel %vm8079_vm8, 4294967295, %v9664_v13  ;;  %v1275_v4 = vsel %vm9556_vm13, %v1264_v2, %v1265_v28  ;;  %v455_v42 = vand.u32 15, %v363_v41  ;;  %v1371_v1 = vpack.c.bf16 %v7989_v54, %v7961_v24 }
 0x2be   : > { %9666 = vst [vmem:[#allocation25_spill] sm:$0xff] %v9665_v13  ;;  %6594 = vmatpush3.bf16.msra.mxu0 %v7545_v56  ;;  %vm5739_vm15 = vcmp.ne.s32.totalorder %v441_v47, 0  ;;  %v5416_v20 = vpack.c.bf16 %v1275_v4, %v1276_v11  ;;  %v1266_v62 = vrot.slane %v7961_v24, 7  ;;  %v1267_v6 = vrot.slane %v7989_v54, 7 }
 0x2bf   : > { %6595 = vmatprep.subr.bf16.mxu0 %v9535_v0  ;;  %vm8098_vm10 = vmpackc.low %vm7215_vm5, %vm5739_vm15  ;;  %v365_v50 = vadd.s32 112, %v7563_v7  ;;  %v9670_v52 = vmov 0  ;;  %v1374_v39 = vpack.c.bf16 %v7819_v26, %v7992_v46  ;;  %v1268_v32 = vrot.slane %v7992_v46, 7 }
 0x2c0   : > { %v9668_v40 = vsel %vm8098_vm10, 4294967295, %v9667_v40  ;;  %v1273_v23 = vsel %vm9556_vm13, %v1266_v62, %v1267_v6  ;;  %v1274_v31 = vsel %vm9556_vm13, %v1265_v28, %v1266_v62  ;;  %v9673_v18 = vmov 0 }
 0x2c1   : > { %9669 = vst [vmem:[#allocation26_spill] sm:$0xff] %v9668_v40  ;;  %v5420_v24 = vpack.c.bf16 %v1273_v23, %v1274_v31  ;;  %v469_v54 = vand.u32 15, %v365_v50  ;;  %v1271_v14 = vsel %vm9556_vm13, %v1268_v32, %v1269_v17  ;;  %v1272_v12 = vsel %vm9556_vm13, %v1267_v6, %v1268_v32 }
 0x2c2   : > { %6597 = vmatpush3.bf16.msra.mxu0 %v7554_v61  ;;  %v5424_v45 = vpack.c.bf16 %v1271_v14, %v1272_v12  ;;  %vm9678_vm13 = vcmask 1043459   ;;  %vm9682_vm11 = vcmask 1047559  }
 0x2c4   : > { %5413 = vmatmul.mubr.msk.bf16.gmra.mrb[20].mxu0 %vm8079_vm8, %v5412_v9  ;;  %vm5740_vm8 = vcmp.ne.s32.totalorder %v455_v42, 0 }
 0x2c5   : > { %1592 = vmatprep.mubr.bf16.mxu0 %v1368_v16  ;;  %vm8114_vm15 = vmpackc.low %vm7215_vm5, %vm5740_vm8 }
 0x2c6   : > { %v9671_v52 = vsel %vm8114_vm15, 4294967295, %v9670_v52 }
 0x2c7   : > { %9672 = vst [vmem:[#allocation27_spill] sm:$0xff] %v9671_v52 }
 0x2cc   : > { %5417 = vmatmul.mubr.msk.bf16.gmra.mrb[24].mxu0 %vm8098_vm10, %v5416_v20  ;;  %vm5741_vm10 = vcmp.ne.s32.totalorder %v469_v54, 0 }
 0x2cd   : > { %1600 = vmatprep.mubr.bf16.mxu0 %v1371_v1  ;;  %vm8130_vm8 = vmpackc.low %vm7215_vm5, %vm5741_vm10  ;;  %vm9676_vm5 = vcmask 1041409   ;;  %vm9677_vm10 = vcmask 1042434  }
 0x2ce   : > { %v9674_v18 = vsel %vm8130_vm8, 4294967295, %v9673_v18 }
 0x2cf   : > { %9675 = vst [vmem:[#allocation28_spill] sm:$0xff] %v9674_v18 }
 0x2d4   : > { %5421 = vmatmul.mubr.msk.bf16.gmra.mrb[28].mxu0 %vm8114_vm15, %v5420_v24  ;;  %vm9680_vm15 = vcmask 1045509  }
 0x2d5   : > { %1608 = vmatprep.mubr.bf16.mxu0 %v1374_v39 }
 0x2dc   : > { %5425 = vmatmul.mubr.msk.bf16.gmra.mrb[32].mxu0 %vm8130_vm8, %v5424_v45  ;;  %vm9679_vm8 = vcmask 1044484  }
 0x2dd   : > { %6295 = vmatprep.mubr.msk.f32.mxu0 %vm9663_vm12, %v9662_v49  ;;  %vm9681_vm12 = vcmask 1046534  }
 0x372   : > { %v6214_v46 = vpop.f32.mrb[4].mxu1 }
 0x373   : > { %v1651_v26 = vpop.f32.mrb[5].mxu1 }
 0x374   : > { %v6215_v19 = vpop.f32.mrb[6].mxu1 }
 0x375   : > { %v1654_v25 = vpop.f32.mrb[7].mxu1 }
 0x376   : > { %v5800_v17 = vpop.f32.mrb[4].mxu0 }
 0x377   : > { %v5801_v44 = vpop.f32.mrb[5].mxu0 }
 0x378   : > { %v5802_v57 = vadd.f32 %v5801_v44, %v5800_v17  ;;  %v5803_v51 = vpop.f32.mrb[6].mxu0 }
 0x379   : > { %v5804_v53 = vpop.f32.mrb[7].mxu0 }
 0x37a   : > { %v8138_v37 = vadd.f32 %v5802_v57, %v1651_v26  ;;  %v5805_v36 = vadd.f32 %v5804_v53, %v5803_v51 }
 0x37c   : > { %v8140_v55 = vadd.f32 %v5805_v36, %v1654_v25  ;;  %v6218_v9 = vpop.f32.mrb[8].mxu1 }
 0x37d   : > { %v1667_v47 = vpop.f32.mrb[9].mxu1 }
 0x37e   : > { %v6219_v16 = vpop.f32.mrb[10].mxu1  ;;  %v5806_v2 = vpop.f32.mrb[8].mxu0 }
 0x37f   : > { %v1670_v28 = vpop.f32.mrb[11].mxu1  ;;  %v5807_v41 = vpop.f32.mrb[9].mxu0 }
 0x380   : > { %v5808_v4 = vadd.f32 %v5807_v41, %v5806_v2  ;;  %v5809_v11 = vpop.f32.mrb[10].mxu0 }
 0x381   : > { %v5810_v20 = vpop.f32.mrb[11].mxu0 }
 0x382   : > { %v8142_v42 = vadd.f32 %v6214_v46, %v5808_v4  ;;  %v5811_v1 = vadd.f32 %v5810_v20, %v5809_v11 }
 0x384   : > { %v8144_v62 = vadd.f32 %v6215_v19, %v5811_v1 }
 0x385   : > { %v6222_v6 = vpop.f32.mrb[12].mxu1 }
 0x386   : > { %v1683_v50 = vpop.f32.mrb[13].mxu1 }
 0x387   : > { %v6223_v23 = vpop.f32.mrb[14].mxu1  ;;  %v5812_v31 = vpop.f32.mrb[12].mxu0 }
 0x388   : > { %v1686_v24 = vpop.f32.mrb[15].mxu1  ;;  %v5813_v54 = vpop.f32.mrb[13].mxu0 }
 0x389   : > { %v5814_v39 = vadd.f32 %v5813_v54, %v5812_v31  ;;  %v5815_v32 = vpop.f32.mrb[14].mxu0 }
 0x38a   : > { %v5816_v14 = vpop.f32.mrb[15].mxu0 }
 0x38b   : > { %v8146_v12 = vadd.f32 %v5814_v39, %v1667_v47  ;;  %v5817_v45 = vadd.f32 %v5816_v14, %v5815_v32 }
 0x38d   : > { %v8148_v26 = vadd.f32 %v5817_v45, %v1670_v28  ;;  %v8150_v25 = vpop.f32.mrb[16].mxu1 }
 0x38e   : > { %v1699_v46 = vpop.f32.mrb[17].mxu1 }
 0x38f   : > { %v8152_v17 = vpop.f32.mrb[18].mxu1  ;;  %v5818_v19 = vpop.f32.mrb[16].mxu0 }
 0x390   : > { %v1702_v44 = vpop.f32.mrb[19].mxu1  ;;  %v5819_v57 = vpop.f32.mrb[17].mxu0 }
 0x391   : > { %v5820_v51 = vadd.f32 %v5819_v57, %v5818_v19  ;;  %v5821_v53 = vpop.f32.mrb[18].mxu0 }
 0x392   : > { %v5822_v36 = vpop.f32.mrb[19].mxu0 }
 0x393   : > { %v8154_v2 = vadd.f32 %v6218_v9, %v5820_v51  ;;  %v5823_v41 = vadd.f32 %v5822_v36, %v5821_v53  ;;  %v1721_v9 = vadd.f32 %v8144_v62, %v8142_v42  ;;  %v1728_v53 = vadd.f32 %v8148_v26, %v8146_v12 }
 0x395   : > { %v8156_v4 = vadd.f32 %v6219_v16, %v5823_v41  ;;  %v1722_v41 = vrot.slane %v1721_v9, 4 }
 0x397   : > { %v5824_v47 = vpop.f32.mrb[20].mxu0 }
 0x398   : > { %v5825_v11 = vpop.f32.mrb[21].mxu0 }
 0x399   : > { %v5826_v28 = vadd.f32 %v5825_v11, %v5824_v47  ;;  %v5827_v20 = vpop.f32.mrb[22].mxu0 }
 0x39a   : > { %v5828_v1 = vpop.f32.mrb[23].mxu0 }
 0x39b   : > { %v8158_v31 = vadd.f32 %v5826_v28, %v1683_v50  ;;  %v5829_v54 = vadd.f32 %v5828_v1, %v5827_v20  ;;  %v1714_v50 = vadd.f32 %v8140_v55, %v8138_v37  ;;  %v1729_v28 = vrot.slane %v1728_v53, 4 }
 0x39d   : > { %v8160_v39 = vadd.f32 %v5829_v54, %v1686_v24  ;;  %v1735_v24 = vadd.f32 %v8156_v4, %v8154_v2  ;;  %v1715_v1 = vrot.slane %v1714_v50, 4  ;;  %v1730_v18 = vadd.f32 %v1729_v28, %v1728_v53 }
 0x39f   : > { %v5830_v32 = vpop.f32.mrb[24].mxu0  ;;  %v1742_v47 = vadd.f32 %v8160_v39, %v8158_v31  ;;  %v1736_v54 = vrot.slane %v1735_v24, 4  ;;  %v1716_v52 = vadd.f32 %v1715_v1, %v1714_v50 }
 0x3a0   : > { %v5831_v14 = vpop.f32.mrb[25].mxu0 }
 0x3a1   : > { %v5832_v45 = vadd.f32 %v5831_v14, %v5830_v32  ;;  %v5833_v19 = vpop.f32.mrb[26].mxu0  ;;  %v1737_v40 = vadd.f32 %v1736_v54, %v1735_v24 }
 0x3a2   : > { %v5834_v57 = vpop.f32.mrb[27].mxu0 }
 0x3a3   : > { %v8164_v16 = vadd.f32 %v6222_v6, %v5832_v45  ;;  %v5835_v51 = vadd.f32 %v5834_v57, %v5833_v19  ;;  %v1723_v45 = vadd.f32 %v1722_v41, %v1721_v9  ;;  %v1743_v19 = vrot.slane %v1742_v47, 4 }
 0x3a4   : > { %v1717_v41 = vrot.slane %v1716_v52, 2  ;;  %v1738_v33 = vrot.slane %v1737_v40, 2 }
 0x3a5   : > { %v8172_v36 = vadd.f32 %v6223_v23, %v5835_v51  ;;  %v1724_v61 = vrot.slane %v1723_v45, 2  ;;  %v1744_v30 = vadd.f32 %v1743_v19, %v1742_v47 }
 0x3a6   : > { %v1739_v1 = vadd.f32 %v1738_v33, %v1737_v40 }
 0x3a7   : > { %v1749_v6 = vadd.f32 %v8172_v36, %v8164_v16  ;;  %v5836_v11 = vpop.f32.mrb[28].mxu0  ;;  %v1745_v53 = vrot.slane %v1744_v30, 2 }
 0x3a8   : > { %v5837_v20 = vpop.f32.mrb[29].mxu0 }
 0x3a9   : > { %v5838_v32 = vadd.f32 %v5837_v20, %v5836_v11  ;;  %v5839_v14 = vpop.f32.mrb[30].mxu0  ;;  %v1750_v0 = vrot.slane %v1749_v6, 4  ;;  %v1731_v20 = vrot.slane %v1730_v18, 2 }
 0x3aa   : > { %v5840_v57 = vpop.f32.mrb[31].mxu0 }
 0x3ab   : > { %v8178_v23 = vadd.f32 %v5838_v32, %v1699_v46  ;;  %v5841_v51 = vadd.f32 %v5840_v57, %v5839_v14  ;;  %v1751_v49 = vadd.f32 %v1750_v0, %v1749_v6  ;;  %v1725_v14 = vadd.f32 %v1724_v61, %v1723_v45 }
 0x3ac   : > { %v1732_v47 = vadd.f32 %v1731_v20, %v1730_v18  ;;  %v1718_v6 = vadd.f32 %v1717_v41, %v1716_v52  ;;  %v1746_v57 = vadd.f32 %v1745_v53, %v1744_v30 }
 0x3ad   : > { %v8180_v13 = vadd.f32 %v5841_v51, %v1702_v44  ;;  %v1752_v24 = vrot.slane %v1751_v49, 2  ;;  %v1726_v51 = vrot.slane %v1725_v14, 1 }
 0x3ae   : > { %v1733_v45 = vrot.slane %v1732_v47, 1 }
 0x3af   : > { %v1756_v56 = vadd.f32 %v8180_v13, %v8178_v23  ;;  %v5842_v11 = vpop.f32.mrb[32].mxu0 }
 0x3b0   : > { %v5843_v9 = vpop.f32.mrb[33].mxu0  ;;  %v1734_v33 = vadd.f32 %v1733_v45, %v1732_v47 }
 0x3b1   : > { %v1757_v35 = vrot.slane %v1756_v56, 4  ;;  %v5844_v46 = vadd.f32 %v5843_v9, %v5842_v11  ;;  %v5845_v32 = vpop.f32.mrb[34].mxu0  ;;  %v1753_v11 = vadd.f32 %v1752_v24, %v1751_v49 }
 0x3b2   : > { %v5846_v50 = vpop.f32.mrb[35].mxu0 }
 0x3b3   : > { %v1758_v44 = vadd.f32 %v1757_v35, %v1756_v56  ;;  %v8185_v28 = vadd.f32 %v8150_v25, %v5844_v46  ;;  %v5847_v0 = vadd.f32 %v5846_v50, %v5845_v32  ;;  %v1719_v35 = vrot.slane %v1718_v6, 1 }
 0x3b4   : > { %v1740_v56 = vrot.slane %v1739_v1, 1  ;;  %v1747_v46 = vrot.slane %v1746_v57, 1  ;;  %v1727_v32 = vadd.f32 %v1726_v51, %v1725_v14  ;;  %v1754_v18 = vrot.slane %v1753_v11, 1 }
 0x3b5   : > { %v1759_v54 = vrot.slane %v1758_v44, 2  ;;  %v8188_v19 = vadd.f32 %v8152_v17, %v5847_v0  ;;  %v1720_v20 = vadd.f32 %v1719_v35, %v1718_v6 }
 0x3b6   : > { %v1741_v17 = vadd.f32 %v1740_v56, %v1739_v1  ;;  %v1748_v30 = vadd.f32 %v1747_v46, %v1746_v57  ;;  %v1755_v53 = vadd.f32 %v1754_v18, %v1753_v11 }
 0x3b7   : > { %v1763_v61 = vadd.f32 %v8188_v19, %v8185_v28  ;;  %v1760_v9 = vadd.f32 %v1759_v54, %v1758_v44  ;;  %v1778_v49 = vsel %vm9676_vm5, %v1727_v32, %v1720_v20 }
 0x3b8   : > { %v1779_v24 = vsel %vm9677_vm10, %v1734_v33, %v1778_v49 }
 0x3b9   : > { %v1764_v25 = vrot.slane %v1763_v61, 4  ;;  %v1761_v40 = vrot.slane %v1760_v9, 1  ;;  %v1780_v54 = vsel %vm9678_vm13, %v1741_v17, %v1779_v24  ;;  %vm9683_vm13 = vmmov %vm9676_vm5  ;;  %vm9688_vm5 = vcmask 1046534  }
 0x3ba   : > { %v1781_v14 = vsel %vm9679_vm8, %v1748_v30, %v1780_v54 }
 0x3bb   : > { %v1765_v52 = vadd.f32 %v1764_v25, %v1763_v61  ;;  %v1762_v44 = vadd.f32 %v1761_v40, %v1760_v9  ;;  %v1782_v47 = vsel %vm9680_vm15, %v1755_v53, %v1781_v14  ;;  %vm9686_vm15 = vmmov %vm9679_vm8  ;;  %vm9687_vm8 = vcmask 1045509  }
 0x3bd   : > { %v1766_v41 = vrot.slane %v1765_v52, 2  ;;  %v1783_v6 = vsel %vm9681_vm12, %v1762_v44, %v1782_v47  ;;  %vm9685_vm12 = vcmask 1043459  }
 0x3bf   : > { %v1767_v50 = vadd.f32 %v1766_v41, %v1765_v52 }
 0x3c1   : > { %v1768_v0 = vrot.slane %v1767_v50, 1 }
 0x3c3   : > { %v1769_v51 = vadd.f32 %v1768_v0, %v1767_v50 }
 0x3c5   : > { %v1784_v1 = vsel %vm9682_vm11, %v1769_v51, %v1783_v6  ;;  %vm9684_vm11 = vmmov %vm9677_vm10  ;;  %vm9689_vm10 = vcmask 1047559  }
 0x3c6   : > { %6261 = vmatmul.mubr.f32.vlgmr.msra.gmra.mrb[2].mxu1 %v1784_v1 }
 0x499   : > { %v1852_v57 = vpop.f32.mrb[2].mxu1 }
 0x49a   : > { %v1857_v61 = vcombine.high %v1852_v57, %v1852_v57  ;;  %v1864_v11 = vrot.slane %v1852_v57, %v7566_v10  ;;  %v6262_v45 = vpop.f32.mrb[3].mxu1 }
 0x49c   : > { %v1871_v9 = vrot.slane %v1857_v61, %v7566_v10  ;;  %v1872_v35 = vcombine.high %v1864_v11, %v1864_v11  ;;  %v1880_v56 = vrot.slane %v1864_v11, %v7566_v10 }
 0x49e   : > { %v1873_v25 = vcombine.high %v1871_v9, %v1871_v9  ;;  %v1887_v46 = vrot.slane %v1871_v9, %v7566_v10  ;;  %v1894_v32 = vrot.slane %v1872_v35, %v7566_v10  ;;  %v1902_v18 = vcombine.high %v1880_v56, %v1880_v56 }
 0x49f   : > { %v1909_v52 = vrot.slane %v1880_v56, %v7570_v15 }
 0x4a0   : > { %v1901_v33 = vrot.slane %v1873_v25, %v7566_v10  ;;  %v1903_v40 = vcombine.high %v1887_v46, %v1887_v46  ;;  %v1904_v20 = vcombine.high %v1894_v32, %v1894_v32  ;;  %v1913_v17 = vrot.slane %v1894_v32, %v7570_v15 }
 0x4a1   : > { %v1917_v41 = vrot.slane %v1902_v18, %v7570_v15  ;;  %v1925_v30 = vrot.slane %v1887_v46, %v7570_v15  ;;  %v8210_v49 = vsub.f32 %v8138_v37, %v1909_v52  ;;  %v8213_v53 = vsub.f32 %v8140_v55, %v1909_v52 }
 0x4a2   : > { %v1905_v50 = vcombine.high %v1901_v33, %v1901_v33  ;;  %v1921_v24 = vrot.slane %v1904_v20, %v7570_v15  ;;  %v1929_v44 = vrot.slane %v1901_v33, %v7570_v15  ;;  %v1933_v0 = vrot.slane %v1903_v40, %v7570_v15 }
 0x4a3   : > { %v8219_v54 = vsub.f32 %v8142_v42, %v1913_v17  ;;  %v8222_v14 = vsub.f32 %v8144_v62, %v1913_v17  ;;  %v8225_v51 = vsub.f32 %v8146_v12, %v1917_v41  ;;  %v8228_v37 = vsub.f32 %v8148_v26, %v1917_v41 }
 0x4a4   : > { %v1937_v55 = vrot.slane %v1905_v50, %v7570_v15  ;;  %v8232_v47 = vsub.f32 %v8154_v2, %v1921_v24  ;;  %v8235_v6 = vsub.f32 %v8156_v4, %v1921_v24  ;;  %v8238_v42 = vsub.f32 %v8158_v31, %v1925_v30 }
 0x4a5   : > { %v8241_v62 = vsub.f32 %v8160_v39, %v1925_v30  ;;  %v8244_v12 = vsub.f32 %v8164_v16, %v1929_v44  ;;  %v8247_v26 = vsub.f32 %v8172_v36, %v1929_v44  ;;  %v8250_v1 = vsub.f32 %v8178_v23, %v1933_v0 }
 0x4a6   : > { %v8253_v2 = vsub.f32 %v8180_v13, %v1933_v0  ;;  %v8256_v4 = vsub.f32 %v8185_v28, %v1937_v55  ;;  %v8259_v31 = vsub.f32 %v8188_v19, %v1937_v55  ;;  %v1962_v39 = vmul.f32 %v8210_v49, %v8210_v49 }
 0x4a7   : > { %v1963_v16 = vmul.f32 %v8213_v53, %v8213_v53  ;;  %v1964_v36 = vmul.f32 %v8219_v54, %v8219_v54  ;;  %v1965_v23 = vmul.f32 %v8222_v14, %v8222_v14  ;;  %v1966_v13 = vmul.f32 %v8225_v51, %v8225_v51 }
 0x4a8   : > { %v1967_v28 = vmul.f32 %v8228_v37, %v8228_v37  ;;  %v1968_v19 = vmul.f32 %v8232_v47, %v8232_v47  ;;  %v1969_v57 = vmul.f32 %v8235_v6, %v8235_v6  ;;  %v1970_v61 = vmul.f32 %v8238_v42, %v8238_v42 }
 0x4a9   : > { %v1971_v11 = vmul.f32 %v8241_v62, %v8241_v62  ;;  %v1972_v45 = vmul.f32 %v8244_v12, %v8244_v12  ;;  %v1973_v9 = vmul.f32 %v8247_v26, %v8247_v26  ;;  %v1974_v35 = vmul.f32 %v8250_v1, %v8250_v1 }
 0x4aa   : > { %v1975_v56 = vmul.f32 %v8253_v2, %v8253_v2  ;;  %v1976_v25 = vmul.f32 %v8256_v4, %v8256_v4  ;;  %v1977_v46 = vmul.f32 %v8259_v31, %v8259_v31  ;;  %v1978_v32 = vadd.f32 %v1963_v16, %v1962_v39 }
 0x4ab   : > { %v1985_v18 = vadd.f32 %v1965_v23, %v1964_v36  ;;  %v1992_v52 = vadd.f32 %v1967_v28, %v1966_v13  ;;  %v1999_v33 = vadd.f32 %v1969_v57, %v1968_v19  ;;  %v2006_v40 = vadd.f32 %v1971_v11, %v1970_v61 }
 0x4ac   : > { %v1979_v20 = vrot.slane %v1978_v32, 4  ;;  %v2013_v17 = vadd.f32 %v1973_v9, %v1972_v45  ;;  %v2020_v41 = vadd.f32 %v1975_v56, %v1974_v35  ;;  %v2027_v30 = vadd.f32 %v1977_v46, %v1976_v25 }
 0x4ad   : > { %v1986_v50 = vrot.slane %v1985_v18, 4  ;;  %v1993_v24 = vrot.slane %v1992_v52, 4  ;;  %v2000_v44 = vrot.slane %v1999_v33, 4  ;;  %v2007_v0 = vrot.slane %v2006_v40, 4 }
 0x4ae   : > { %v1980_v55 = vadd.f32 %v1979_v20, %v1978_v32  ;;  %v2014_v58 = vrot.slane %v2013_v17, 4  ;;  %v2021_v43 = vrot.slane %v2020_v41, 4  ;;  %v2028_v3 = vrot.slane %v2027_v30, 4 }
 0x4af   : > { %v1987_v34 = vadd.f32 %v1986_v50, %v1985_v18  ;;  %v1994_v27 = vadd.f32 %v1993_v24, %v1992_v52  ;;  %v2001_v63 = vadd.f32 %v2000_v44, %v1999_v33  ;;  %v2008_v39 = vadd.f32 %v2007_v0, %v2006_v40 }
 0x4b0   : > { %v1981_v16 = vrot.slane %v1980_v55, 2  ;;  %v2015_v36 = vadd.f32 %v2014_v58, %v2013_v17  ;;  %v2022_v23 = vadd.f32 %v2021_v43, %v2020_v41  ;;  %v2029_v13 = vadd.f32 %v2028_v3, %v2027_v30 }
 0x4b1   : > { %v1988_v28 = vrot.slane %v1987_v34, 2  ;;  %v1995_v19 = vrot.slane %v1994_v27, 2  ;;  %v2002_v57 = vrot.slane %v2001_v63, 2  ;;  %v2009_v61 = vrot.slane %v2008_v39, 2 }
 0x4b2   : > { %v1982_v11 = vadd.f32 %v1981_v16, %v1980_v55  ;;  %v2016_v45 = vrot.slane %v2015_v36, 2  ;;  %v2023_v9 = vrot.slane %v2022_v23, 2  ;;  %v2030_v35 = vrot.slane %v2029_v13, 2 }
 0x4b3   : > { %v1989_v56 = vadd.f32 %v1988_v28, %v1987_v34  ;;  %v1996_v25 = vadd.f32 %v1995_v19, %v1994_v27  ;;  %v2003_v46 = vadd.f32 %v2002_v57, %v2001_v63  ;;  %v2010_v32 = vadd.f32 %v2009_v61, %v2008_v39  ;;  %v6818_v57 = vld [vmem:[#allocation4 + $0x140] sm:$0xff]  }
 0x4b4   : > { %v1983_v18 = vrot.slane %v1982_v11, 1  ;;  %v2017_v52 = vadd.f32 %v2016_v45, %v2015_v36  ;;  %v2024_v33 = vadd.f32 %v2023_v9, %v2022_v23  ;;  %v2031_v43 = vadd.f32 %v2030_v35, %v2029_v13  ;;  %6298 = vmatprep.subr.bf16.mxu0 %v6818_v57  ;;  %v6819_v61 = vld [vmem:[#allocation4 + $0x100] sm:$0xff]   ;;  %v6821_v45 = vld [vmem:[#allocation4 + $0x148] sm:$0xff]  }
 0x4b5   : > { %v1990_v40 = vrot.slane %v1989_v56, 1  ;;  %v1997_v20 = vrot.slane %v1996_v25, 1  ;;  %v2004_v58 = vrot.slane %v2003_v46, 1  ;;  %v2011_v17 = vrot.slane %v2010_v32, 1  ;;  %5898 = vmatprep.subr.bf16.mxu1 %v6819_v61  ;;  %v6822_v9 = vld [vmem:[#allocation4 + $0x108] sm:$0xff]  }
 0x4b6   : > { %v1984_v3 = vadd.f32 %v1983_v18, %v1982_v11  ;;  %v2018_v24 = vrot.slane %v2017_v52, 1  ;;  %v2025_v44 = vrot.slane %v2024_v33, 1  ;;  %v2032_v0 = vrot.slane %v2031_v43, 1  ;;  %v6820_v11 = vld [vmem:[#allocation4 + $0xc0] sm:$0xff]   ;;  %v6823_v35 = vld [vmem:[#allocation4 + $0xc8] sm:$0xff]   ;;  %v6828_v18 = vld [vmem:[#allocation4 + $0x118] sm:$0xff]  }
 0x4b7   : > { %v1991_v41 = vadd.f32 %v1990_v40, %v1989_v56  ;;  %v1998_v30 = vadd.f32 %v1997_v20, %v1996_v25  ;;  %v2005_v50 = vadd.f32 %v2004_v58, %v2003_v46  ;;  %v2012_v27 = vadd.f32 %v2011_v17, %v2010_v32  ;;  %5899 = vmatpush3.bf16.msra.mxu1 %v6820_v11  ;;  %v6824_v56 = vld [vmem:[#allocation4 + $0x150] sm:$0xff]   ;;  %v6827_v32 = vld [vmem:[#allocation4 + $0x158] sm:$0xff]   ;;  %v6831_v40 = vld [vmem:[#allocation4 + $0x120] sm:$0xff]  }
 0x4b8   : > { %v2019_v55 = vadd.f32 %v2018_v24, %v2017_v52  ;;  %v2026_v16 = vadd.f32 %v2025_v44, %v2024_v33  ;;  %v2033_v23 = vadd.f32 %v2032_v0, %v2031_v43  ;;  %5900 = vmatprep.subr.bf16.mxu1 %v6822_v9  ;;  %v6825_v25 = vld [vmem:[#allocation4 + $0x110] sm:$0xff]   ;;  %v6830_v52 = vld [vmem:[#allocation4 + $0x160] sm:$0xff]   ;;  %v6829_v33 = vld [vmem:[#allocation4 + $0xd8] sm:$0xff]   ;;  %v9690_v0 = vmov 0.0|0.0  }
 0x4b9   : > { %v2042_v34 = vsel %vm9683_vm13, %v1991_v41, %v1984_v3  ;;  %v6826_v46 = vld [vmem:[#allocation4 + $0xd0] sm:$0xff]   ;;  %v6833_v20 = vld [vmem:[#allocation4 + $0x168] sm:$0xff]   ;;  %v6832_v58 = vld [vmem:[#allocation4 + $0xe0] sm:$0xff]  }
 0x4ba   : > { %v2043_v63 = vsel %vm9684_vm11, %v1998_v30, %v2042_v34  ;;  %v6834_v43 = vld [vmem:[#allocation4 + $0x128] sm:$0xff]   ;;  %v6836_v3 = vld [vmem:[#allocation4 + $0x170] sm:$0xff]   ;;  %v6839_v30 = vld [vmem:[#allocation4 + $0x178] sm:$0xff]  }
 0x4bb   : > { %v2044_v39 = vsel %vm9685_vm12, %v2005_v50, %v2043_v63  ;;  %5901 = vmatpush3.bf16.msra.mxu1 %v6823_v35  ;;  %v6835_v17 = vld [vmem:[#allocation4 + $0xe8] sm:$0xff]   ;;  %v6837_v41 = vld [vmem:[#allocation4 + $0x130] sm:$0xff]   ;;  %v6840_v24 = vld [vmem:[#allocation4 + $0x138] sm:$0xff]  }
 0x4bc   : > { %v2045_v36 = vsel %vm9686_vm15, %v2012_v27, %v2044_v39  ;;  %5902 = vmatprep.subr.bf16.mxu1 %v6825_v25  ;;  %v6838_v50 = vld [vmem:[#allocation4 + $0xf0] sm:$0xff]   ;;  %v6841_v44 = vld [vmem:[#allocation4 + $0xf8] sm:$0xff]  }
 0x4bd   : > { %v2046_v13 = vsel %vm9687_vm8, %v2019_v55, %v2045_v36 }
 0x4be   : > { %v2047_v28 = vsel %vm9688_vm5, %v2026_v16, %v2046_v13  ;;  %vm9691_vm5 = vcmp.lt.s32.totalorder %v7563_v7, 7 }
 0x4bf   : > { %v2048_v19 = vsel %vm9689_vm10, %v2033_v23, %v2047_v28  ;;  %5903 = vmatpush3.bf16.msra.mxu1 %v6826_v46 }
 0x4c0   : > { %6296 = vmatmul.mubr.f32.vlgmr.msra.gmra.mrb[2].mxu0 %v2048_v19  ;;  %5904 = vmatprep.subr.bf16.mxu1 %v6828_v18 }
 0x4c1   : > { %6299 = vmatpush3.bf16.msra.mxu0 %v6818_v57 }
 0x4c2   : > { %6300 = vmatprep.subr.bf16.mxu0 %v6821_v45 }
 0x4c3   : > { %5905 = vmatpush3.bf16.msra.mxu1 %v6829_v33 }
 0x4c4   : > { %5906 = vmatprep.subr.bf16.mxu1 %v6831_v40 }
 0x4c5   : > { %6301 = vmatpush3.bf16.msra.mxu0 %v6821_v45 }
 0x4c6   : > { %6302 = vmatprep.subr.bf16.mxu0 %v6824_v56 }
 0x4c7   : > { %5907 = vmatpush3.bf16.msra.mxu1 %v6832_v58 }
 0x4c8   : > { %5908 = vmatprep.subr.bf16.mxu1 %v6834_v43 }
 0x4c9   : > { %6303 = vmatpush3.bf16.msra.mxu0 %v6824_v56 }
 0x4ca   : > { %6304 = vmatprep.subr.bf16.mxu0 %v6827_v32 }
 0x4cb   : > { %5909 = vmatpush3.bf16.msra.mxu1 %v6835_v17 }
 0x4cc   : > { %5910 = vmatprep.subr.bf16.mxu1 %v6837_v41 }
 0x4cd   : > { %6305 = vmatpush3.bf16.msra.mxu0 %v6827_v32 }
 0x4ce   : > { %6306 = vmatprep.subr.bf16.mxu0 %v6830_v52 }
 0x4cf   : > { %5911 = vmatpush3.bf16.msra.mxu1 %v6838_v50 }
 0x4d0   : > { %5912 = vmatprep.subr.bf16.mxu1 %v6840_v24 }
 0x4d1   : > { %6307 = vmatpush3.bf16.msra.mxu0 %v6830_v52 }
 0x4d2   : > { %6308 = vmatprep.subr.bf16.mxu0 %v6833_v20 }
 0x4d3   : > { %5913 = vmatpush3.bf16.msra.mxu1 %v6841_v44 }
 0x4d4   : > { %6622 = vmatprep.subr.bf16.mxu1 %v9690_v0 }
 0x4d5   : > { %6309 = vmatpush3.bf16.msra.mxu0 %v6833_v20 }
 0x4d6   : > { %6310 = vmatprep.subr.bf16.mxu0 %v6836_v3 }
 0x4d9   : > { %6311 = vmatpush3.bf16.msra.mxu0 %v6836_v3 }
 0x4da   : > { %6312 = vmatprep.subr.bf16.mxu0 %v6839_v30 }
 0x4dd   : > { %6313 = vmatpush3.bf16.msra.mxu0 %v6839_v30 }
 0x4de   : > { %6598 = vmatprep.subr.bf16.mxu0 %v9690_v0 }
 0x593   : > { %v2116_v34 = vpop.f32.mrb[2].mxu0 }
 0x594   : > { %v2121_v27 = vcombine.high %v2116_v34, %v2116_v34  ;;  %v2128_v63 = vrot.slane %v2116_v34, %v7566_v10  ;;  %v6297_v55 = vpop.f32.mrb[3].mxu0 }
 0x596   : > { %v2135_v39 = vrot.slane %v2121_v27, %v7566_v10  ;;  %v2136_v16 = vcombine.high %v2128_v63, %v2128_v63  ;;  %v2144_v36 = vrot.slane %v2128_v63, %v7566_v10 }
 0x598   : > { %v2137_v23 = vcombine.high %v2135_v39, %v2135_v39  ;;  %v2151_v13 = vrot.slane %v2135_v39, %v7566_v10  ;;  %v2158_v28 = vrot.slane %v2136_v16, %v7566_v10  ;;  %v2166_v19 = vcombine.high %v2144_v36, %v2144_v36 }
 0x599   : > { %v2178_v57 = vadd.f32 1e-05, %v2144_v36 }
 0x59a   : > { %v2165_v61 = vrot.slane %v2137_v23, %v7566_v10  ;;  %v2167_v11 = vcombine.high %v2151_v13, %v2151_v13  ;;  %v2168_v45 = vcombine.high %v2158_v28, %v2158_v28  ;;  %v2179_v9 = vadd.f32 1e-05, %v2158_v28 }
 0x59b   : > { %v2180_v35 = vadd.f32 1e-05, %v2166_v19  ;;  %6978 = vrsqrt.f32 %v2178_v57  ;;  %v2182_v46 = vadd.f32 1e-05, %v2151_v13 }
 0x59c   : > { %v2169_v56 = vcombine.high %v2165_v61, %v2165_v61  ;;  %v2181_v25 = vadd.f32 1e-05, %v2168_v45  ;;  %v2183_v32 = vadd.f32 1e-05, %v2165_v61  ;;  %6980 = vrsqrt.f32 %v2179_v9 }
 0x59d   : > { %v2184_v18 = vadd.f32 1e-05, %v2167_v11  ;;  %6982 = vrsqrt.f32 %v2180_v35 }
 0x59e   : > { %v2185_v52 = vadd.f32 1e-05, %v2169_v56  ;;  %6984 = vrsqrt.f32 %v2181_v25 }
 0x59f   : > { %6986 = vrsqrt.f32 %v2182_v46 }
 0x5a0   : > { %6988 = vrsqrt.f32 %v2183_v32 }
 0x5a1   : > { %6990 = vrsqrt.f32 %v2184_v18 }
 0x5a2   : > { %6992 = vrsqrt.f32 %v2185_v52 }
 0x5a5   : > { %v6979_v33 = vpop.eup %6978 }
 0x5a6   : > { %v2205_v40 = vrot.slane %v6979_v33, %v7570_v15  ;;  %v6981_v20 = vpop.eup %6980 }
 0x5a7   : > { %v6983_v58 = vpop.eup %6982  ;;  %v2209_v43 = vrot.slane %v6981_v20, %v7570_v15 }
 0x5a8   : > { %v2242_v3 = vmul.f32 %v2205_v40, %v8210_v49  ;;  %v2243_v17 = vmul.f32 %v2205_v40, %v8213_v53  ;;  %v6985_v41 = vpop.eup %6984  ;;  %v2213_v30 = vrot.slane %v6983_v58, %v7570_v15 }
 0x5a9   : > { %v6987_v50 = vpop.eup %6986  ;;  %v2217_v24 = vrot.slane %v6985_v41, %v7570_v15  ;;  %v2245_v44 = vmul.f32 %v2209_v43, %v8222_v14  ;;  %v2244_v16 = vmul.f32 %v2209_v43, %v8219_v54 }
 0x5aa   : > { %vm2258_vm13 = vcmp.ge.f32.partialorder %v2242_v3, 0.0  ;;  %vm2259_vm11 = vcmp.ge.f32.partialorder %v2243_v17, 0.0  ;;  %v6989_v34 = vpop.eup %6988  ;;  %v2221_v27 = vrot.slane %v6987_v50, %v7570_v15  ;;  %v2246_v63 = vmul.f32 %v2213_v30, %v8225_v51 }
 0x5ab   : > { %v2274_v55 = vmul.f32 0.01, %v2242_v3  ;;  %v2275_v39 = vmul.f32 0.01, %v2243_v17  ;;  %v6991_v49 = vpop.eup %6990  ;;  %v8318_v53 = vrot.slane %v6989_v34, %v7570_v15  ;;  %vm2261_vm12 = vcmp.ge.f32.partialorder %v2245_v44, 0.0 }
 0x5ac   : > { %v2277_v36 = vmul.f32 0.01, %v2245_v44  ;;  %v6993_v23 = vpop.eup %6992  ;;  %v8322_v14 = vrot.slane %v6991_v49, %v7570_v15  ;;  %vm2262_vm15 = vcmp.ge.f32.partialorder %v2246_v63, 0.0  ;;  %vm2260_vm8 = vcmp.ge.f32.partialorder %v2244_v16, 0.0 }
 0x5ad   : > { %v8324_v13 = vsel %vm2258_vm13, %v2242_v3, %v2274_v55  ;;  %v8326_v28 = vsel %vm2259_vm11, %v2243_v17, %v2275_v39  ;;  %v8329_v51 = vrot.slane %v6993_v23, %v7570_v15  ;;  %v2276_v45 = vmul.f32 0.01, %v2244_v16 }
 0x5ae   : > { %v2355_v19 = vrot.slane %v8324_v13, 7  ;;  %v2356_v57 = vrot.slane %v8326_v28, 7  ;;  %v2403_v54 = vrot.slane %v8324_v13, 1  ;;  %v2404_v61 = vrot.slane %v8326_v28, 1 }
 0x5af   : > { %v2452_v11 = vpack.c.bf16 %v8326_v28, %v8324_v13  ;;  %v2257_v9 = vmul.f32 %v8329_v51, %v8259_v31  ;;  %v2278_v35 = vmul.f32 0.01, %v2246_v63  ;;  %v8340_v56 = vsel %vm2261_vm12, %v2245_v44, %v2277_v36  ;;  %vm9692_vm12 = vmmov %vm9691_vm5 }
 0x5b0   : > { %v2247_v25 = vmul.f32 %v2213_v30, %v8228_v37  ;;  %v8343_v46 = vsel %vm2260_vm8, %v2244_v16, %v2276_v45  ;;  %v2433_v32 = vsel %vm9691_vm5, %v2403_v54, %v2404_v61  ;;  %v2406_v18 = vrot.slane %v8340_v56, 1  ;;  %vm9693_vm8 = vmmov %vm9691_vm5 }
 0x5b1   : > { %2651 = vmatprep.mubr.bf16.mxu1 %v2452_v11  ;;  %v2248_v52 = vmul.f32 %v2217_v24, %v8232_v47  ;;  %v2405_v31 = vrot.slane %v8343_v46, 1  ;;  %v8353_v33 = vsel %vm2262_vm15, %v2246_v63, %v2278_v35  ;;  %vm2273_vm11 = vcmp.ge.f32.partialorder %v2257_v9, 0.0  ;;  %vm9694_vm15 = vmmov %vm9691_vm5 }
 0x5b2   : > { %vm2263_vm10 = vcmp.ge.f32.partialorder %v2247_v25, 0.0  ;;  %v2279_v40 = vmul.f32 0.01, %v2247_v25  ;;  %v2407_v37 = vrot.slane %v8353_v33, 1  ;;  %v2289_v47 = vmul.f32 0.01, %v2257_v9 }
 0x5b3   : > { %vm2264_vm13 = vcmp.ge.f32.partialorder %v2248_v52, 0.0  ;;  %v2280_v20 = vmul.f32 0.01, %v2248_v52  ;;  %v2432_v58 = vsel %vm9692_vm12, %v2404_v61, %v2405_v31  ;;  %v2431_v43 = vsel %vm9693_vm8, %v2405_v31, %v2406_v18 }
 0x5b4   : > { %v8360_v3 = vsel %vm2263_vm10, %v2247_v25, %v2279_v40  ;;  %v5516_v17 = vpack.c.bf16 %v2432_v58, %v2433_v32  ;;  %v2430_v41 = vsel %vm9694_vm15, %v2406_v18, %v2407_v37  ;;  %v8368_v63 = vsel %vm2273_vm11, %v2257_v9, %v2289_v47  ;;  %vm9696_vm10 = vmmov %vm9693_vm8 }
 0x5b5   : > { %v8364_v30 = vsel %vm2264_vm13, %v2248_v52, %v2280_v20  ;;  %v2408_v50 = vrot.slane %v8360_v3, 1  ;;  %v5520_v44 = vpack.c.bf16 %v2430_v41, %v2431_v43  ;;  %vm9695_vm5 = vcmp.lt.s32.totalorder %v7563_v7, 1  ;;  %vm9697_vm13 = vmmov %vm9693_vm8 }
 0x5b6   : > { %v2409_v34 = vrot.slane %v8364_v30, 1  ;;  %v2385_v55 = vsel %vm9695_vm5, %v2355_v19, %v2356_v57  ;;  %6314 = vmatprep.mubr.msk.bf16.mxu0 %vm7785_vm4, %v5516_v17  ;;  %v2370_v49 = vrot.slane %v8368_v63, 7  ;;  %v2455_v16 = vpack.c.bf16 %v8340_v56, %v8343_v46  ;;  %vm9698_vm11 = vmmov %vm9695_vm5 }
 0x5b7   : > { %v2429_v39 = vsel %vm9696_vm10, %v2407_v37, %v2408_v50  ;;  %v2249_v36 = vmul.f32 %v2217_v24, %v8235_v6  ;;  %6315 = vmatmul.mubr.msk.bf16.vlgmr.msra.gmra.mrb[36].mxu0 %vm7804_vm9, %v5520_v44  ;;  %v2250_v61 = vmul.f32 %v2221_v27, %v8238_v42  ;;  %v2251_v11 = vmul.f32 %v2221_v27, %v8241_v62 }
 0x5b8   : > { %v2428_v23 = vsel %vm9697_vm13, %v2408_v50, %v2409_v34  ;;  %v2252_v45 = vmul.f32 %v8318_v53, %v8244_v12  ;;  %v2386_v35 = vsel %vm9698_vm11, %v2370_v49, %v2355_v19  ;;  %6600 = vmatpush3.bf16.msra.mxu0 %v7441_v5  ;;  %v2357_v32 = vrot.slane %v8343_v46, 7  ;;  %vm9699_vm13 = vmmov %vm9698_vm11 }
 0x5b9   : > { %v5524_v9 = vpack.c.bf16 %v2428_v23, %v2429_v39  ;;  %vm2265_vm12 = vcmp.ge.f32.partialorder %v2249_v36, 0.0  ;;  %v2281_v6 = vmul.f32 0.01, %v2249_v36  ;;  %v5484_v24 = vpack.c.bf16 %v2385_v55, %v2386_v35  ;;  %6601 = vmatprep.subr.bf16.mxu0 %v9690_v0  ;;  %vm9700_vm11 = vmmov %vm9696_vm10 }
 0x5ba   : > { %vm2266_vm8 = vcmp.ge.f32.partialorder %v2250_v61, 0.0  ;;  %v2282_v25 = vmul.f32 0.01, %v2250_v61  ;;  %vm2267_vm15 = vcmp.ge.f32.partialorder %v2251_v11, 0.0  ;;  %vm2268_vm5 = vcmp.ge.f32.partialorder %v2252_v45, 0.0 }
 0x5bb   : > { %6318 = vmatprep.mubr.msk.bf16.mxu0 %vm7847_vm14, %v5524_v9  ;;  %v8398_v42 = vsel %vm2265_vm12, %v2249_v36, %v2281_v6  ;;  %v2283_v62 = vmul.f32 0.01, %v2251_v11  ;;  %v2284_v12 = vmul.f32 0.01, %v2252_v45  ;;  %5485 = vmatmul.mubr.msk.bf16.vlgmr.msra.gmra.mrb[20].mxu1 %vm7864_vm7, %v5484_v24  ;;  %v2358_v18 = vrot.slane %v8340_v56, 7  ;;  %vm9701_vm12 = vmmov %vm9699_vm13 }
 0x5bc   : > { %v8402_v27 = vsel %vm2266_vm8, %v2250_v61, %v2282_v25  ;;  %v2410_v19 = vrot.slane %v8398_v42, 1  ;;  %2659 = vmatprep.mubr.bf16.mxu1 %v2455_v16  ;;  %6603 = vmatpush3.bf16.msra.mxu0 %v7449_v8  ;;  %v2384_v43 = vsel %vm9701_vm12, %v2356_v57, %v2357_v32  ;;  %v2253_v47 = vmul.f32 %v8318_v53, %v8247_v26  ;;  %vm9702_vm8 = vmmov %vm9696_vm10  ;;  %v9705_v61 = vld [vmem:[#allocation13_spill] sm:$0xff] }
 0x5bd   : > { %v2411_v52 = vrot.slane %v8402_v27, 1  ;;  %v8408_v31 = vsel %vm2267_vm15, %v2251_v11, %v2283_v62  ;;  %v8410_v40 = vsel %vm2268_vm5, %v2252_v45, %v2284_v12  ;;  %v2383_v46 = vsel %vm9699_vm13, %v2357_v32, %v2358_v18  ;;  %6604 = vmatprep.subr.bf16.mxu0 %v9690_v0  ;;  %6624 = vmatpush3.bf16.msra.mxu1 %v7441_v5  ;;  %vm9703_vm15 = vmmov %vm9702_vm8 }
 0x5be   : > { %v2427_v37 = vsel %vm9696_vm10, %v2409_v34, %v2410_v19  ;;  %v2412_v20 = vrot.slane %v8408_v31, 1  ;;  %v2413_v58 = vrot.slane %v8410_v40, 1  ;;  %v2254_v17 = vmul.f32 %v8322_v14, %v8250_v1  ;;  %6625 = vmatprep.subr.bf16.mxu1 %v9690_v0  ;;  %vm9706_vm12 = vmmov %vm9702_vm8 }
 0x5bf   : > { %v2426_v56 = vsel %vm9700_vm11, %v2410_v19, %v2411_v52  ;;  %v5488_v34 = vpack.c.bf16 %v2383_v46, %v2384_v43  ;;  %vm2269_vm5 = vcmp.ge.f32.partialorder %v2253_v47, 0.0  ;;  %v2285_v57 = vmul.f32 0.01, %v2253_v47  ;;  %v9710_v19 = vld [vmem:[#allocation14_spill] sm:$0xff] }
 0x5c0   : > { %v5528_v41 = vpack.c.bf16 %v2426_v56, %v2427_v37  ;;  %v2424_v50 = vsel %vm9702_vm8, %v2412_v20, %v2413_v58  ;;  %v2425_v44 = vsel %vm9703_vm15, %v2411_v52, %v2412_v20  ;;  %vm2270_vm10 = vcmp.ge.f32.partialorder %v2254_v17, 0.0  ;;  %6606 = vmatpush3.bf16.msra.mxu0 %v7472_v22  ;;  %vm9708_vm15 = vmmov %vm9706_vm12 }
 0x5c1   : > { %v5532_v28 = vpack.c.bf16 %v2424_v50, %v2425_v44  ;;  %v2286_v26 = vmul.f32 0.01, %v2254_v17  ;;  %v2255_v1 = vmul.f32 %v8322_v14, %v8253_v2  ;;  %v2256_v53 = vmul.f32 %v8329_v51, %v8256_v4  ;;  %6607 = vmatprep.subr.bf16.mxu0 %v9690_v0  ;;  %6627 = vmatpush3.bf16.msra.mxu1 %v7449_v8 }
 0x5c2   : > { %6319 = vmatmul.mubr.msk.bf16.gmra.mrb[40].mxu0 %vm7909_vm1, %v5528_v41  ;;  %v2359_v55 = vrot.slane %v8353_v33, 7  ;;  %v2458_v39 = vpack.c.bf16 %v8360_v3, %v8353_v33  ;;  %v8449_v16 = vsel %vm2269_vm5, %v2253_v47, %v2285_v57  ;;  %v2360_v36 = vrot.slane %v8360_v3, 7  ;;  %6628 = vmatprep.subr.bf16.mxu1 %v9690_v0  ;;  %v9715_v47 = vld [vmem:[#allocation22_spill] sm:$0xff] }
 0x5c3   : > { %6322 = vmatprep.mubr.msk.bf16.mxu0 %vm7929_vm2, %v5532_v28  ;;  %5489 = vmatmul.mubr.msk.bf16.gmra.mrb[24].mxu1 %vm7936_vm3, %v5488_v34  ;;  %v8455_v4 = vsel %vm2270_vm10, %v2254_v17, %v2286_v26  ;;  %v2414_v14 = vrot.slane %v8449_v16, 1  ;;  %vm2271_vm13 = vcmp.ge.f32.partialorder %v2255_v1, 0.0  ;;  %vm2272_vm11 = vcmp.ge.f32.partialorder %v2256_v53, 0.0  ;;  %vm9712_vm10 = vmmov %vm9706_vm12  ;;  %v9721_v34 = vld [vmem:[#allocation23_spill] sm:$0xff]  ;;  %v9723_v28 = vld [vmem:[#allocation16_spill] sm:$0xff] }
 0x5c4   : > { %2667 = vmatprep.mubr.bf16.mxu1 %v2458_v39  ;;  %v2415_v51 = vrot.slane %v8455_v4, 1  ;;  %v2287_v33 = vmul.f32 0.01, %v2255_v1  ;;  %v2288_v23 = vmul.f32 0.01, %v2256_v53  ;;  %6609 = vmatpush3.bf16.msra.mxu0 %v9705_v61  ;;  %vm9707_vm8 = vcmp.lt.s32.totalorder %v7563_v7, 1 }
 0x5c5   : > { %v2423_v3 = vsel %vm9706_vm12, %v2413_v58, %v2414_v14  ;;  %v2381_v11 = vsel %vm9707_vm8, %v2359_v55, %v2360_v36  ;;  %6610 = vmatprep.subr.bf16.mxu0 %v9690_v0  ;;  %vm9709_vm5 = vmmov %vm9707_vm8  ;;  %6630 = vmatpush3.bf16.msra.mxu1 %v7472_v22  ;;  %v2418_v12 = vrot.slane %v8368_v63, 1  ;;  %v2461_v58 = vpack.c.bf16 %v8398_v42, %v8364_v30  ;;  %v9726_v26 = vld [vmem:[#allocation24_spill] sm:$0xff]  ;;  %v9729_v39 = vld [vmem:[#allocation17_spill] sm:$0xff] }
 0x5c6   : > { %v2422_v45 = vsel %vm9708_vm15, %v2414_v14, %v2415_v51  ;;  %v8468_v9 = vsel %vm2271_vm13, %v2255_v1, %v2287_v33  ;;  %v8470_v35 = vsel %vm2272_vm11, %v2256_v53, %v2288_v23  ;;  %v2382_v6 = vsel %vm9709_vm5, %v2358_v18, %v2359_v55  ;;  %6631 = vmatprep.subr.bf16.mxu1 %v9690_v0  ;;  %vm9713_vm13 = vmmov %vm9712_vm10  ;;  %v9731_v33 = vld [vmem:[#allocation25_spill] sm:$0xff] }
 0x5c7   : > { %v5536_v24 = vpack.c.bf16 %v2422_v45, %v2423_v3  ;;  %v2416_v25 = vrot.slane %v8468_v9, 1  ;;  %v2417_v62 = vrot.slane %v8470_v35, 1  ;;  %v5492_v37 = vpack.c.bf16 %v2381_v11, %v2382_v6  ;;  %vm9717_vm12 = vmmov %vm9712_vm10  ;;  %v9734_v6 = vld [vmem:[#allocation26_spill] sm:$0xff] }
 0x5c8   : > { %6612 = vmatpush3.bf16.msra.mxu0 %v9710_v19  ;;  %v2361_v46 = vrot.slane %v8364_v30, 7  ;;  %v2362_v56 = vrot.slane %v8398_v42, 7  ;;  %vm9716_vm11 = vnez %v9715_v47  ;;  %vm9718_vm8 = vmmov %vm9712_vm10  ;;  %v9719_v30 = vld [vmem:[#allocation15_spill] sm:$0xff]  ;;  %v9724_v57 = vmov 0.0  }
 0x5c9   : > { %v2420_v52 = vsel %vm9712_vm10, %v2416_v25, %v2417_v62  ;;  %v2421_v18 = vsel %vm9713_vm13, %v2415_v51, %v2416_v25  ;;  %6613 = vmatprep.subr.bf16.mxu0 %v9690_v0  ;;  %v2419_v17 = vsel %vm9717_vm12, %v2417_v62, %v2418_v12  ;;  %v2434_v41 = vsel %vm9718_vm8, %v2418_v12, %v2403_v54  ;;  %vm9720_vm15 = vmmov %vm9709_vm5 }
 0x5ca   : > { %6323 = vmatmul.mubr.msk.bf16.gmra.mrb[44].mxu0 %vm7984_vm0, %v5536_v24  ;;  %v5540_v20 = vpack.c.bf16 %v2420_v52, %v2421_v18  ;;  %6633 = vmatpush3.bf16.msra.mxu1 %v9705_v61  ;;  %v2379_v42 = vsel %vm9720_vm15, %v2361_v46, %v2362_v56  ;;  %v2380_v50 = vsel %vm9709_vm5, %v2360_v36, %v2361_v46  ;;  %vm9725_vm13 = vmmov 0   ;;  %vm9728_vm8 = vmmov %vm9709_vm5  ;;  %v9738_v18 = vld [vmem:[#allocation27_spill] sm:$0xff] }
 0x5cb   : > { %5493 = vmatmul.mubr.msk.bf16.gmra.mrb[28].mxu1 %vm8003_vm6, %v5492_v37  ;;  %6634 = vmatprep.subr.bf16.mxu1 %v9690_v0  ;;  %v5544_v44 = vpack.c.bf16 %v2434_v41, %v2419_v17  ;;  %vm9722_vm10 = vnez %v9721_v34  ;;  %v5496_v13 = vpack.c.bf16 %v2379_v42, %v2380_v50  ;;  %v2464_v54 = vpack.c.bf16 %v8408_v31, %v8402_v27  ;;  %vm9730_vm15 = vmmov %vm9709_vm5  ;;  %v7026_v50 = vld [vmem:[%s7446_s13] sm:$0xff] }
 0x5cc   : > { %6326 = vmatprep.mubr.msk.bf16.mxu0 %vm9716_vm11, %v5540_v20  ;;  %2675 = vmatprep.mubr.bf16.mxu1 %v2461_v58  ;;  %vm9727_vm12 = vnez %v9726_v26  ;;  %v2363_v1 = vrot.slane %v8402_v27, 7  ;;  %v2364_v53 = vrot.slane %v8408_v31, 7  ;;  %v2467_v27 = vpack.c.bf16 %v8449_v16, %v8410_v40  ;;  %v9741_v20 = vld [vmem:[#allocation28_spill] sm:$0xff] }
 0x5cd   : > { %6615 = vmatpush3.bf16.msra.mxu0 %v9719_v30  ;;  %v2365_v31 = vrot.slane %v8410_v40, 7  ;;  %v2366_v51 = vrot.slane %v8449_v16, 7  ;;  %vm9732_vm5 = vnez %v9731_v33  ;;  %v2470_v40 = vpack.c.bf16 %v8468_v9, %v8455_v4  ;;  %v7039_v33 = vld [vmem:[%s7446_s13 + $0x68] sm:$0xff] }
 0x5ce   : > { %6616 = vmatprep.subr.bf16.mxu0 %v9690_v0  ;;  %6636 = vmatpush3.bf16.msra.mxu1 %v9710_v19  ;;  %v2378_v55 = vsel %vm9728_vm8, %v2362_v56, %v2363_v1  ;;  %v2377_v36 = vsel %vm9730_vm15, %v2363_v1, %v2364_v53  ;;  %vm9733_vm15 = vmmov %vm9728_vm8  ;;  %v2367_v16 = vrot.slane %v8455_v4, 7  ;;  %v2368_v45 = vrot.slane %v8468_v9, 7  ;;  %v7027_v1 = vld [vmem:[%s7446_s13 + $0x8] sm:$0xff] }
 0x5cf   : > { %6637 = vmatprep.subr.bf16.mxu1 %v9690_v0  ;;  %v5500_v14 = vpack.c.bf16 %v2377_v36, %v2378_v55  ;;  %v2375_v23 = vsel %vm9728_vm8, %v2365_v31, %v2366_v51  ;;  %v2376_v3 = vsel %vm9733_vm15, %v2364_v53, %v2365_v31  ;;  %v2473_v12 = vpack.c.bf16 %v8368_v63, %v8470_v35 }
 0x5d0   : > { %v5504_v11 = vpack.c.bf16 %v2375_v23, %v2376_v3  ;;  %v2369_v52 = vrot.slane %v8470_v35, 7  ;;  %vm9739_vm15 = vnez %v9738_v18  ;;  %vm9749_vm11 = vcmask 1047559  }
 0x5d1   : > { %6618 = vmatpush3.bf16.msra.mxu0 %v9723_v28 }
 0x5d2   : > { %6327 = vmatmul.mubr.msk.bf16.gmra.mrb[48].mxu0 %vm9722_vm10, %v5544_v44  ;;  %6619 = vmatprep.subr.bf16.mxu0 %v9690_v0  ;;  %vm9748_vm10 = vcmask 1046534  }
 0x5d3   : > { %6362 = vmatprep.mubr.msk.f32.mxu0 %vm9725_vm13, %v9724_v57  ;;  %5497 = vmatmul.mubr.msk.bf16.gmra.mrb[32].mxu1 %vm9727_vm12, %v5496_v13  ;;  %vm9735_vm12 = vnez %v9734_v6 }
 0x5d4   : > { %2683 = vmatprep.mubr.bf16.mxu1 %v2464_v54  ;;  %6639 = vmatpush3.bf16.msra.mxu1 %v9719_v30 }
 0x5d5   : > { %6621 = vmatpush3.bf16.msra.mxu0 %v9729_v39  ;;  %6640 = vmatprep.subr.bf16.mxu1 %v9690_v0 }
 0x5d8   : > { %6642 = vmatpush3.bf16.msra.mxu1 %v9723_v28 }
 0x5d9   : > { %6643 = vmatprep.subr.bf16.mxu1 %v9690_v0 }
 0x5db   : > { %5501 = vmatmul.mubr.msk.bf16.gmra.mrb[36].mxu1 %vm9732_vm5, %v5500_v14  ;;  %vm9736_vm5 = vmmov %vm9728_vm8 }
 0x5dc   : > { %2691 = vmatprep.mubr.bf16.mxu1 %v2467_v27  ;;  %6645 = vmatpush3.bf16.msra.mxu1 %v9729_v39  ;;  %v2373_v24 = vsel %vm9736_vm5, %v2367_v16, %v2368_v45  ;;  %vm9737_vm8 = vmmov %vm9736_vm5  ;;  %v2372_v9 = vsel %vm9736_vm5, %v2368_v45, %v2369_v52 }
 0x5dd   : > { %v2374_v25 = vsel %vm9737_vm8, %v2366_v51, %v2367_v16  ;;  %vm9742_vm8 = vnez %v9741_v20  ;;  %v7028_v16 = vld [vmem:[%s7446_s13 + $0x10] sm:$0xff] }
 0x5de   : > { %v5508_v62 = vpack.c.bf16 %v2373_v24, %v2374_v25 }
 0x5e3   : > { %5505 = vmatmul.mubr.msk.bf16.gmra.mrb[40].mxu1 %vm9735_vm12, %v5504_v11  ;;  %vm9740_vm12 = vmmov %vm9736_vm5  ;;  %vm9744_vm5 = vcmask 1042434  }
 0x5e4   : > { %2699 = vmatprep.mubr.bf16.mxu1 %v2470_v40  ;;  %v2371_v4 = vsel %vm9740_vm12, %v2369_v52, %v2370_v49  ;;  %vm9743_vm12 = vcmask 1041409  }
 0x5e5   : > { %v5512_v37 = vpack.c.bf16 %v2371_v4, %v2372_v9 }
 0x5eb   : > { %5509 = vmatmul.mubr.msk.bf16.gmra.mrb[44].mxu1 %vm9739_vm15, %v5508_v62  ;;  %v7029_v62 = vld [vmem:[%s7446_s13 + $0x18] sm:$0xff]  ;;  %vm9746_vm15 = vcmask 1044484  }
 0x5ec   : > { %2707 = vmatprep.mubr.bf16.mxu1 %v2473_v12 }
 0x5f3   : > { %5513 = vmatmul.mubr.msk.bf16.gmra.mrb[48].mxu1 %vm9742_vm8, %v5512_v37  ;;  %vm9745_vm8 = vcmask 1043459  }
 0x5f4   : > { %6397 = vmatprep.mubr.msk.f32.mxu1 %vm9725_vm13, %v9724_v57  ;;  %vm9747_vm13 = vcmask 1045509  }
 0x68a   : > { %v6316_v35 = vpop.f32.mrb[36].mxu0 }
 0x68b   : > { %v2750_v58 = vpop.f32.mrb[37].mxu0 }
 0x68c   : > { %v6317_v46 = vpop.f32.mrb[38].mxu0 }
 0x68d   : > { %v2753_v56 = vpop.f32.mrb[39].mxu0 }
 0x68e   : > { %v5914_v17 = vpop.f32.mrb[20].mxu1 }
 0x68f   : > { %v5915_v63 = vpop.f32.mrb[21].mxu1 }
 0x690   : > { %v5916_v41 = vadd.f32 %v5915_v63, %v5914_v17  ;;  %v5917_v42 = vpop.f32.mrb[22].mxu1 }
 0x691   : > { %v5918_v49 = vpop.f32.mrb[23].mxu1 }
 0x692   : > { %v2654_v44 = vadd.f32 %v7026_v50, %v5916_v41  ;;  %v5919_v13 = vadd.f32 %v5918_v49, %v5917_v42  ;;  %v7030_v49 = vld [vmem:[%s7446_s13 + $0x20] sm:$0xff] }
 0x694   : > { %v8569_v54 = vadd.f32 %v2750_v58, %v2654_v44  ;;  %v2657_v53 = vadd.f32 %v7027_v1, %v5919_v13  ;;  %v7031_v13 = vld [vmem:[%s7446_s13 + $0x28] sm:$0xff] }
 0x695   : > { %v6320_v55 = vpop.f32.mrb[40].mxu0 }
 0x696   : > { %v2766_v36 = vpop.f32.mrb[41].mxu0  ;;  %v8572_v14 = vadd.f32 %v2753_v56, %v2657_v53  ;;  %v5920_v31 = vpop.f32.mrb[24].mxu1 }
 0x697   : > { %v6321_v27 = vpop.f32.mrb[42].mxu0  ;;  %v5921_v23 = vpop.f32.mrb[25].mxu1 }
 0x698   : > { %v2769_v51 = vpop.f32.mrb[43].mxu0  ;;  %v5922_v3 = vadd.f32 %v5921_v23, %v5920_v31  ;;  %v5923_v11 = vpop.f32.mrb[26].mxu1 }
 0x699   : > { %v5924_v40 = vpop.f32.mrb[27].mxu1 }
 0x69a   : > { %v2662_v45 = vadd.f32 %v7028_v16, %v5922_v3  ;;  %v5925_v24 = vadd.f32 %v5924_v40, %v5923_v11 }
 0x69c   : > { %v8575_v25 = vadd.f32 %v6316_v35, %v2662_v45  ;;  %v2665_v12 = vadd.f32 %v7029_v62, %v5925_v24 }
 0x69d   : > { %v6324_v52 = vpop.f32.mrb[44].mxu0 }
 0x69e   : > { %v2782_v4 = vpop.f32.mrb[45].mxu0  ;;  %v8578_v9 = vadd.f32 %v6317_v46, %v2665_v12  ;;  %v5926_v58 = vpop.f32.mrb[28].mxu1 }
 0x69f   : > { %v6325_v37 = vpop.f32.mrb[46].mxu0  ;;  %v5927_v17 = vpop.f32.mrb[29].mxu1 }
 0x6a0   : > { %v2785_v56 = vpop.f32.mrb[47].mxu0  ;;  %v5928_v63 = vadd.f32 %v5927_v17, %v5926_v58  ;;  %v5929_v41 = vpop.f32.mrb[30].mxu1  ;;  %v7033_v17 = vld [vmem:[%s7446_s13 + $0x38] sm:$0xff] }
 0x6a1   : > { %v5930_v42 = vpop.f32.mrb[31].mxu1 }
 0x6a2   : > { %v2670_v50 = vadd.f32 %v7030_v49, %v5928_v63  ;;  %v5931_v44 = vadd.f32 %v5930_v42, %v5929_v41 }
 0x6a4   : > { %v8581_v35 = vadd.f32 %v2766_v36, %v2670_v50  ;;  %v2673_v1 = vadd.f32 %v7031_v13, %v5931_v44  ;;  %v7032_v36 = vld [vmem:[%s7446_s13 + $0x30] sm:$0xff]  ;;  %v7034_v13 = vld [vmem:[%s7446_s13 + $0x40] sm:$0xff] }
 0x6a5   : > { %v8584_v53 = vpop.f32.mrb[48].mxu0 }
 0x6a6   : > { %v2798_v46 = vpop.f32.mrb[49].mxu0  ;;  %v8586_v31 = vadd.f32 %v2769_v51, %v2673_v1  ;;  %v5932_v3 = vpop.f32.mrb[32].mxu1 }
 0x6a7   : > { %v8588_v23 = vpop.f32.mrb[50].mxu0  ;;  %v5933_v40 = vpop.f32.mrb[33].mxu1 }
 0x6a8   : > { %v8590_v11 = vpop.f32.mrb[51].mxu0  ;;  %v5934_v16 = vadd.f32 %v5933_v40, %v5932_v3  ;;  %v5935_v45 = vpop.f32.mrb[34].mxu1 }
 0x6a9   : > { %v5936_v24 = vpop.f32.mrb[35].mxu1 }
 0x6aa   : > { %v2678_v62 = vadd.f32 %v7032_v36, %v5934_v16  ;;  %v5937_v12 = vadd.f32 %v5936_v24, %v5935_v45  ;;  %v7035_v16 = vld [vmem:[%s7446_s13 + $0x48] sm:$0xff] }
 0x6ac   : > { %v8593_v58 = vadd.f32 %v6320_v55, %v2678_v62  ;;  %v2681_v63 = vadd.f32 %v7033_v17, %v5937_v12  ;;  %v7036_v17 = vld [vmem:[%s7446_s13 + $0x50] sm:$0xff] }
 0x6ae   : > { %v8596_v51 = vadd.f32 %v6321_v27, %v2681_v63  ;;  %v5938_v41 = vpop.f32.mrb[36].mxu1 }
 0x6af   : > { %v5939_v42 = vpop.f32.mrb[37].mxu1 }
 0x6b0   : > { %v5940_v49 = vadd.f32 %v5939_v42, %v5938_v41  ;;  %v5941_v50 = vpop.f32.mrb[38].mxu1  ;;  %v2820_v42 = vadd.f32 %v8578_v9, %v8575_v25 }
 0x6b1   : > { %v5942_v44 = vpop.f32.mrb[39].mxu1 }
 0x6b2   : > { %v2686_v1 = vadd.f32 %v7034_v13, %v5940_v49  ;;  %v5943_v3 = vadd.f32 %v5942_v44, %v5941_v50  ;;  %v7037_v50 = vld [vmem:[%s7446_s13 + $0x58] sm:$0xff]  ;;  %v2827_v44 = vadd.f32 %v8586_v31, %v8581_v35  ;;  %v2834_v13 = vadd.f32 %v8596_v51, %v8593_v58 }
 0x6b4   : > { %v8599_v40 = vadd.f32 %v2782_v4, %v2686_v1  ;;  %v2689_v45 = vadd.f32 %v7035_v16, %v5943_v3  ;;  %v2821_v16 = vrot.slane %v2820_v42, 4 }
 0x6b6   : > { %v8602_v55 = vadd.f32 %v2785_v56, %v2689_v45  ;;  %v5944_v24 = vpop.f32.mrb[40].mxu1  ;;  %v2813_v56 = vadd.f32 %v8572_v14, %v8569_v54 }
 0x6b7   : > { %v5945_v36 = vpop.f32.mrb[41].mxu1 }
 0x6b8   : > { %v5946_v27 = vadd.f32 %v5945_v36, %v5944_v24  ;;  %v5947_v62 = vpop.f32.mrb[42].mxu1 }
 0x6b9   : > { %v5948_v12 = vpop.f32.mrb[43].mxu1 }
 0x6ba   : > { %v2694_v63 = vadd.f32 %v7036_v17, %v5946_v27  ;;  %v5949_v41 = vadd.f32 %v5948_v12, %v5947_v62  ;;  %v2814_v62 = vrot.slane %v2813_v56, 4  ;;  %v2828_v12 = vrot.slane %v2827_v44, 4 }
 0x6bc   : > { %v8607_v49 = vadd.f32 %v6324_v52, %v2694_v63  ;;  %v2697_v4 = vadd.f32 %v7037_v50, %v5949_v41  ;;  %v2841_v52 = vadd.f32 %v8602_v55, %v8599_v40  ;;  %v2835_v63 = vrot.slane %v2834_v13, 4  ;;  %v7038_v41 = vld [vmem:[%s7446_s13 + $0x60] sm:$0xff] }
 0x6bd   : > { %v2815_v26 = vadd.f32 %v2814_v62, %v2813_v56  ;;  %v2829_v57 = vadd.f32 %v2828_v12, %v2827_v44 }
 0x6be   : > { %v8616_v1 = vadd.f32 %v6325_v37, %v2697_v4  ;;  %v5950_v3 = vpop.f32.mrb[44].mxu1  ;;  %v2822_v4 = vadd.f32 %v2821_v16, %v2820_v42  ;;  %v2842_v20 = vrot.slane %v2841_v52, 4  ;;  %v2836_v28 = vadd.f32 %v2835_v63, %v2834_v13  ;;  %v7040_v13 = vld [vmem:[%s7446_s13 + $0x70] sm:$0xff] }
 0x6bf   : > { %v5951_v45 = vpop.f32.mrb[45].mxu1 }
 0x6c0   : > { %v2848_v24 = vadd.f32 %v8616_v1, %v8607_v49  ;;  %v5952_v36 = vadd.f32 %v5951_v45, %v5950_v3  ;;  %v5953_v27 = vpop.f32.mrb[46].mxu1  ;;  %v2823_v34 = vrot.slane %v2822_v4, 2  ;;  %v2843_v30 = vadd.f32 %v2842_v20, %v2841_v52  ;;  %v7041_v52 = vld [vmem:[%s7446_s13 + $0x78] sm:$0xff] }
 0x6c1   : > { %v5954_v17 = vpop.f32.mrb[47].mxu1  ;;  %v2837_v44 = vrot.slane %v2836_v28, 2 }
 0x6c2   : > { %v2702_v50 = vadd.f32 %v7038_v41, %v5952_v36  ;;  %v5955_v37 = vadd.f32 %v5954_v17, %v5953_v27  ;;  %v2849_v18 = vrot.slane %v2848_v24, 4  ;;  %v2816_v27 = vrot.slane %v2815_v26, 2 }
 0x6c3   : > { %v2844_v17 = vrot.slane %v2843_v30, 2 }
 0x6c4   : > { %v8623_v6 = vadd.f32 %v2798_v46, %v2702_v50  ;;  %v2705_v39 = vadd.f32 %v7039_v33, %v5955_v37  ;;  %v2850_v36 = vadd.f32 %v2849_v18, %v2848_v24  ;;  %v2830_v33 = vrot.slane %v2829_v57, 2 }
 0x6c5   : > { %v2838_v50 = vadd.f32 %v2837_v44, %v2836_v28  ;;  %v2845_v43 = vadd.f32 %v2844_v17, %v2843_v30 }
 0x6c6   : > { %v8627_v3 = vadd.f32 %v8590_v11, %v2705_v39  ;;  %v5956_v45 = vpop.f32.mrb[48].mxu1  ;;  %v2824_v11 = vadd.f32 %v2823_v34, %v2822_v4  ;;  %v2851_v63 = vrot.slane %v2850_v36, 2  ;;  %v2831_v41 = vadd.f32 %v2830_v33, %v2829_v57 }
 0x6c7   : > { %v5957_v47 = vpop.f32.mrb[49].mxu1 }
 0x6c8   : > { %v2855_v42 = vadd.f32 %v8627_v3, %v8623_v6  ;;  %v5958_v46 = vadd.f32 %v5957_v47, %v5956_v45  ;;  %v5959_v16 = vpop.f32.mrb[50].mxu1  ;;  %v2817_v47 = vadd.f32 %v2816_v27, %v2815_v26  ;;  %v2825_v32 = vrot.slane %v2824_v11, 1 }
 0x6c9   : > { %v5960_v56 = vpop.f32.mrb[51].mxu1  ;;  %v2832_v4 = vrot.slane %v2831_v41, 1 }
 0x6ca   : > { %v2856_v62 = vrot.slane %v2855_v42, 4  ;;  %v2710_v12 = vadd.f32 %v7040_v13, %v5958_v46  ;;  %v5961_v39 = vadd.f32 %v5960_v56, %v5959_v16  ;;  %v2852_v46 = vadd.f32 %v2851_v63, %v2850_v36 }
 0x6cb   : > { %v2818_v16 = vrot.slane %v2817_v47, 1  ;;  %v2826_v13 = vadd.f32 %v2825_v32, %v2824_v11  ;;  %v2833_v28 = vadd.f32 %v2832_v4, %v2831_v41 }
 0x6cc   : > { %v2857_v20 = vadd.f32 %v2856_v62, %v2855_v42  ;;  %v8633_v18 = vadd.f32 %v8584_v53, %v2710_v12  ;;  %v2713_v24 = vadd.f32 %v7041_v52, %v5961_v39  ;;  %v2839_v53 = vrot.slane %v2838_v50, 1 }
 0x6cd   : > { %v2846_v62 = vrot.slane %v2845_v43, 1  ;;  %v2853_v57 = vrot.slane %v2852_v46, 1  ;;  %v2819_v33 = vadd.f32 %v2818_v16, %v2817_v47 }
 0x6ce   : > { %v2858_v37 = vrot.slane %v2857_v20, 2  ;;  %v8637_v45 = vadd.f32 %v8588_v23, %v2713_v24  ;;  %v2840_v23 = vadd.f32 %v2839_v53, %v2838_v50 }
 0x6cf   : > { %v2847_v30 = vadd.f32 %v2846_v62, %v2845_v43  ;;  %v2877_v36 = vsel %vm9743_vm12, %v2826_v13, %v2819_v33  ;;  %v2854_v12 = vadd.f32 %v2853_v57, %v2852_v46 }
 0x6d0   : > { %v2862_v34 = vadd.f32 %v8637_v45, %v8633_v18  ;;  %v2859_v42 = vadd.f32 %v2858_v37, %v2857_v20  ;;  %v2878_v63 = vsel %vm9744_vm5, %v2833_v28, %v2877_v36 }
 0x6d1   : > { %v2879_v52 = vsel %vm9745_vm8, %v2840_v23, %v2878_v63 }
 0x6d2   : > { %v2863_v56 = vrot.slane %v2862_v34, 4  ;;  %v2860_v27 = vrot.slane %v2859_v42, 1  ;;  %v2880_v32 = vsel %vm9746_vm15, %v2847_v30, %v2879_v52 }
 0x6d3   : > { %v2881_v24 = vsel %vm9747_vm13, %v2854_v12, %v2880_v32  ;;  %vm9752_vm13 = vmmov %vm9745_vm8  ;;  %vm9753_vm8 = vcmask 1045509  }
 0x6d4   : > { %v2864_v26 = vadd.f32 %v2863_v56, %v2862_v34  ;;  %v2861_v17 = vadd.f32 %v2860_v27, %v2859_v42 }
 0x6d6   : > { %v2865_v44 = vrot.slane %v2864_v26, 2  ;;  %v2882_v41 = vsel %vm9748_vm10, %v2861_v17, %v2881_v24  ;;  %vm9751_vm10 = vmmov %vm9744_vm5  ;;  %vm9755_vm5 = vcmask 1047559  }
 0x6d8   : > { %v2866_v39 = vadd.f32 %v2865_v44, %v2864_v26 }
 0x6da   : > { %v2867_v20 = vrot.slane %v2866_v39, 1 }
 0x6dc   : > { %v2868_v11 = vadd.f32 %v2867_v20, %v2866_v39 }
 0x6de   : > { %v2883_v47 = vsel %vm9749_vm11, %v2868_v11, %v2882_v41  ;;  %vm9750_vm11 = vmmov %vm9743_vm12  ;;  %vm9754_vm12 = vcmask 1046534  }
 0x6df   : > { %6363 = vmatmul.mubr.f32.vlgmr.msra.gmra.mrb[52].mxu0 %v2883_v47 }
 0x7b2   : > { %v2951_v43 = vpop.f32.mrb[52].mxu0 }
 0x7b3   : > { %v2956_v50 = vcombine.high %v2951_v43, %v2951_v43  ;;  %v2963_v37 = vrot.slane %v2951_v43, %v7566_v10  ;;  %v6364_v46 = vpop.f32.mrb[53].mxu0 }
 0x7b5   : > { %v2970_v34 = vrot.slane %v2956_v50, %v7566_v10  ;;  %v2971_v4 = vcombine.high %v2963_v37, %v2963_v37  ;;  %v2979_v42 = vrot.slane %v2963_v37, %v7566_v10 }
 0x7b7   : > { %v2972_v16 = vcombine.high %v2970_v34, %v2970_v34  ;;  %v2986_v53 = vrot.slane %v2970_v34, %v7566_v10  ;;  %v2993_v56 = vrot.slane %v2971_v4, %v7566_v10  ;;  %v3001_v62 = vcombine.high %v2979_v42, %v2979_v42 }
 0x7b8   : > { %v3008_v13 = vrot.slane %v2979_v42, %v7570_v15 }
 0x7b9   : > { %v3000_v57 = vrot.slane %v2972_v16, %v7566_v10  ;;  %v3002_v26 = vcombine.high %v2986_v53, %v2986_v53  ;;  %v3003_v28 = vcombine.high %v2993_v56, %v2993_v56  ;;  %v3012_v27 = vrot.slane %v2993_v56, %v7570_v15 }
 0x7ba   : > { %v3016_v33 = vrot.slane %v3001_v62, %v7570_v15  ;;  %v3024_v23 = vrot.slane %v2986_v53, %v7570_v15  ;;  %v8659_v44 = vsub.f32 %v8569_v54, %v3008_v13  ;;  %v8662_v30 = vsub.f32 %v8572_v14, %v3008_v13 }
 0x7bb   : > { %v3004_v36 = vcombine.high %v3000_v57, %v3000_v57  ;;  %v3020_v12 = vrot.slane %v3003_v28, %v7570_v15  ;;  %v3028_v39 = vrot.slane %v3000_v57, %v7570_v15  ;;  %v3032_v17 = vrot.slane %v3002_v26, %v7570_v15 }
 0x7bc   : > { %v8668_v63 = vsub.f32 %v8575_v25, %v3012_v27  ;;  %v8671_v20 = vsub.f32 %v8578_v9, %v3012_v27  ;;  %v8674_v52 = vsub.f32 %v8581_v35, %v3016_v33  ;;  %v8677_v54 = vsub.f32 %v8586_v31, %v3016_v33 }
 0x7bd   : > { %v3036_v14 = vrot.slane %v3004_v36, %v7570_v15  ;;  %v8681_v32 = vsub.f32 %v8593_v58, %v3020_v12  ;;  %v8684_v11 = vsub.f32 %v8596_v51, %v3020_v12  ;;  %v8687_v25 = vsub.f32 %v8599_v40, %v3024_v23 }
 0x7be   : > { %v8690_v9 = vsub.f32 %v8602_v55, %v3024_v23  ;;  %v8693_v35 = vsub.f32 %v8607_v49, %v3028_v39  ;;  %v8696_v31 = vsub.f32 %v8616_v1, %v3028_v39  ;;  %v8699_v24 = vsub.f32 %v8623_v6, %v3032_v17 }
 0x7bf   : > { %v8702_v58 = vsub.f32 %v8627_v3, %v3032_v17  ;;  %v8705_v51 = vsub.f32 %v8633_v18, %v3036_v14  ;;  %v8708_v40 = vsub.f32 %v8637_v45, %v3036_v14  ;;  %v3061_v55 = vmul.f32 %v8659_v44, %v8659_v44 }
 0x7c0   : > { %v3062_v49 = vmul.f32 %v8662_v30, %v8662_v30  ;;  %v3063_v1 = vmul.f32 %v8668_v63, %v8668_v63  ;;  %v3064_v6 = vmul.f32 %v8671_v20, %v8671_v20  ;;  %v3065_v3 = vmul.f32 %v8674_v52, %v8674_v52 }
 0x7c1   : > { %v3066_v18 = vmul.f32 %v8677_v54, %v8677_v54  ;;  %v3067_v45 = vmul.f32 %v8681_v32, %v8681_v32  ;;  %v3068_v41 = vmul.f32 %v8684_v11, %v8684_v11  ;;  %v3069_v47 = vmul.f32 %v8687_v25, %v8687_v25 }
 0x7c2   : > { %v3070_v43 = vmul.f32 %v8690_v9, %v8690_v9  ;;  %v3071_v50 = vmul.f32 %v8693_v35, %v8693_v35  ;;  %v3072_v37 = vmul.f32 %v8696_v31, %v8696_v31  ;;  %v3073_v46 = vmul.f32 %v8699_v24, %v8699_v24 }
 0x7c3   : > { %v3074_v34 = vmul.f32 %v8702_v58, %v8702_v58  ;;  %v3075_v4 = vmul.f32 %v8705_v51, %v8705_v51  ;;  %v3076_v42 = vmul.f32 %v8708_v40, %v8708_v40  ;;  %v3077_v16 = vadd.f32 %v3062_v49, %v3061_v55 }
 0x7c4   : > { %v3084_v53 = vadd.f32 %v3064_v6, %v3063_v1  ;;  %v3091_v56 = vadd.f32 %v3066_v18, %v3065_v3  ;;  %v3098_v62 = vadd.f32 %v3068_v41, %v3067_v45  ;;  %v3105_v13 = vadd.f32 %v3070_v43, %v3069_v47 }
 0x7c5   : > { %v3078_v57 = vrot.slane %v3077_v16, 4  ;;  %v3112_v26 = vadd.f32 %v3072_v37, %v3071_v50  ;;  %v3119_v28 = vadd.f32 %v3074_v34, %v3073_v46  ;;  %v3126_v27 = vadd.f32 %v3076_v42, %v3075_v4 }
 0x7c6   : > { %v3085_v33 = vrot.slane %v3084_v53, 4  ;;  %v3092_v23 = vrot.slane %v3091_v56, 4  ;;  %v3099_v36 = vrot.slane %v3098_v62, 4  ;;  %v3106_v12 = vrot.slane %v3105_v13, 4 }
 0x7c7   : > { %v3079_v39 = vadd.f32 %v3078_v57, %v3077_v16  ;;  %v3113_v17 = vrot.slane %v3112_v26, 4  ;;  %v3120_v14 = vrot.slane %v3119_v28, 4  ;;  %v3127_v19 = vrot.slane %v3126_v27, 4 }
 0x7c8   : > { %v3086_v61 = vadd.f32 %v3085_v33, %v3084_v53  ;;  %v3093_v2 = vadd.f32 %v3092_v23, %v3091_v56  ;;  %v3100_v59 = vadd.f32 %v3099_v36, %v3098_v62  ;;  %v3107_v55 = vadd.f32 %v3106_v12, %v3105_v13 }
 0x7c9   : > { %v3080_v49 = vrot.slane %v3079_v39, 2  ;;  %v3114_v1 = vadd.f32 %v3113_v17, %v3112_v26  ;;  %v3121_v6 = vadd.f32 %v3120_v14, %v3119_v28  ;;  %v3128_v3 = vadd.f32 %v3127_v19, %v3126_v27 }
 0x7ca   : > { %v3087_v18 = vrot.slane %v3086_v61, 2  ;;  %v3094_v45 = vrot.slane %v3093_v2, 2  ;;  %v3101_v41 = vrot.slane %v3100_v59, 2  ;;  %v3108_v47 = vrot.slane %v3107_v55, 2 }
 0x7cb   : > { %v3081_v43 = vadd.f32 %v3080_v49, %v3079_v39  ;;  %v3115_v50 = vrot.slane %v3114_v1, 2  ;;  %v3122_v37 = vrot.slane %v3121_v6, 2  ;;  %v3129_v46 = vrot.slane %v3128_v3, 2 }
 0x7cc   : > { %v3088_v34 = vadd.f32 %v3087_v18, %v3086_v61  ;;  %v3095_v4 = vadd.f32 %v3094_v45, %v3093_v2  ;;  %v3102_v42 = vadd.f32 %v3101_v41, %v3100_v59  ;;  %v3109_v16 = vadd.f32 %v3108_v47, %v3107_v55  ;;  %v6842_v41 = vld [vmem:[#allocation6 + $0x80] sm:$0xff]  }
 0x7cd   : > { %v3082_v53 = vrot.slane %v3081_v43, 1  ;;  %v3116_v56 = vadd.f32 %v3115_v50, %v3114_v1  ;;  %v3123_v62 = vadd.f32 %v3122_v37, %v3121_v6  ;;  %v3130_v28 = vadd.f32 %v3129_v46, %v3128_v3  ;;  %6400 = vmatprep.subr.bf16.mxu1 %v6842_v41  ;;  %v6843_v47 = vld [vmem:[#allocation6 + $0x40] sm:$0xff]   ;;  %v6845_v50 = vld [vmem:[#allocation6 + $0x88] sm:$0xff]  }
 0x7ce   : > { %v3089_v13 = vrot.slane %v3088_v34, 1  ;;  %v3096_v57 = vrot.slane %v3095_v4, 1  ;;  %v3103_v26 = vrot.slane %v3102_v42, 1  ;;  %v3110_v27 = vrot.slane %v3109_v16, 1  ;;  %6012 = vmatprep.subr.bf16.mxu0 %v6843_v47  ;;  %v6846_v37 = vld [vmem:[#allocation6 + $0x48] sm:$0xff]  }
 0x7cf   : > { %v3083_v19 = vadd.f32 %v3082_v53, %v3081_v43  ;;  %v3117_v12 = vrot.slane %v3116_v56, 1  ;;  %v3124_v39 = vrot.slane %v3123_v62, 1  ;;  %v3131_v17 = vrot.slane %v3130_v28, 1  ;;  %v6844_v43 = vld [vmem:[#allocation6] sm:$0xff]   ;;  %v6847_v46 = vld [vmem:[#allocation6 + $0x8] sm:$0xff]   ;;  %v6852_v53 = vld [vmem:[#allocation6 + $0x58] sm:$0xff]  }
 0x7d0   : > { %v3090_v33 = vadd.f32 %v3089_v13, %v3088_v34  ;;  %v3097_v23 = vadd.f32 %v3096_v57, %v3095_v4  ;;  %v3104_v36 = vadd.f32 %v3103_v26, %v3102_v42  ;;  %v3111_v2 = vadd.f32 %v3110_v27, %v3109_v16  ;;  %6013 = vmatpush3.bf16.msra.mxu0 %v6844_v43  ;;  %v6848_v34 = vld [vmem:[#allocation6 + $0x90] sm:$0xff]   ;;  %v6851_v16 = vld [vmem:[#allocation6 + $0x98] sm:$0xff]   ;;  %v6855_v13 = vld [vmem:[#allocation6 + $0x60] sm:$0xff]  }
 0x7d1   : > { %v3118_v14 = vadd.f32 %v3117_v12, %v3116_v56  ;;  %v3125_v49 = vadd.f32 %v3124_v39, %v3123_v62  ;;  %v3132_v6 = vadd.f32 %v3131_v17, %v3130_v28  ;;  %6014 = vmatprep.subr.bf16.mxu0 %v6846_v37  ;;  %v6849_v4 = vld [vmem:[#allocation6 + $0x50] sm:$0xff]   ;;  %v6854_v56 = vld [vmem:[#allocation6 + $0xa0] sm:$0xff]   ;;  %v6853_v62 = vld [vmem:[#allocation6 + $0x18] sm:$0xff]  }
 0x7d2   : > { %v3141_v61 = vsel %vm9750_vm11, %v3090_v33, %v3083_v19  ;;  %v6850_v42 = vld [vmem:[#allocation6 + $0x10] sm:$0xff]   ;;  %v6857_v57 = vld [vmem:[#allocation6 + $0xa8] sm:$0xff]   ;;  %v6856_v26 = vld [vmem:[#allocation6 + $0x20] sm:$0xff]  }
 0x7d3   : > { %v3142_v59 = vsel %vm9751_vm10, %v3097_v23, %v3141_v61  ;;  %v6858_v28 = vld [vmem:[#allocation6 + $0x68] sm:$0xff]   ;;  %v6860_v19 = vld [vmem:[#allocation6 + $0xb0] sm:$0xff]   ;;  %v6863_v23 = vld [vmem:[#allocation6 + $0xb8] sm:$0xff]  }
 0x7d4   : > { %v3143_v55 = vsel %vm9752_vm13, %v3104_v36, %v3142_v59  ;;  %6015 = vmatpush3.bf16.msra.mxu0 %v6847_v46  ;;  %v6859_v27 = vld [vmem:[#allocation6 + $0x28] sm:$0xff]   ;;  %v6861_v33 = vld [vmem:[#allocation6 + $0x70] sm:$0xff]   ;;  %v6864_v12 = vld [vmem:[#allocation6 + $0x78] sm:$0xff]  }
 0x7d5   : > { %v3144_v1 = vsel %vm9746_vm15, %v3111_v2, %v3143_v55  ;;  %6016 = vmatprep.subr.bf16.mxu0 %v6849_v4  ;;  %v6862_v36 = vld [vmem:[#allocation6 + $0x30] sm:$0xff]   ;;  %v6865_v39 = vld [vmem:[#allocation6 + $0x38] sm:$0xff]  }
 0x7d6   : > { %v3145_v3 = vsel %vm9753_vm8, %v3118_v14, %v3144_v1 }
 0x7d7   : > { %v3146_v18 = vsel %vm9754_vm12, %v3125_v49, %v3145_v3  ;;  %vm9756_vm12 = vcmp.lt.s32.totalorder %v7563_v7, 7 }
 0x7d8   : > { %v3147_v45 = vsel %vm9755_vm5, %v3132_v6, %v3146_v18  ;;  %6017 = vmatpush3.bf16.msra.mxu0 %v6850_v42 }
 0x7d9   : > { %6398 = vmatmul.mubr.f32.vlgmr.msra.gmra.mrb[52].mxu1 %v3147_v45  ;;  %6018 = vmatprep.subr.bf16.mxu0 %v6852_v53 }
 0x7da   : > { %6401 = vmatpush3.bf16.msra.mxu1 %v6842_v41 }
 0x7db   : > { %6402 = vmatprep.subr.bf16.mxu1 %v6845_v50 }
 0x7dc   : > { %6019 = vmatpush3.bf16.msra.mxu0 %v6853_v62 }
 0x7dd   : > { %6020 = vmatprep.subr.bf16.mxu0 %v6855_v13 }
 0x7de   : > { %6403 = vmatpush3.bf16.msra.mxu1 %v6845_v50 }
 0x7df   : > { %6404 = vmatprep.subr.bf16.mxu1 %v6848_v34 }
 0x7e0   : > { %6021 = vmatpush3.bf16.msra.mxu0 %v6856_v26 }
 0x7e1   : > { %6022 = vmatprep.subr.bf16.mxu0 %v6858_v28 }
 0x7e2   : > { %6405 = vmatpush3.bf16.msra.mxu1 %v6848_v34 }
 0x7e3   : > { %6406 = vmatprep.subr.bf16.mxu1 %v6851_v16 }
 0x7e4   : > { %6023 = vmatpush3.bf16.msra.mxu0 %v6859_v27 }
 0x7e5   : > { %6024 = vmatprep.subr.bf16.mxu0 %v6861_v33 }
 0x7e6   : > { %6407 = vmatpush3.bf16.msra.mxu1 %v6851_v16 }
 0x7e7   : > { %6408 = vmatprep.subr.bf16.mxu1 %v6854_v56 }
 0x7e8   : > { %6025 = vmatpush3.bf16.msra.mxu0 %v6862_v36 }
 0x7e9   : > { %6026 = vmatprep.subr.bf16.mxu0 %v6864_v12 }
 0x7ea   : > { %6409 = vmatpush3.bf16.msra.mxu1 %v6854_v56 }
 0x7eb   : > { %6410 = vmatprep.subr.bf16.mxu1 %v6857_v57 }
 0x7ec   : > { %6027 = vmatpush3.bf16.msra.mxu0 %v6865_v39 }
 0x7ed   : > { %6670 = vmatprep.subr.bf16.mxu0 %v9690_v0 }
 0x7ee   : > { %6411 = vmatpush3.bf16.msra.mxu1 %v6857_v57 }
 0x7ef   : > { %6412 = vmatprep.subr.bf16.mxu1 %v6860_v19 }
 0x7f2   : > { %6413 = vmatpush3.bf16.msra.mxu1 %v6860_v19 }
 0x7f3   : > { %6414 = vmatprep.subr.bf16.mxu1 %v6863_v23 }
 0x7f6   : > { %6415 = vmatpush3.bf16.msra.mxu1 %v6863_v23 }
 0x7f7   : > { %6646 = vmatprep.subr.bf16.mxu1 %v9690_v0 }
 0x8ac   : > { %v3215_v17 = vpop.f32.mrb[52].mxu1 }
 0x8ad   : > { %v3220_v61 = vcombine.high %v3215_v17, %v3215_v17  ;;  %v3227_v2 = vrot.slane %v3215_v17, %v7566_v10  ;;  %v6399_v59 = vpop.f32.mrb[53].mxu1 }
 0x8af   : > { %v3234_v14 = vrot.slane %v3220_v61, %v7566_v10  ;;  %v3235_v55 = vcombine.high %v3227_v2, %v3227_v2  ;;  %v3243_v49 = vrot.slane %v3227_v2, %v7566_v10 }
 0x8b1   : > { %v3236_v1 = vcombine.high %v3234_v14, %v3234_v14  ;;  %v3250_v6 = vrot.slane %v3234_v14, %v7566_v10  ;;  %v3257_v3 = vrot.slane %v3235_v55, %v7566_v10  ;;  %v3265_v18 = vcombine.high %v3243_v49, %v3243_v49 }
 0x8b2   : > { %v3277_v45 = vadd.f32 1e-05, %v3243_v49 }
 0x8b3   : > { %v3264_v41 = vrot.slane %v3236_v1, %v7566_v10  ;;  %v3266_v47 = vcombine.high %v3250_v6, %v3250_v6  ;;  %v3267_v43 = vcombine.high %v3257_v3, %v3257_v3  ;;  %v3278_v50 = vadd.f32 1e-05, %v3257_v3 }
 0x8b4   : > { %v3279_v37 = vadd.f32 1e-05, %v3265_v18  ;;  %6994 = vrsqrt.f32 %v3277_v45  ;;  %v3281_v4 = vadd.f32 1e-05, %v3250_v6 }
 0x8b5   : > { %v3268_v46 = vcombine.high %v3264_v41, %v3264_v41  ;;  %v3280_v34 = vadd.f32 1e-05, %v3267_v43  ;;  %v3282_v42 = vadd.f32 1e-05, %v3264_v41  ;;  %6996 = vrsqrt.f32 %v3278_v50 }
 0x8b6   : > { %v3283_v16 = vadd.f32 1e-05, %v3266_v47  ;;  %6998 = vrsqrt.f32 %v3279_v37 }
 0x8b7   : > { %v3284_v53 = vadd.f32 1e-05, %v3268_v46  ;;  %7000 = vrsqrt.f32 %v3280_v34 }
 0x8b8   : > { %7002 = vrsqrt.f32 %v3281_v4 }
 0x8b9   : > { %7004 = vrsqrt.f32 %v3282_v42 }
 0x8ba   : > { %7006 = vrsqrt.f32 %v3283_v16 }
 0x8bb   : > { %7008 = vrsqrt.f32 %v3284_v53 }
 0x8be   : > { %v6995_v56 = vpop.eup %6994 }
 0x8bf   : > { %v3304_v62 = vrot.slane %v6995_v56, %v7570_v15  ;;  %v6997_v13 = vpop.eup %6996 }
 0x8c0   : > { %v6999_v57 = vpop.eup %6998  ;;  %v3308_v26 = vrot.slane %v6997_v13, %v7570_v15 }
 0x8c1   : > { %v3341_v28 = vmul.f32 %v3304_v62, %v8659_v44  ;;  %v3342_v19 = vmul.f32 %v3304_v62, %v8662_v30  ;;  %v7001_v27 = vpop.eup %7000  ;;  %v3312_v33 = vrot.slane %v6999_v57, %v7570_v15 }
 0x8c2   : > { %v7003_v23 = vpop.eup %7002  ;;  %v3316_v36 = vrot.slane %v7001_v27, %v7570_v15  ;;  %v3344_v12 = vmul.f32 %v3308_v26, %v8671_v20  ;;  %v3343_v14 = vmul.f32 %v3308_v26, %v8668_v63 }
 0x8c3   : > { %vm3357_vm11 = vcmp.ge.f32.partialorder %v3341_v28, 0.0  ;;  %vm3358_vm10 = vcmp.ge.f32.partialorder %v3342_v19, 0.0  ;;  %v7005_v39 = vpop.eup %7004  ;;  %v3320_v17 = vrot.slane %v7003_v23, %v7570_v15  ;;  %v3345_v61 = vmul.f32 %v3312_v33, %v8674_v52 }
 0x8c4   : > { %v3373_v2 = vmul.f32 0.01, %v3341_v28  ;;  %v3374_v59 = vmul.f32 0.01, %v3342_v19  ;;  %v7007_v44 = vpop.eup %7006  ;;  %v8767_v30 = vrot.slane %v7005_v39, %v7570_v15  ;;  %vm3360_vm13 = vcmp.ge.f32.partialorder %v3344_v12, 0.0 }
 0x8c5   : > { %v3376_v55 = vmul.f32 0.01, %v3344_v12  ;;  %v7009_v49 = vpop.eup %7008  ;;  %v8771_v20 = vrot.slane %v7007_v44, %v7570_v15  ;;  %vm3361_vm15 = vcmp.ge.f32.partialorder %v3345_v61, 0.0  ;;  %vm3359_vm8 = vcmp.ge.f32.partialorder %v3343_v14, 0.0 }
 0x8c6   : > { %v8773_v1 = vsel %vm3357_vm11, %v3341_v28, %v3373_v2  ;;  %v8775_v6 = vsel %vm3358_vm10, %v3342_v19, %v3374_v59  ;;  %v8778_v52 = vrot.slane %v7009_v49, %v7570_v15  ;;  %v3375_v47 = vmul.f32 0.01, %v3343_v14 }
 0x8c7   : > { %v3453_v3 = vrot.slane %v8773_v1, 7  ;;  %v3454_v18 = vrot.slane %v8775_v6, 7  ;;  %v3501_v63 = vrot.slane %v8773_v1, 1  ;;  %v3502_v45 = vrot.slane %v8775_v6, 1 }
 0x8c8   : > { %v8786_v41 = vpack.c.bf16 %v8775_v6, %v8773_v1  ;;  %v3356_v43 = vmul.f32 %v8778_v52, %v8708_v40  ;;  %v3377_v50 = vmul.f32 0.01, %v3345_v61  ;;  %v8791_v37 = vsel %vm3360_vm13, %v3344_v12, %v3376_v55  ;;  %vm9757_vm13 = vmmov %vm9756_vm12 }
 0x8c9   : > { %v3346_v46 = vmul.f32 %v3312_v33, %v8677_v54  ;;  %v8795_v34 = vsel %vm3359_vm8, %v3343_v14, %v3375_v47  ;;  %v3531_v4 = vsel %vm9756_vm12, %v3501_v63, %v3502_v45  ;;  %v3504_v42 = vrot.slane %v8791_v37, 1  ;;  %vm9758_vm8 = vmmov %vm9756_vm12 }
 0x8ca   : > { %3749 = vmatprep.mubr.bf16.mxu0 %v8786_v41  ;;  %v3347_v16 = vmul.f32 %v3316_v36, %v8681_v32  ;;  %v3503_v40 = vrot.slane %v8795_v34, 1  ;;  %v8805_v53 = vsel %vm3361_vm15, %v3345_v61, %v3377_v50  ;;  %vm3372_vm10 = vcmp.ge.f32.partialorder %v3356_v43, 0.0  ;;  %vm9759_vm15 = vmmov %vm9758_vm8 }
 0x8cb   : > { %vm3362_vm5 = vcmp.ge.f32.partialorder %v3346_v46, 0.0  ;;  %v3378_v54 = vmul.f32 0.01, %v3346_v46  ;;  %v3505_v56 = vrot.slane %v8805_v53, 1  ;;  %v3388_v32 = vmul.f32 0.01, %v3356_v43 }
 0x8cc   : > { %vm3363_vm11 = vcmp.ge.f32.partialorder %v3347_v16, 0.0  ;;  %v3379_v62 = vmul.f32 0.01, %v3347_v16  ;;  %v3530_v13 = vsel %vm9757_vm13, %v3502_v45, %v3503_v40  ;;  %v3529_v57 = vsel %vm9758_vm8, %v3503_v40, %v3504_v42 }
 0x8cd   : > { %v8812_v26 = vsel %vm3362_vm5, %v3346_v46, %v3378_v54  ;;  %v5604_v28 = vpack.c.bf16 %v3530_v13, %v3531_v4  ;;  %v3528_v19 = vsel %vm9759_vm15, %v3504_v42, %v3505_v56  ;;  %v8820_v39 = vsel %vm3372_vm10, %v3356_v43, %v3388_v32  ;;  %vm9761_vm5 = vmmov %vm9758_vm8 }
 0x8ce   : > { %v8816_v27 = vsel %vm3363_vm11, %v3347_v16, %v3379_v62  ;;  %v3506_v33 = vrot.slane %v8812_v26, 1  ;;  %v5608_v23 = vpack.c.bf16 %v3528_v19, %v3529_v57  ;;  %vm9760_vm12 = vcmp.lt.s32.totalorder %v7563_v7, 1  ;;  %vm9762_vm11 = vmmov %vm9761_vm5 }
 0x8cf   : > { %v3507_v12 = vrot.slane %v8816_v27, 1  ;;  %v3483_v61 = vsel %vm9760_vm12, %v3453_v3, %v3454_v18  ;;  %6416 = vmatprep.mubr.msk.bf16.mxu1 %vm7785_vm4, %v5604_v28  ;;  %v3468_v59 = vrot.slane %v8820_v39, 7  ;;  %v8833_v44 = vpack.c.bf16 %v8791_v37, %v8795_v34  ;;  %vm9763_vm10 = vmmov %vm9760_vm12 }
 0x8d0   : > { %v3527_v2 = vsel %vm9761_vm5, %v3505_v56, %v3506_v33  ;;  %v3348_v14 = vmul.f32 %v3316_v36, %v8684_v11  ;;  %6417 = vmatmul.mubr.msk.bf16.vlgmr.msra.gmra.mrb[56].mxu1 %vm7804_vm9, %v5608_v23  ;;  %v3349_v49 = vmul.f32 %v3320_v17, %v8687_v25  ;;  %v3350_v45 = vmul.f32 %v3320_v17, %v8690_v9 }
 0x8d1   : > { %v3526_v55 = vsel %vm9762_vm11, %v3506_v33, %v3507_v12  ;;  %v3351_v47 = vmul.f32 %v8767_v30, %v8693_v35  ;;  %v3484_v50 = vsel %vm9763_vm10, %v3468_v59, %v3453_v3  ;;  %6648 = vmatpush3.bf16.msra.mxu1 %v7441_v5  ;;  %v3455_v4 = vrot.slane %v8795_v34, 7 }
 0x8d2   : > { %v5612_v43 = vpack.c.bf16 %v3526_v55, %v3527_v2  ;;  %vm3364_vm13 = vcmp.ge.f32.partialorder %v3348_v14, 0.0  ;;  %v3380_v11 = vmul.f32 0.01, %v3348_v14  ;;  %v5572_v36 = vpack.c.bf16 %v3483_v61, %v3484_v50  ;;  %6649 = vmatprep.subr.bf16.mxu1 %v9690_v0 }
 0x8d3   : > { %vm3365_vm8 = vcmp.ge.f32.partialorder %v3349_v49, 0.0  ;;  %v3381_v46 = vmul.f32 0.01, %v3349_v49  ;;  %vm3366_vm15 = vcmp.ge.f32.partialorder %v3350_v45, 0.0  ;;  %vm3367_vm12 = vcmp.ge.f32.partialorder %v3351_v47, 0.0 }
 0x8d4   : > { %6420 = vmatprep.mubr.msk.bf16.mxu1 %vm7847_vm14, %v5612_v43  ;;  %v8852_v25 = vsel %vm3364_vm13, %v3348_v14, %v3380_v11  ;;  %v3382_v9 = vmul.f32 0.01, %v3350_v45  ;;  %v3383_v35 = vmul.f32 0.01, %v3351_v47  ;;  %5573 = vmatmul.mubr.msk.bf16.vlgmr.msra.gmra.mrb[56].mxu0 %vm7864_vm7, %v5572_v36  ;;  %v3456_v42 = vrot.slane %v8791_v37, 7  ;;  %vm9764_vm7 = vmmov %vm9761_vm5 }
 0x8d5   : > { %v8856_v17 = vsel %vm3365_vm8, %v3349_v49, %v3381_v46  ;;  %v3508_v3 = vrot.slane %v8852_v25, 1  ;;  %3757 = vmatprep.mubr.bf16.mxu0 %v8833_v44  ;;  %6651 = vmatpush3.bf16.msra.mxu1 %v7449_v8  ;;  %vm9765_vm5 = vmmov %vm9763_vm10  ;;  %v3352_v57 = vmul.f32 %v8767_v30, %v8696_v31  ;;  %v3353_v32 = vmul.f32 %v8771_v20, %v8699_v24 }
 0x8d6   : > { %v3509_v16 = vrot.slane %v8856_v17, 1  ;;  %v8863_v40 = vsel %vm3366_vm15, %v3350_v45, %v3382_v9  ;;  %v8865_v54 = vsel %vm3367_vm12, %v3351_v47, %v3383_v35  ;;  %v3481_v37 = vsel %vm9765_vm5, %v3455_v4, %v3456_v42  ;;  %6652 = vmatprep.subr.bf16.mxu1 %v9690_v0  ;;  %6672 = vmatpush3.bf16.msra.mxu0 %v7441_v5  ;;  %vm9766_vm11 = vmmov %vm9764_vm7  ;;  %v9777_v35 = vld [vmem:[#allocation14_spill] sm:$0xff] }
 0x8d7   : > { %v3525_v48 = vsel %vm9764_vm7, %v3507_v12, %v3508_v3  ;;  %v3510_v56 = vrot.slane %v8863_v40, 1  ;;  %v3511_v62 = vrot.slane %v8865_v54, 1  ;;  %vm9767_vm10 = vmmov %vm9765_vm5  ;;  %6673 = vmatprep.subr.bf16.mxu0 %v9690_v0  ;;  %vm3368_vm15 = vcmp.ge.f32.partialorder %v3352_v57, 0.0 }
 0x8d8   : > { %v3524_v34 = vsel %vm9766_vm11, %v3508_v3, %v3509_v16  ;;  %v3482_v13 = vsel %vm9767_vm10, %v3454_v18, %v3455_v4  ;;  %vm9768_vm13 = vmmov %vm9764_vm7  ;;  %vm3369_vm12 = vcmp.ge.f32.partialorder %v3353_v32, 0.0  ;;  %v3384_v18 = vmul.f32 0.01, %v3352_v57 }
 0x8d9   : > { %v5616_v28 = vpack.c.bf16 %v3524_v34, %v3525_v48  ;;  %v3522_v5 = vsel %vm9768_vm13, %v3510_v56, %v3511_v62  ;;  %vm9769_vm8 = vmmov %vm9764_vm7  ;;  %v5576_v33 = vpack.c.bf16 %v3481_v37, %v3482_v13  ;;  %6654 = vmatpush3.bf16.msra.mxu1 %v7472_v22  ;;  %v3385_v31 = vmul.f32 0.01, %v3353_v32  ;;  %v9781_v34 = vld [vmem:[#allocation22_spill] sm:$0xff] }
 0x8da   : > { %v3523_v19 = vsel %vm9769_vm8, %v3509_v16, %v3510_v56  ;;  %v3354_v24 = vmul.f32 %v8771_v20, %v8702_v58  ;;  %v3355_v30 = vmul.f32 %v8778_v52, %v8705_v51  ;;  %v3457_v23 = vrot.slane %v8805_v53, 7  ;;  %6655 = vmatprep.subr.bf16.mxu1 %v9690_v0  ;;  %6675 = vmatpush3.bf16.msra.mxu0 %v7449_v8  ;;  %vm9773_vm11 = vmmov %vm9769_vm8 }
 0x8db   : > { %v5620_v6 = vpack.c.bf16 %v3522_v5, %v3523_v19  ;;  %6421 = vmatmul.mubr.msk.bf16.gmra.mrb[60].mxu1 %vm7909_vm1, %v5616_v28  ;;  %v8904_v61 = vpack.c.bf16 %v8812_v26, %v8805_v53  ;;  %v8906_v2 = vsel %vm3368_vm15, %v3352_v57, %v3384_v18  ;;  %v3458_v14 = vrot.slane %v8812_v26, 7  ;;  %6676 = vmatprep.subr.bf16.mxu0 %v9690_v0  ;;  %v9772_v26 = vld [vmem:[#allocation13_spill] sm:$0xff]  ;;  %vm9779_vm15 = vmmov %vm9769_vm8  ;;  %v9785_v57 = vld [vmem:[#allocation15_spill] sm:$0xff] }
 0x8dc   : > { %5577 = vmatmul.mubr.msk.bf16.gmra.mrb[60].mxu0 %vm7936_vm3, %v5576_v33  ;;  %v8912_v51 = vsel %vm3369_vm12, %v3353_v32, %v3385_v31  ;;  %v3512_v20 = vrot.slane %v8906_v2, 1  ;;  %vm3370_vm7 = vcmp.ge.f32.partialorder %v3354_v24, 0.0  ;;  %vm3371_vm5 = vcmp.ge.f32.partialorder %v3355_v30, 0.0  ;;  %vm9774_vm3 = vmmov %vm9767_vm10  ;;  %v9788_v5 = vld [vmem:[#allocation23_spill] sm:$0xff]  ;;  %v9790_v19 = vld [vmem:[#allocation16_spill] sm:$0xff] }
 0x8dd   : > { %6424 = vmatprep.mubr.msk.bf16.mxu1 %vm7929_vm2, %v5620_v6  ;;  %3765 = vmatprep.mubr.bf16.mxu0 %v8904_v61  ;;  %v3513_v52 = vrot.slane %v8912_v51, 1  ;;  %v3386_v53 = vmul.f32 0.01, %v3354_v24  ;;  %v3387_v55 = vmul.f32 0.01, %v3355_v30  ;;  %v3479_v49 = vsel %vm9774_vm3, %v3457_v23, %v3458_v14  ;;  %vm9775_vm10 = vmmov %vm9769_vm8  ;;  %v9793_v6 = vld [vmem:[#allocation24_spill] sm:$0xff] }
 0x8de   : > { %6657 = vmatpush3.bf16.msra.mxu1 %v9772_v26  ;;  %v3521_v8 = vsel %vm9773_vm11, %v3511_v62, %v3512_v20  ;;  %vm9776_vm13 = vmmov %vm9774_vm3  ;;  %6678 = vmatpush3.bf16.msra.mxu0 %v7472_v22  ;;  %v3516_v9 = vrot.slane %v8820_v39, 1  ;;  %v8946_v48 = vpack.c.bf16 %v8852_v25, %v8816_v27  ;;  %v3459_v56 = vrot.slane %v8816_v27, 7 }
 0x8df   : > { %6658 = vmatprep.subr.bf16.mxu1 %v9690_v0  ;;  %v3520_v45 = vsel %vm9775_vm10, %v3512_v20, %v3513_v52  ;;  %v8926_v47 = vsel %vm3370_vm7, %v3354_v24, %v3386_v53  ;;  %v8928_v43 = vsel %vm3371_vm5, %v3355_v30, %v3387_v55  ;;  %v3480_v50 = vsel %vm9776_vm13, %v3456_v42, %v3457_v23  ;;  %vm9783_vm7 = vmmov %vm9769_vm8  ;;  %v9796_v30 = vld [vmem:[#allocation17_spill] sm:$0xff] }
 0x8e0   : > { %v5624_v11 = vpack.c.bf16 %v3520_v45, %v3521_v8  ;;  %v3514_v36 = vrot.slane %v8926_v47, 1  ;;  %v3515_v46 = vrot.slane %v8928_v43, 1  ;;  %6679 = vmatprep.subr.bf16.mxu0 %v9690_v0  ;;  %v5580_v42 = vpack.c.bf16 %v3479_v49, %v3480_v50  ;;  %vm9784_vm5 = vmmov %vm9783_vm7  ;;  %v9798_v20 = vld [vmem:[#allocation25_spill] sm:$0xff] }
 0x8e1   : > { %v3460_v62 = vrot.slane %v8852_v25, 7  ;;  %vm9782_vm12 = vnez %v9781_v34  ;;  %v3532_v27 = vsel %vm9784_vm5, %v3516_v9, %v3501_v63  ;;  %vm9786_vm11 = vmmov %vm9774_vm3  ;;  %v8975_v63 = vpack.c.bf16 %v8863_v40, %v8856_v17 }
 0x8e2   : > { %6660 = vmatpush3.bf16.msra.mxu1 %v9777_v35  ;;  %v3518_v4 = vsel %vm9769_vm8, %v3514_v36, %v3515_v46  ;;  %v3519_v22 = vsel %vm9779_vm15, %v3513_v52, %v3514_v36  ;;  %v3517_v13 = vsel %vm9783_vm7, %v3515_v46, %v3516_v9  ;;  %6681 = vmatpush3.bf16.msra.mxu0 %v9772_v26  ;;  %v9791_v33 = vmov 0.0   ;;  %v9803_v26 = vld [vmem:[#allocation26_spill] sm:$0xff]  ;;  %v9811_v9 = vld [vmem:[#allocation28_spill] sm:$0xff] }
 0x8e3   : > { %6425 = vmatmul.mubr.msk.bf16.gmra.mrb[64].mxu1 %vm7984_vm0, %v5624_v11  ;;  %v5628_v16 = vpack.c.bf16 %v3518_v4, %v3519_v22  ;;  %6661 = vmatprep.subr.bf16.mxu1 %v9690_v0  ;;  %v3477_v25 = vsel %vm9786_vm11, %v3459_v56, %v3460_v62  ;;  %v5632_v28 = vpack.c.bf16 %v3532_v27, %v3517_v13  ;;  %vm9792_vm10 = vmmov 0   ;;  %v9808_v11 = vld [vmem:[#allocation27_spill] sm:$0xff] }
 0x8e4   : > { %5581 = vmatmul.mubr.msk.bf16.gmra.mrb[64].mxu0 %vm8003_vm6, %v5580_v42  ;;  %vm9787_vm6 = vmmov %vm9774_vm3  ;;  %6682 = vmatprep.subr.bf16.mxu0 %v9690_v0  ;;  %vm9789_vm3 = vnez %v9788_v5  ;;  %vm9794_vm13 = vnez %v9793_v6  ;;  %v3461_v18 = vrot.slane %v8856_v17, 7  ;;  %v3462_v31 = vrot.slane %v8863_v40, 7 }
 0x8e5   : > { %6428 = vmatprep.mubr.msk.bf16.mxu1 %vm9782_vm12, %v5628_v16  ;;  %3773 = vmatprep.mubr.bf16.mxu0 %v8946_v48  ;;  %v3478_v32 = vsel %vm9787_vm6, %v3458_v14, %v3459_v56  ;;  %vm9795_vm8 = vmmov %vm9787_vm6  ;;  %v8997_v17 = vpack.c.bf16 %v8906_v2, %v8865_v54  ;;  %v3463_v40 = vrot.slane %v8865_v54, 7  ;;  %v3464_v58 = vrot.slane %v8906_v2, 7 }
 0x8e6   : > { %6663 = vmatpush3.bf16.msra.mxu1 %v9785_v57  ;;  %v5584_v1 = vpack.c.bf16 %v3477_v25, %v3478_v32  ;;  %6684 = vmatpush3.bf16.msra.mxu0 %v9777_v35  ;;  %v3476_v24 = vsel %vm9795_vm8, %v3460_v62, %v3461_v18  ;;  %vm9797_vm15 = vmmov %vm9787_vm6  ;;  %vm9799_vm7 = vnez %v9798_v20  ;;  %v9012_v54 = vpack.c.bf16 %v8926_v47, %v8912_v51 }
 0x8e7   : > { %6664 = vmatprep.subr.bf16.mxu1 %v9690_v0  ;;  %6685 = vmatprep.subr.bf16.mxu0 %v9690_v0  ;;  %v3475_v23 = vsel %vm9797_vm15, %v3461_v18, %v3462_v31  ;;  %vm9800_vm5 = vmmov %vm9787_vm6  ;;  %v3466_v2 = vrot.slane %v8926_v47, 7  ;;  %vm9804_vm6 = vnez %v9803_v26  ;;  %v9025_v50 = vpack.c.bf16 %v8820_v39, %v8928_v43 }
 0x8e8   : > { %v5588_v14 = vpack.c.bf16 %v3475_v23, %v3476_v24  ;;  %v3473_v52 = vsel %vm9800_vm5, %v3463_v40, %v3464_v58  ;;  %vm9801_vm11 = vmmov %vm9800_vm5  ;;  %9802 = vst [vmem:[#allocation18_spill] sm:$0xff] %v9012_v54  ;;  %vm9809_vm15 = vnez %v9808_v11 }
 0x8e9   : > { %v3474_v53 = vsel %vm9801_vm11, %v3462_v31, %v3463_v40  ;;  %vm9806_vm8 = vmmov %vm9800_vm5  ;;  %9807 = vst [vmem:[#allocation19_spill] sm:$0xff] %v9025_v50  ;;  %vm9812_vm11 = vnez %v9811_v9 }
 0x8ea   : > { %6666 = vmatpush3.bf16.msra.mxu1 %v9790_v19  ;;  %6687 = vmatpush3.bf16.msra.mxu0 %v9785_v57  ;;  %v5592_v55 = vpack.c.bf16 %v3473_v52, %v3474_v53 }
 0x8eb   : > { %6429 = vmatmul.mubr.msk.bf16.gmra.mrb[68].mxu1 %vm9789_vm3, %v5632_v28  ;;  %6667 = vmatprep.subr.bf16.mxu1 %v9690_v0 }
 0x8ec   : > { %6464 = vmatprep.mubr.msk.f32.mxu1 %vm9792_vm10, %v9791_v33  ;;  %5585 = vmatmul.mubr.msk.bf16.gmra.mrb[68].mxu0 %vm9794_vm13, %v5584_v1  ;;  %vm9805_vm13 = vmmov %vm9800_vm5 }
 0x8ed   : > { %3781 = vmatprep.mubr.bf16.mxu0 %v8975_v63  ;;  %6688 = vmatprep.subr.bf16.mxu0 %v9690_v0 }
 0x8ee   : > { %6669 = vmatpush3.bf16.msra.mxu1 %v9796_v30  ;;  %6690 = vmatpush3.bf16.msra.mxu0 %v9790_v19 }
 0x8ef   : > { %6691 = vmatprep.subr.bf16.mxu0 %v9690_v0  ;;  %v3465_v0 = vrot.slane %v8912_v51, 7  ;;  %v3467_v51 = vrot.slane %v8928_v43, 7 }
 0x8f1   : > { %v3471_v8 = vsel %vm9805_vm13, %v3465_v0, %v3466_v2  ;;  %v3472_v49 = vsel %vm9806_vm8, %v3464_v58, %v3465_v0  ;;  %v3470_v36 = vsel %vm9800_vm5, %v3466_v2, %v3467_v51  ;;  %vm9815_vm13 = vcmask 1043459  }
 0x8f2   : > { %6693 = vmatpush3.bf16.msra.mxu0 %v9796_v30  ;;  %v5596_v45 = vpack.c.bf16 %v3471_v8, %v3472_v49  ;;  %vm9816_vm8 = vcmask 1044484  }
 0x8f4   : > { %5589 = vmatmul.mubr.msk.bf16.gmra.mrb[72].mxu0 %vm9799_vm7, %v5588_v14  ;;  %vm9810_vm7 = vmmov %vm9800_vm5  ;;  %vm9819_vm5 = vcmask 1047559  }
 0x8f5   : > { %3789 = vmatprep.mubr.bf16.mxu0 %v8997_v17  ;;  %v3469_v47 = vsel %vm9810_vm7, %v3467_v51, %v3468_v59  ;;  %vm9818_vm7 = vcmask 1046534  }
 0x8f6   : > { %v5600_v46 = vpack.c.bf16 %v3469_v47, %v3470_v36 }
 0x8fc   : > { %5593 = vmatmul.mubr.msk.bf16.gmra.mrb[76].mxu0 %vm9804_vm6, %v5592_v55  ;;  %vm9814_vm6 = vcmask 1042434  }
 0x8fd   : > { %3797 = vmatprep.mubr.bf16.mxu0 %v9012_v54 }
 0x904   : > { %5597 = vmatmul.mubr.msk.bf16.gmra.mrb[80].mxu0 %vm9809_vm15, %v5596_v45  ;;  %vm9817_vm15 = vcmask 1045509  }
 0x905   : > { %3805 = vmatprep.mubr.bf16.mxu0 %v9025_v50 }
 0x90c   : > { %5601 = vmatmul.mubr.msk.bf16.gmra.mrb[84].mxu0 %vm9812_vm11, %v5600_v46 }
 0x90d   : > { %6499 = vmatprep.mubr.msk.f32.mxu0 %vm9792_vm10, %v9791_v33  ;;  %vm9813_vm10 = vcmask 1041409  }
 0x90e   : > { %vm9822_vm11 = vmmov %vm9813_vm10 }
 0x9a3   : > { %v6418_v43 = vpop.f32.mrb[56].mxu1 }
 0x9a4   : > { %v3848_v35 = vpop.f32.mrb[57].mxu1 }
 0x9a5   : > { %v6419_v4 = vpop.f32.mrb[58].mxu1 }
 0x9a6   : > { %v3851_v22 = vpop.f32.mrb[59].mxu1 }
 0x9a7   : > { %v6028_v42 = vpop.f32.mrb[56].mxu0 }
 0x9a8   : > { %v6029_v16 = vpop.f32.mrb[57].mxu0 }
 0x9a9   : > { %v6030_v39 = vadd.f32 %v6029_v16, %v6028_v42  ;;  %v6031_v56 = vpop.f32.mrb[58].mxu0 }
 0x9aa   : > { %v6032_v62 = vpop.f32.mrb[59].mxu0 }
 0x9ab   : > { %v9041_v59 = vadd.f32 %v6030_v39, %v3848_v35  ;;  %v6033_v37 = vadd.f32 %v6032_v62, %v6031_v56 }
 0x9ad   : > { %v9043_v13 = vadd.f32 %v6033_v37, %v3851_v22 }
 0x9ae   : > { %v6422_v27 = vpop.f32.mrb[60].mxu1 }
 0x9af   : > { %v3864_v57 = vpop.f32.mrb[61].mxu1  ;;  %v6034_v32 = vpop.f32.mrb[60].mxu0 }
 0x9b0   : > { %v6423_v25 = vpop.f32.mrb[62].mxu1  ;;  %v6035_v1 = vpop.f32.mrb[61].mxu0 }
 0x9b1   : > { %v3867_v28 = vpop.f32.mrb[63].mxu1  ;;  %v6036_v19 = vadd.f32 %v6035_v1, %v6034_v32  ;;  %v6037_v33 = vpop.f32.mrb[62].mxu0 }
 0x9b2   : > { %v6038_v6 = vpop.f32.mrb[63].mxu0 }
 0x9b3   : > { %v9045_v18 = vadd.f32 %v6418_v43, %v6036_v19  ;;  %v6039_v31 = vadd.f32 %v6038_v6, %v6037_v33 }
 0x9b5   : > { %v9047_v24 = vadd.f32 %v6419_v4, %v6039_v31 }
 0x9b6   : > { %v6426_v30 = vpop.f32.mrb[64].mxu1 }
 0x9b7   : > { %v3880_v23 = vpop.f32.mrb[65].mxu1  ;;  %v6040_v40 = vpop.f32.mrb[64].mxu0 }
 0x9b8   : > { %v6427_v14 = vpop.f32.mrb[66].mxu1  ;;  %v6041_v20 = vpop.f32.mrb[65].mxu0 }
 0x9b9   : > { %v3883_v58 = vpop.f32.mrb[67].mxu1  ;;  %v6042_v52 = vadd.f32 %v6041_v20, %v6040_v40  ;;  %v6043_v53 = vpop.f32.mrb[66].mxu0 }
 0x9ba   : > { %v6044_v55 = vpop.f32.mrb[67].mxu0 }
 0x9bb   : > { %v9049_v0 = vadd.f32 %v6042_v52, %v3864_v57  ;;  %v6045_v2 = vadd.f32 %v6044_v55, %v6043_v53 }
 0x9bd   : > { %v9051_v26 = vadd.f32 %v6045_v2, %v3867_v28 }
 0x9be   : > { %v9053_v8 = vpop.f32.mrb[68].mxu1 }
 0x9bf   : > { %v3896_v49 = vpop.f32.mrb[69].mxu1  ;;  %v6046_v51 = vpop.f32.mrb[68].mxu0  ;;  %v3925_v31 = vadd.f32 %v9051_v26, %v9049_v0 }
 0x9c0   : > { %v9055_v45 = vpop.f32.mrb[70].mxu1  ;;  %v6047_v47 = vpop.f32.mrb[69].mxu0 }
 0x9c1   : > { %v3899_v11 = vpop.f32.mrb[71].mxu1  ;;  %v6048_v36 = vadd.f32 %v6047_v47, %v6046_v51  ;;  %v6049_v46 = vpop.f32.mrb[70].mxu0  ;;  %v3926_v55 = vrot.slane %v3925_v31, 4 }
 0x9c2   : > { %v6050_v9 = vpop.f32.mrb[71].mxu0 }
 0x9c3   : > { %v9057_v43 = vadd.f32 %v6422_v27, %v6048_v36  ;;  %v6051_v35 = vadd.f32 %v6050_v9, %v6049_v46  ;;  %v3918_v27 = vadd.f32 %v9047_v24, %v9045_v18 }
 0x9c5   : > { %v9059_v4 = vadd.f32 %v6423_v25, %v6051_v35  ;;  %v3919_v20 = vrot.slane %v3918_v27, 4 }
 0x9c7   : > { %v6052_v22 = vpop.f32.mrb[72].mxu0  ;;  %v3932_v40 = vadd.f32 %v9059_v4, %v9057_v43  ;;  %v3920_v9 = vadd.f32 %v3919_v20, %v3918_v27 }
 0x9c8   : > { %v6053_v42 = vpop.f32.mrb[73].mxu0 }
 0x9c9   : > { %v6054_v16 = vadd.f32 %v6053_v42, %v6052_v22  ;;  %v6055_v39 = vpop.f32.mrb[74].mxu0  ;;  %v3933_v47 = vrot.slane %v3932_v40, 4 }
 0x9ca   : > { %v6056_v56 = vpop.f32.mrb[75].mxu0 }
 0x9cb   : > { %v9061_v62 = vadd.f32 %v6054_v16, %v3880_v23  ;;  %v6057_v37 = vadd.f32 %v6056_v56, %v6055_v39  ;;  %v3911_v23 = vadd.f32 %v9043_v13, %v9041_v59  ;;  %v3927_v39 = vadd.f32 %v3926_v55, %v3925_v31 }
 0x9cd   : > { %v9063_v57 = vadd.f32 %v6057_v37, %v3883_v58  ;;  %v3912_v51 = vrot.slane %v3911_v23, 4  ;;  %v3934_v37 = vadd.f32 %v3933_v47, %v3932_v40 }
 0x9cf   : > { %v6058_v32 = vpop.f32.mrb[76].mxu0  ;;  %v3939_v52 = vadd.f32 %v9063_v57, %v9061_v62  ;;  %v3913_v56 = vadd.f32 %v3912_v51, %v3911_v23 }
 0x9d0   : > { %v6059_v28 = vpop.f32.mrb[77].mxu0 }
 0x9d1   : > { %v6060_v1 = vadd.f32 %v6059_v28, %v6058_v32  ;;  %v6061_v19 = vpop.f32.mrb[78].mxu0  ;;  %v3940_v35 = vrot.slane %v3939_v52, 4  ;;  %v3921_v28 = vrot.slane %v3920_v9, 2  ;;  %v3914_v20 = vrot.slane %v3913_v56, 2 }
 0x9d2   : > { %v6062_v33 = vpop.f32.mrb[79].mxu0 }
 0x9d3   : > { %v9067_v25 = vadd.f32 %v6426_v30, %v6060_v1  ;;  %v6063_v6 = vadd.f32 %v6062_v33, %v6061_v19  ;;  %v3941_v1 = vadd.f32 %v3940_v35, %v3939_v52  ;;  %v3915_v51 = vadd.f32 %v3914_v20, %v3913_v56 }
 0x9d5   : > { %v9075_v58 = vadd.f32 %v6427_v14, %v6063_v6  ;;  %v3942_v31 = vrot.slane %v3941_v1, 2 }
 0x9d7   : > { %v3946_v30 = vadd.f32 %v9075_v58, %v9067_v25  ;;  %v6064_v53 = vpop.f32.mrb[80].mxu0 }
 0x9d8   : > { %v6065_v2 = vpop.f32.mrb[81].mxu0 }
 0x9d9   : > { %v6066_v36 = vadd.f32 %v6065_v2, %v6064_v53  ;;  %v6067_v46 = vpop.f32.mrb[82].mxu0  ;;  %v3947_v42 = vrot.slane %v3946_v30, 4  ;;  %v3928_v53 = vrot.slane %v3927_v39, 2  ;;  %v3935_v2 = vrot.slane %v3934_v37, 2 }
 0x9da   : > { %v6068_v22 = vpop.f32.mrb[83].mxu0 }
 0x9db   : > { %v9081_v14 = vadd.f32 %v6066_v36, %v3896_v49  ;;  %v6069_v16 = vadd.f32 %v6068_v22, %v6067_v46  ;;  %v3948_v19 = vadd.f32 %v3947_v42, %v3946_v30  ;;  %v3922_v46 = vadd.f32 %v3921_v28, %v3920_v9 }
 0x9dc   : > { %v3929_v30 = vadd.f32 %v3928_v53, %v3927_v39  ;;  %v3936_v47 = vadd.f32 %v3935_v2, %v3934_v37  ;;  %v3943_v42 = vadd.f32 %v3942_v31, %v3941_v1 }
 0x9dd   : > { %v9083_v32 = vadd.f32 %v6069_v16, %v3899_v11  ;;  %v3949_v40 = vrot.slane %v3948_v19, 2  ;;  %v3923_v16 = vrot.slane %v3922_v46, 1 }
 0x9de   : > { %v3930_v28 = vrot.slane %v3929_v30, 1 }
 0x9df   : > { %v3953_v33 = vadd.f32 %v9083_v32, %v9081_v14  ;;  %v6070_v6 = vpop.f32.mrb[84].mxu0 }
 0x9e0   : > { %v6071_v27 = vpop.f32.mrb[85].mxu0  ;;  %v3931_v37 = vadd.f32 %v3930_v28, %v3929_v30  ;;  %v9103_v28 = vld [vmem:[#allocation9 + $0x4] ss:$8 sps:$4 sm:$0xff]  }
 0x9e1   : > { %v3954_v5 = vrot.slane %v3953_v33, 4  ;;  %v6072_v49 = vadd.f32 %v6071_v27, %v6070_v6  ;;  %v6073_v36 = vpop.f32.mrb[86].mxu0  ;;  %v3950_v6 = vadd.f32 %v3949_v40, %v3948_v19  ;;  %5064 = vmatprep.subr.bf16.mxu0 %v9103_v28 }
 0x9e2   : > { %v6074_v23 = vpop.f32.mrb[87].mxu0 }
 0x9e3   : > { %v3955_v11 = vadd.f32 %v3954_v5, %v3953_v33  ;;  %v9088_v55 = vadd.f32 %v9053_v8, %v6072_v49  ;;  %v6075_v52 = vadd.f32 %v6074_v23, %v6073_v36  ;;  %v3916_v5 = vrot.slane %v3915_v51, 1 }
 0x9e4   : > { %v3937_v33 = vrot.slane %v3936_v47, 1  ;;  %v3944_v49 = vrot.slane %v3943_v42, 1  ;;  %v3924_v36 = vadd.f32 %v3923_v16, %v3922_v46  ;;  %v3951_v39 = vrot.slane %v3950_v6, 1 }
 0x9e5   : > { %v3956_v35 = vrot.slane %v3955_v11, 2  ;;  %v9091_v22 = vadd.f32 %v9055_v45, %v6075_v52  ;;  %v3917_v20 = vadd.f32 %v3916_v5, %v3915_v51  ;;  %v6877_v5 = vld [vmem:[#allocation7 + $0x24] ss:$8 sps:$4 sm:$0xff]  }
 0x9e6   : > { %v3938_v45 = vadd.f32 %v3937_v33, %v3936_v47  ;;  %v3945_v1 = vadd.f32 %v3944_v49, %v3943_v42  ;;  %v3952_v31 = vadd.f32 %v3951_v39, %v3950_v6  ;;  %v6866_v42 = vld [vmem:[#allocation7] ss:$8 sps:$4 sm:$0xff]   ;;  %v6868_v6 = vld [vmem:[#allocation7 + $0x4] ss:$8 sps:$4 sm:$0xff]   ;;  %v6881_v49 = vld [vmem:[#allocation7 + $0x30] ss:$8 sps:$4 sm:$0xff]  }
 0x9e7   : > { %v3960_v9 = vadd.f32 %v9091_v22, %v9088_v55  ;;  %v3957_v27 = vadd.f32 %v3956_v35, %v3955_v11  ;;  %v3975_v19 = vsel %vm9813_vm10, %v3924_v36, %v3917_v20  ;;  %4703 = vmatprep.subr.bf16.mxu1 %v6868_v6  ;;  %v6875_v33 = vld [vmem:[#allocation7 + $0x20] ss:$8 sps:$4 sm:$0xff]   ;;  %v6895_v39 = vld [vmem:[#allocation7 + $0x54] ss:$8 sps:$4 sm:$0xff]   ;;  %vm9823_vm10 = vmmov %vm9814_vm6 }
 0x9e8   : > { %v3976_v40 = vsel %vm9814_vm6, %v3931_v37, %v3975_v19  ;;  %v6887_v36 = vld [vmem:[#allocation7 + $0x40] ss:$8 sps:$4 sm:$0xff]   ;;  %v6901_v37 = vld [vmem:[#allocation7 + $0x64] ss:$8 sps:$4 sm:$0xff]   ;;  %v6907_v20 = vld [vmem:[#allocation7 + $0x74] ss:$8 sps:$4 sm:$0xff]  }
 0x9e9   : > { %v3961_v8 = vrot.slane %v3960_v9, 4  ;;  %v3958_v53 = vrot.slane %v3957_v27, 1  ;;  %v3977_v35 = vsel %vm9815_vm13, %v3938_v45, %v3976_v40  ;;  %v6905_v45 = vld [vmem:[#allocation7 + $0x70] ss:$8 sps:$4 sm:$0xff]   ;;  %v6919_v19 = vld [vmem:[#allocation7 + $0x94] ss:$8 sps:$4 sm:$0xff]   ;;  %vm9824_vm6 = vmmov %vm9815_vm13 }
 0x9ea   : > { %v3978_v46 = vsel %vm9816_vm8, %v3945_v1, %v3977_v35  ;;  %v6911_v1 = vld [vmem:[#allocation7 + $0x80] ss:$8 sps:$4 sm:$0xff]   ;;  %vm9825_vm13 = vmmov %vm9816_vm8 }
 0x9eb   : > { %v3962_v56 = vadd.f32 %v3961_v8, %v3960_v9  ;;  %v3959_v11 = vadd.f32 %v3958_v53, %v3957_v27  ;;  %v3979_v30 = vsel %vm9817_vm15, %v3952_v31, %v3978_v46  ;;  %v6871_v9 = vld [vmem:[#allocation7 + $0x14] ss:$8 sps:$4 sm:$0xff]   ;;  %v6869_v27 = vld [vmem:[#allocation7 + $0x10] ss:$8 sps:$4 sm:$0xff]   ;;  %v6899_v53 = vld [vmem:[#allocation7 + $0x60] ss:$8 sps:$4 sm:$0xff]  }
 0x9ec   : > { %v6883_v8 = vld [vmem:[#allocation7 + $0x34] ss:$8 sps:$4 sm:$0xff]   ;;  %v6917_v31 = vld [vmem:[#allocation7 + $0x90] ss:$8 sps:$4 sm:$0xff]   ;;  %vm9826_vm8 = vmmov %vm9817_vm15 }
 0x9ed   : > { %v3963_v2 = vrot.slane %v3962_v56, 2  ;;  %v3980_v51 = vsel %vm9818_vm7, %v3959_v11, %v3979_v30  ;;  %vm9827_vm15 = vmmov %vm9818_vm7 }
 0x9ee   : > { %vm9828_vm7 = vmmov %vm9819_vm5 }
 0x9ef   : > { %v3964_v23 = vadd.f32 %v3963_v2, %v3962_v56  ;;  %v6893_v56 = vld [vmem:[#allocation7 + $0x50] ss:$8 sps:$4 sm:$0xff]   ;;  %v6913_v2 = vld [vmem:[#allocation7 + $0x84] ss:$8 sps:$4 sm:$0xff]  }
 0x9f1   : > { %v3965_v52 = vrot.slane %v3964_v23, 1 }
 0x9f3   : > { %v3966_v16 = vadd.f32 %v3965_v52, %v3964_v23 }
 0x9f5   : > { %v3981_v47 = vsel %vm9819_vm5, %v3966_v16, %v3980_v51 }
 0x9f6   : > { %6465 = vmatmul.mubr.f32.vlgmr.msra.gmra.mrb[54].mxu1 %v3981_v47 }
 0x9f7   : > { %4735 = vmatprep.mubr.bf16.mxu1 %v8786_v41  ;;  %4704 = vmatpush1.bf16.msra.mxu1 %v6866_v42  ;;  %v6889_v41 = vld [vmem:[#allocation7 + $0x44] ss:$8 sps:$4 sm:$0xff]  }
 0x9f8   : > { %4705 = vmatprep.subr.bf16.mxu1 %v6871_v9 }
 0x9fb   : > { %4706 = vmatpush1.bf16.msra.mxu1 %v6869_v27 }
 0x9fc   : > { %4707 = vmatprep.subr.bf16.mxu1 %v6877_v5 }
 0x9ff   : > { %4708 = vmatpush1.bf16.msra.mxu1 %v6875_v33 }
 0xa00   : > { %4709 = vmatprep.subr.bf16.mxu1 %v6883_v8 }
 0xa03   : > { %4710 = vmatpush1.bf16.msra.mxu1 %v6881_v49 }
 0xa04   : > { %4711 = vmatprep.subr.bf16.mxu1 %v6889_v41 }
 0xa07   : > { %4712 = vmatpush1.bf16.msra.mxu1 %v6887_v36 }
 0xa08   : > { %4713 = vmatprep.subr.bf16.mxu1 %v6895_v39 }
 0xa0b   : > { %4714 = vmatpush1.bf16.msra.mxu1 %v6893_v56 }
 0xa0c   : > { %4715 = vmatprep.subr.bf16.mxu1 %v6901_v37 }
 0xa0f   : > { %4716 = vmatpush1.bf16.msra.mxu1 %v6899_v53 }
 0xa10   : > { %4717 = vmatprep.subr.bf16.mxu1 %v6907_v20 }
 0xa13   : > { %4718 = vmatpush1.bf16.msra.mxu1 %v6905_v45 }
 0xa14   : > { %4719 = vmatprep.subr.bf16.mxu1 %v6913_v2 }
 0xa17   : > { %4720 = vmatpush1.bf16.msra.mxu1 %v6911_v1 }
 0xa18   : > { %4721 = vmatprep.subr.bf16.mxu1 %v6919_v19 }
 0xa1b   : > { %4722 = vmatpush1.bf16.msra.mxu1 %v6917_v31 }
 0xac9   : > { %v4049_v23 = vpop.f32.mrb[54].mxu1 }
 0xaca   : > { %v4054_v40 = vcombine.high %v4049_v23, %v4049_v23  ;;  %v4061_v11 = vrot.slane %v4049_v23, %v7566_v10  ;;  %v6466_v52 = vpop.f32.mrb[55].mxu1 }
 0xacc   : > { %v4068_v35 = vrot.slane %v4054_v40, %v7566_v10  ;;  %v4069_v46 = vcombine.high %v4061_v11, %v4061_v11  ;;  %v4077_v16 = vrot.slane %v4061_v11, %v7566_v10 }
 0xace   : > { %v4070_v30 = vcombine.high %v4068_v35, %v4068_v35  ;;  %v4084_v51 = vrot.slane %v4068_v35, %v7566_v10  ;;  %v4091_v47 = vrot.slane %v4069_v46, %v7566_v10  ;;  %v4099_v42 = vcombine.high %v4077_v16, %v4077_v16 }
 0xacf   : > { %v4106_v6 = vrot.slane %v4077_v16, %v7570_v15 }
 0xad0   : > { %v4098_v9 = vrot.slane %v4070_v30, %v7566_v10  ;;  %v4100_v27 = vcombine.high %v4084_v51, %v4084_v51  ;;  %v4101_v5 = vcombine.high %v4091_v47, %v4091_v47  ;;  %v4110_v33 = vrot.slane %v4091_v47, %v7570_v15 }
 0xad1   : > { %v4114_v8 = vrot.slane %v4099_v42, %v7570_v15  ;;  %v4122_v49 = vrot.slane %v4084_v51, %v7570_v15  ;;  %v9117_v41 = vsub.f32 %v9041_v59, %v4106_v6  ;;  %v9120_v36 = vsub.f32 %v9043_v13, %v4106_v6 }
 0xad2   : > { %v4102_v39 = vcombine.high %v4098_v9, %v4098_v9  ;;  %v4118_v56 = vrot.slane %v4101_v5, %v7570_v15  ;;  %v4126_v37 = vrot.slane %v4098_v9, %v7570_v15  ;;  %v4130_v53 = vrot.slane %v4100_v27, %v7570_v15 }
 0xad3   : > { %v9126_v20 = vsub.f32 %v9045_v18, %v4110_v33  ;;  %v9129_v45 = vsub.f32 %v9047_v24, %v4110_v33  ;;  %v9132_v2 = vsub.f32 %v9049_v0, %v4114_v8  ;;  %v9135_v59 = vsub.f32 %v9051_v26, %v4114_v8 }
 0xad4   : > { %v4134_v13 = vrot.slane %v4102_v39, %v7570_v15  ;;  %v9139_v1 = vsub.f32 %v9057_v43, %v4118_v56  ;;  %v9142_v19 = vsub.f32 %v9059_v4, %v4118_v56  ;;  %v9145_v18 = vsub.f32 %v9061_v62, %v4122_v49 }
 0xad5   : > { %v9148_v24 = vsub.f32 %v9063_v57, %v4122_v49  ;;  %v9151_v0 = vsub.f32 %v9067_v25, %v4126_v37  ;;  %v9154_v26 = vsub.f32 %v9075_v58, %v4126_v37  ;;  %v9157_v31 = vsub.f32 %v9081_v14, %v4130_v53 }
 0xad6   : > { %v9160_v43 = vsub.f32 %v9083_v32, %v4130_v53  ;;  %v9163_v4 = vsub.f32 %v9088_v55, %v4134_v13  ;;  %v9166_v62 = vsub.f32 %v9091_v22, %v4134_v13  ;;  %v4159_v57 = vmul.f32 %v9117_v41, %v9117_v41 }
 0xad7   : > { %v4160_v25 = vmul.f32 %v9120_v36, %v9120_v36  ;;  %v4161_v58 = vmul.f32 %v9126_v20, %v9126_v20  ;;  %v4162_v14 = vmul.f32 %v9129_v45, %v9129_v45  ;;  %v4163_v32 = vmul.f32 %v9132_v2, %v9132_v2 }
 0xad8   : > { %9820 = vst [vmem:[#allocation13_spill] sm:$0xff] %v9163_v4  ;;  %9821 = vst [vmem:[#allocation14_spill] sm:$0xff] %v9166_v62  ;;  %v4164_v55 = vmul.f32 %v9135_v59, %v9135_v59  ;;  %v4165_v22 = vmul.f32 %v9139_v1, %v9139_v1  ;;  %v4166_v23 = vmul.f32 %v9142_v19, %v9142_v19 }
 0xad9   : > { %v4167_v40 = vmul.f32 %v9145_v18, %v9145_v18  ;;  %v4168_v11 = vmul.f32 %v9148_v24, %v9148_v24  ;;  %v4169_v52 = vmul.f32 %v9151_v0, %v9151_v0  ;;  %v4170_v35 = vmul.f32 %v9154_v26, %v9154_v26 }
 0xada   : > { %v4171_v46 = vmul.f32 %v9157_v31, %v9157_v31  ;;  %v4172_v16 = vmul.f32 %v9160_v43, %v9160_v43  ;;  %v4173_v30 = vmul.f32 %v9163_v4, %v9163_v4  ;;  %v4174_v51 = vmul.f32 %v9166_v62, %v9166_v62 }
 0xadb   : > { %v4175_v47 = vadd.f32 %v4160_v25, %v4159_v57  ;;  %v4182_v42 = vadd.f32 %v4162_v14, %v4161_v58  ;;  %v4189_v6 = vadd.f32 %v4164_v55, %v4163_v32  ;;  %v4196_v9 = vadd.f32 %v4166_v23, %v4165_v22 }
 0xadc   : > { %v4203_v27 = vadd.f32 %v4168_v11, %v4167_v40  ;;  %v4210_v33 = vadd.f32 %v4170_v35, %v4169_v52  ;;  %v4217_v8 = vadd.f32 %v4172_v16, %v4171_v46  ;;  %v4224_v49 = vadd.f32 %v4174_v51, %v4173_v30 }
 0xadd   : > { %v4176_v5 = vrot.slane %v4175_v47, 4  ;;  %v4183_v39 = vrot.slane %v4182_v42, 4  ;;  %v4190_v56 = vrot.slane %v4189_v6, 4  ;;  %v4197_v37 = vrot.slane %v4196_v9, 4 }
 0xade   : > { %v4204_v53 = vrot.slane %v4203_v27, 4  ;;  %v4211_v34 = vrot.slane %v4210_v33, 4  ;;  %v4218_v50 = vrot.slane %v4217_v8, 4  ;;  %v4225_v54 = vrot.slane %v4224_v49, 4 }
 0xadf   : > { %v4177_v13 = vadd.f32 %v4176_v5, %v4175_v47  ;;  %v4184_v3 = vadd.f32 %v4183_v39, %v4182_v42  ;;  %v4191_v4 = vadd.f32 %v4190_v56, %v4189_v6  ;;  %v4198_v62 = vadd.f32 %v4197_v37, %v4196_v9  ;;  %v9853_v12 = vld [vmem:[#allocation13_spill] sm:$0xff] }
 0xae0   : > { %v4205_v57 = vadd.f32 %v4204_v53, %v4203_v27  ;;  %v4212_v58 = vadd.f32 %v4211_v34, %v4210_v33  ;;  %v4219_v14 = vadd.f32 %v4218_v50, %v4217_v8  ;;  %v4226_v32 = vadd.f32 %v4225_v54, %v4224_v49 }
 0xae1   : > { %v4178_v25 = vrot.slane %v4177_v13, 2  ;;  %v4185_v55 = vrot.slane %v4184_v3, 2  ;;  %v4192_v22 = vrot.slane %v4191_v4, 2  ;;  %v4199_v23 = vrot.slane %v4198_v62, 2 }
 0xae2   : > { %v4206_v40 = vrot.slane %v4205_v57, 2  ;;  %v4213_v52 = vrot.slane %v4212_v58, 2  ;;  %v4220_v35 = vrot.slane %v4219_v14, 2  ;;  %v4227_v46 = vrot.slane %v4226_v32, 2 }
 0xae3   : > { %v4179_v11 = vadd.f32 %v4178_v25, %v4177_v13  ;;  %v4186_v16 = vadd.f32 %v4185_v55, %v4184_v3  ;;  %v4193_v30 = vadd.f32 %v4192_v22, %v4191_v4  ;;  %v4200_v51 = vadd.f32 %v4199_v23, %v4198_v62  ;;  %v9205_v55 = vld [vmem:[#allocation9] ss:$8 sps:$4 sm:$0xff]   ;;  %v9208_v23 = vld [vmem:[#allocation9 + $0x14] ss:$8 sps:$4 sm:$0xff]  }
 0xae4   : > { %v4207_v47 = vadd.f32 %v4206_v40, %v4205_v57  ;;  %v4214_v6 = vadd.f32 %v4213_v52, %v4212_v58  ;;  %v4221_v9 = vadd.f32 %v4220_v35, %v4219_v14  ;;  %v4228_v50 = vadd.f32 %v4227_v46, %v4226_v32  ;;  %v9215_v52 = vld [vmem:[#allocation9 + $0x24] ss:$8 sps:$4 sm:$0xff]   ;;  %v9218_v35 = vld [vmem:[#allocation9 + $0x20] ss:$8 sps:$4 sm:$0xff]   ;;  %v9221_v46 = vld [vmem:[#allocation9 + $0x34] ss:$8 sps:$4 sm:$0xff]  }
 0xae5   : > { %v4180_v42 = vrot.slane %v4179_v11, 1  ;;  %v4187_v27 = vrot.slane %v4186_v16, 1  ;;  %v4194_v5 = vrot.slane %v4193_v30, 1  ;;  %v4201_v34 = vrot.slane %v4200_v51, 1 }
 0xae6   : > { %v4208_v33 = vrot.slane %v4207_v47, 1  ;;  %v4215_v56 = vrot.slane %v4214_v6, 1  ;;  %v4222_v37 = vrot.slane %v4221_v9, 1  ;;  %v4229_v53 = vrot.slane %v4228_v50, 1 }
 0xae7   : > { %v4181_v54 = vadd.f32 %v4180_v42, %v4179_v11  ;;  %v4188_v8 = vadd.f32 %v4187_v27, %v4186_v16  ;;  %v4195_v49 = vadd.f32 %v4194_v5, %v4193_v30  ;;  %v4202_v39 = vadd.f32 %v4201_v34, %v4200_v51  ;;  %v9212_v11 = vld [vmem:[#allocation9 + $0x10] ss:$8 sps:$4 sm:$0xff]   ;;  %v9227_v30 = vld [vmem:[#allocation9 + $0x44] ss:$8 sps:$4 sm:$0xff]   ;;  %v9230_v51 = vld [vmem:[#allocation9 + $0x40] ss:$8 sps:$4 sm:$0xff]  }
 0xae8   : > { %v4209_v4 = vadd.f32 %v4208_v33, %v4207_v47  ;;  %v4216_v13 = vadd.f32 %v4215_v56, %v4214_v6  ;;  %v4223_v25 = vadd.f32 %v4222_v37, %v4221_v9  ;;  %v4230_v14 = vadd.f32 %v4229_v53, %v4228_v50  ;;  %v9224_v16 = vld [vmem:[#allocation9 + $0x30] ss:$8 sps:$4 sm:$0xff]   ;;  %v9233_v47 = vld [vmem:[#allocation9 + $0x54] ss:$8 sps:$4 sm:$0xff]   ;;  %v9239_v6 = vld [vmem:[#allocation9 + $0x64] ss:$8 sps:$4 sm:$0xff]  }
 0xae9   : > { %v4239_v3 = vsel %vm9822_vm11, %v4188_v8, %v4181_v54  ;;  %v9236_v42 = vld [vmem:[#allocation9 + $0x50] ss:$8 sps:$4 sm:$0xff]   ;;  %v9242_v9 = vld [vmem:[#allocation9 + $0x60] ss:$8 sps:$4 sm:$0xff]   ;;  %v9245_v27 = vld [vmem:[#allocation9 + $0x74] ss:$8 sps:$4 sm:$0xff]  }
 0xaea   : > { %v4240_v62 = vsel %vm9823_vm10, %v4195_v49, %v4239_v3  ;;  %v9248_v5 = vld [vmem:[#allocation9 + $0x70] ss:$8 sps:$4 sm:$0xff]   ;;  %v9252_v34 = vld [vmem:[#allocation9 + $0x84] ss:$8 sps:$4 sm:$0xff]   ;;  %v9254_v50 = vld [vmem:[#allocation9 + $0x80] ss:$8 sps:$4 sm:$0xff]  }
 0xaeb   : > { %v4241_v57 = vsel %vm9824_vm6, %v4202_v39, %v4240_v62  ;;  %v6925_v54 = vld [vmem:[#allocation7 + $0xa4] ss:$8 sps:$4 sm:$0xff]   ;;  %v6923_v33 = vld [vmem:[#allocation7 + $0xa0] ss:$8 sps:$4 sm:$0xff]   ;;  %v9258_v8 = vld [vmem:[#allocation9 + $0x94] ss:$8 sps:$4 sm:$0xff]  }
 0xaec   : > { %v4242_v58 = vsel %vm9825_vm13, %v4209_v4, %v4241_v57  ;;  %4723 = vmatprep.subr.bf16.mxu1 %v6925_v54  ;;  %v9260_v49 = vld [vmem:[#allocation9 + $0x90] ss:$8 sps:$4 sm:$0xff]   ;;  %v6931_v39 = vld [vmem:[#allocation7 + $0xb4] ss:$8 sps:$4 sm:$0xff]   ;;  %v9264_v37 = vld [vmem:[#allocation9 + $0xa0] ss:$8 sps:$4 sm:$0xff]  }
 0xaed   : > { %v4243_v32 = vsel %vm9826_vm8, %v4216_v13, %v4242_v58  ;;  %4724 = vmatpush1.bf16.msra.mxu1 %v6923_v33  ;;  %v6929_v56 = vld [vmem:[#allocation7 + $0xb0] ss:$8 sps:$4 sm:$0xff]   ;;  %9829 = vst [vmem:[#allocation21_spill] sm:$0xff] %v9264_v37  ;;  %v9266_v53 = vld [vmem:[#allocation9 + $0xa4] ss:$8 sps:$4 sm:$0xff]  }
 0xaee   : > { %v4244_v22 = vsel %vm9827_vm15, %v4223_v25, %v4243_v32  ;;  %4725 = vmatprep.subr.bf16.mxu1 %v6931_v39  ;;  %9830 = vst [vmem:[#allocation15_spill] sm:$0xff] %v9266_v53  ;;  %v6935_v3 = vld [vmem:[#allocation7 + $0xc0] ss:$8 sps:$4 sm:$0xff]   ;;  %v6937_v4 = vld [vmem:[#allocation7 + $0xc4] ss:$8 sps:$4 sm:$0xff]   ;;  %vm9841_vm15 = vcmp.lt.s32.totalorder %v7563_v7, 7 }
 0xaef   : > { %v4245_v40 = vsel %vm9828_vm7, %v4230_v14, %v4244_v22  ;;  %v9268_v62 = vld [vmem:[#allocation9 + $0xb4] ss:$8 sps:$4 sm:$0xff]   ;;  %v9272_v57 = vld [vmem:[#allocation9 + $0xb0] ss:$8 sps:$4 sm:$0xff]   ;;  %v9275_v25 = vld [vmem:[#allocation9 + $0xc4] ss:$8 sps:$4 sm:$0xff]  }
 0xaf0   : > { %6500 = vmatmul.mubr.f32.vlgmr.msra.gmra.mrb[54].mxu0 %v4245_v40  ;;  %9831 = vst [vmem:[#allocation16_spill] sm:$0xff] %v9268_v62  ;;  %v6943_v13 = vld [vmem:[#allocation7 + $0xd4] ss:$8 sps:$4 sm:$0xff]   ;;  %9832 = vst [vmem:[#allocation24_spill] sm:$0xff] %v9272_v57  ;;  %v6941_v58 = vld [vmem:[#allocation7 + $0xd0] ss:$8 sps:$4 sm:$0xff]  }
 0xaf1   : > { %5065 = vmatpush1.bf16.msra.mxu0 %v9205_v55  ;;  %4726 = vmatpush1.bf16.msra.mxu1 %v6929_v56  ;;  %9833 = vst [vmem:[#allocation17_spill] sm:$0xff] %v9275_v25  ;;  %v6949_v14 = vld [vmem:[#allocation7 + $0xe4] ss:$8 sps:$4 sm:$0xff]   ;;  %v9278_v32 = vld [vmem:[#allocation9 + $0xc0] ss:$8 sps:$4 sm:$0xff]   ;;  %vm9842_vm7 = vmmov %vm9841_vm15 }
 0xaf2   : > { %5066 = vmatprep.subr.bf16.mxu0 %v9208_v23  ;;  %4727 = vmatprep.subr.bf16.mxu1 %v6937_v4  ;;  %9834 = vst [vmem:[#allocation25_spill] sm:$0xff] %v9278_v32  ;;  %v9281_v22 = vld [vmem:[#allocation9 + $0xd4] ss:$8 sps:$4 sm:$0xff]   ;;  %v6947_v40 = vld [vmem:[#allocation7 + $0xe0] ss:$8 sps:$4 sm:$0xff]  }
 0xaf3   : > { %9835 = vst [vmem:[#allocation26_spill] sm:$0xff] %v9281_v22  ;;  %v6955_v54 = vld [vmem:[#allocation7 + $0xf4] ss:$8 sps:$4 sm:$0xff]   ;;  %v9284_v33 = vld [vmem:[#allocation9 + $0xd0] ss:$8 sps:$4 sm:$0xff]  }
 0xaf4   : > { %9836 = vst [vmem:[#allocation27_spill] sm:$0xff] %v9284_v33  ;;  %v9287_v39 = vld [vmem:[#allocation9 + $0xe4] ss:$8 sps:$4 sm:$0xff]   ;;  %v6953_v56 = vld [vmem:[#allocation7 + $0xf0] ss:$8 sps:$4 sm:$0xff]  }
 0xaf5   : > { %5067 = vmatpush1.bf16.msra.mxu0 %v9212_v11  ;;  %4728 = vmatpush1.bf16.msra.mxu1 %v6935_v3  ;;  %9837 = vst [vmem:[#allocation28_spill] sm:$0xff] %v9287_v39  ;;  %v9290_v3 = vld [vmem:[#allocation9 + $0xe0] ss:$8 sps:$4 sm:$0xff]   ;;  %v9293_v4 = vld [vmem:[#allocation9 + $0xf4] ss:$8 sps:$4 sm:$0xff]  }
 0xaf6   : > { %5068 = vmatprep.subr.bf16.mxu0 %v9215_v52  ;;  %4729 = vmatprep.subr.bf16.mxu1 %v6943_v13  ;;  %9838 = vst [vmem:[#allocation29_spill] sm:$0xff] %v9290_v3  ;;  %9839 = vst [vmem:[#allocation30_spill] sm:$0xff] %v9293_v4  ;;  %v9297_v13 = vld [vmem:[#allocation9 + $0xf0] ss:$8 sps:$4 sm:$0xff]  }
 0xaf7   : > { %9840 = vst [vmem:[#allocation31_spill] sm:$0xff] %v9297_v13 }
 0xaf9   : > { %5069 = vmatpush1.bf16.msra.mxu0 %v9218_v35  ;;  %4730 = vmatpush1.bf16.msra.mxu1 %v6941_v58 }
 0xafa   : > { %5070 = vmatprep.subr.bf16.mxu0 %v9221_v46  ;;  %4731 = vmatprep.subr.bf16.mxu1 %v6949_v14 }
 0xafd   : > { %5071 = vmatpush1.bf16.msra.mxu0 %v9224_v16  ;;  %4732 = vmatpush1.bf16.msra.mxu1 %v6947_v40 }
 0xafe   : > { %5072 = vmatprep.subr.bf16.mxu0 %v9227_v30  ;;  %4733 = vmatprep.subr.bf16.mxu1 %v6955_v54 }
 0xb01   : > { %5073 = vmatpush1.bf16.msra.mxu0 %v9230_v51  ;;  %4734 = vmatpush1.bf16.msra.mxu1 %v6953_v56 }
 0xb02   : > { %5074 = vmatprep.subr.bf16.mxu0 %v9233_v47  ;;  %6694 = vmatprep.subr.bf16.mxu1 %v9103_v28 }
 0xb05   : > { %5075 = vmatpush1.bf16.msra.mxu0 %v9236_v42 }
 0xb06   : > { %5076 = vmatprep.subr.bf16.mxu0 %v9239_v6 }
 0xb09   : > { %5077 = vmatpush1.bf16.msra.mxu0 %v9242_v9 }
 0xb0a   : > { %5078 = vmatprep.subr.bf16.mxu0 %v9245_v27 }
 0xb0d   : > { %5079 = vmatpush1.bf16.msra.mxu0 %v9248_v5 }
 0xb0e   : > { %5080 = vmatprep.subr.bf16.mxu0 %v9252_v34 }
 0xb11   : > { %5081 = vmatpush1.bf16.msra.mxu0 %v9254_v50 }
 0xb12   : > { %5082 = vmatprep.subr.bf16.mxu0 %v9258_v8 }
 0xb15   : > { %5083 = vmatpush1.bf16.msra.mxu0 %v9260_v49 }
 0xb16   : > { %5084 = vmatprep.subr.bf16.mxu0 %v9266_v53 }
 0xb19   : > { %5085 = vmatpush1.bf16.msra.mxu0 %v9264_v37 }
 0xb1a   : > { %5086 = vmatprep.subr.bf16.mxu0 %v9268_v62 }
 0xb1d   : > { %5087 = vmatpush1.bf16.msra.mxu0 %v9272_v57 }
 0xb1e   : > { %5088 = vmatprep.subr.bf16.mxu0 %v9275_v25 }
 0xb21   : > { %5089 = vmatpush1.bf16.msra.mxu0 %v9278_v32 }
 0xb22   : > { %5090 = vmatprep.subr.bf16.mxu0 %v9281_v22 }
 0xb25   : > { %5091 = vmatpush1.bf16.msra.mxu0 %v9284_v33 }
 0xb26   : > { %5092 = vmatprep.subr.bf16.mxu0 %v9287_v39 }
 0xb29   : > { %5093 = vmatpush1.bf16.msra.mxu0 %v9290_v3 }
 0xb2a   : > { %5094 = vmatprep.subr.bf16.mxu0 %v9293_v4 }
 0xb2d   : > { %5095 = vmatpush1.bf16.msra.mxu0 %v9297_v13 }
 0xbc3   : > { %v4313_v58 = vpop.f32.mrb[54].mxu0 }
 0xbc4   : > { %v4325_v14 = vrot.slane %v4313_v58, %v7566_v10  ;;  %v6501_v40 = vpop.f32.mrb[55].mxu0  ;;  %v4318_v54 = vcombine.high %v4313_v58, %v4313_v58 }
 0xbc6   : > { %v4333_v33 = vcombine.high %v4325_v14, %v4325_v14  ;;  %v4341_v39 = vrot.slane %v4325_v14, %v7566_v10  ;;  %v4332_v28 = vrot.slane %v4318_v54, %v7566_v10 }
 0xbc8   : > { %v4355_v56 = vrot.slane %v4333_v33, %v7566_v10  ;;  %v4363_v22 = vcombine.high %v4341_v39, %v4341_v39  ;;  %v4375_v3 = vadd.f32 1e-05, %v4341_v39  ;;  %v4348_v13 = vrot.slane %v4332_v28, %v7566_v10 }
 0xbc9   : > { %v4334_v40 = vcombine.high %v4332_v28, %v4332_v28 }
 0xbca   : > { %v4365_v32 = vcombine.high %v4355_v56, %v4355_v56  ;;  %v4376_v25 = vadd.f32 1e-05, %v4355_v56  ;;  %v4377_v57 = vadd.f32 1e-05, %v4363_v22  ;;  %7010 = vrsqrt.f32 %v4375_v3 }
 0xbcb   : > { %v4379_v58 = vadd.f32 1e-05, %v4348_v13  ;;  %v9307_v14 = vrot.slane %v4334_v40, %v7566_v10 }
 0xbcc   : > { %v4378_v4 = vadd.f32 1e-05, %v4365_v32  ;;  %7012 = vrsqrt.f32 %v4376_v25 }
 0xbcd   : > { %7014 = vrsqrt.f32 %v4377_v57  ;;  %v4380_v56 = vadd.f32 1e-05, %v9307_v14  ;;  %v4366_v29 = vcombine.high %v9307_v14, %v9307_v14 }
 0xbce   : > { %7016 = vrsqrt.f32 %v4378_v4  ;;  %v4364_v4 = vcombine.high %v4348_v13, %v4348_v13 }
 0xbcf   : > { %7018 = vrsqrt.f32 %v4379_v58 }
 0xbd0   : > { %7020 = vrsqrt.f32 %v4380_v56  ;;  %v4381_v13 = vadd.f32 1e-05, %v4364_v4 }
 0xbd2   : > { %7022 = vrsqrt.f32 %v4381_v13 }
 0xbd4   : > { %v7011_v33 = vpop.eup %7010 }
 0xbd5   : > { %v4402_v54 = vrot.slane %v7011_v33, %v7570_v15 }
 0xbd6   : > { %v7013_v39 = vpop.eup %7012 }
 0xbd7   : > { %v7015_v22 = vpop.eup %7014  ;;  %v4406_v32 = vrot.slane %v7013_v39, %v7570_v15  ;;  %v4439_v3 = vmul.f32 %v4402_v54, %v9117_v41  ;;  %v4440_v57 = vmul.f32 %v4402_v54, %v9120_v36 }
 0xbd8   : > { %v7017_v25 = vpop.eup %7016  ;;  %v4410_v28 = vrot.slane %v7015_v22, %v7570_v15 }
 0xbd9   : > { %v4414_v10 = vrot.slane %v7017_v25, %v7570_v15  ;;  %vm4455_vm5 = vcmp.ge.f32.partialorder %v4439_v3, 0.0  ;;  %vm4456_vm11 = vcmp.ge.f32.partialorder %v4440_v57, 0.0  ;;  %v4471_v40 = vmul.f32 0.01, %v4439_v3 }
 0xbda   : > { %v4472_v58 = vmul.f32 0.01, %v4440_v57  ;;  %v4441_v33 = vmul.f32 %v4406_v32, %v9126_v20  ;;  %v4442_v62 = vmul.f32 %v4406_v32, %v9129_v45  ;;  %v4443_v41 = vmul.f32 %v4410_v28, %v9132_v2  ;;  %v7019_v20 = vpop.eup %7018 }
 0xbdb   : > { %v9318_v39 = vsel %vm4455_vm5, %v4439_v3, %v4471_v40  ;;  %v4445_v36 = vmul.f32 %v4414_v10, %v9139_v1  ;;  %v4444_v22 = vmul.f32 %v4410_v28, %v9135_v59  ;;  %v4418_v4 = vrot.slane %v7019_v20, %v7570_v15 }
 0xbdc   : > { %v4488_v54 = vsel %vm4456_vm11, %v4440_v57, %v4472_v58  ;;  %vm4457_vm10 = vcmp.ge.f32.partialorder %v4441_v33, 0.0  ;;  %v4816_v56 = vrot.slane %v9318_v39, 1  ;;  %v4473_v37 = vmul.f32 0.01, %v4441_v33  ;;  %vm9843_vm11 = vmmov %vm9842_vm7 }
 0xbdd   : > { %v4503_v25 = vpack.c.bf16 %v4488_v54, %v9318_v39  ;;  %vm4458_vm6 = vcmp.ge.f32.partialorder %v4442_v62, 0.0  ;;  %v4817_v53 = vrot.slane %v4488_v54, 1  ;;  %vm4459_vm13 = vcmp.ge.f32.partialorder %v4443_v41, 0.0 }
 0xbde   : > { %v4474_v45 = vmul.f32 0.01, %v4442_v62  ;;  %v4475_v32 = vmul.f32 0.01, %v4443_v41  ;;  %v4489_v2 = vsel %vm4457_vm10, %v4441_v33, %v4473_v37  ;;  %vm4461_vm8 = vcmp.ge.f32.partialorder %v4445_v36, 0.0  ;;  %vm9844_vm10 = vmmov %vm9842_vm7 }
 0xbdf   : > { %4736 = vmatmul.mubr.bf16.vlgmr.msra.gmra.mrb[72].mxu1 %v4503_v25  ;;  %v4818_v1 = vrot.slane %v4489_v2, 1  ;;  %v4477_v57 = vmul.f32 0.01, %v4445_v36  ;;  %v4476_v58 = vmul.f32 0.01, %v4444_v22  ;;  %vm4460_vm5 = vcmp.ge.f32.partialorder %v4444_v22, 0.0 }
 0xbe0   : > { %6710 = vmatpush1.bf16.msra.mxu1 %v9205_v55  ;;  %4745 = vmatprep.mubr.bf16.mxu1 %v8833_v44  ;;  %v4490_v59 = vsel %vm4458_vm6, %v4442_v62, %v4474_v45  ;;  %v4491_v3 = vsel %vm4459_vm13, %v4443_v41, %v4475_v32  ;;  %v4846_v44 = vsel %vm9842_vm7, %v4816_v56, %v4817_v53  ;;  %v7021_v41 = vpop.eup %7020  ;;  %vm9845_vm6 = vmmov %vm9842_vm7 }
 0xbe1   : > { %6695 = vmatprep.subr.bf16.mxu1 %v9208_v23  ;;  %v4819_v28 = vrot.slane %v4490_v59, 1  ;;  %v4820_v40 = vrot.slane %v4491_v3, 1  ;;  %v4845_v37 = vsel %vm9841_vm15, %v4817_v53, %v4818_v1  ;;  %v4493_v33 = vsel %vm4461_vm8, %v4445_v36, %v4477_v57  ;;  %vm9847_vm15 = vmmov %vm9845_vm6 }
 0xbe2   : > { %v5700_v55 = vpack.c.bf16 %v4845_v37, %v4846_v44  ;;  %v4504_v13 = vpack.c.bf16 %v4490_v59, %v4489_v2  ;;  %v4446_v54 = vmul.f32 %v4414_v10, %v9142_v19  ;;  %v4492_v20 = vsel %vm4460_vm5, %v4444_v22, %v4476_v58  ;;  %v7023_v22 = vpop.eup %7022  ;;  %vm9848_vm7 = vmmov %vm9845_vm6 }
 0xbe3   : > { %v4843_v62 = vsel %vm9843_vm11, %v4819_v28, %v4820_v40  ;;  %v4844_v23 = vsel %vm9844_vm10, %v4818_v1, %v4819_v28  ;;  %v4447_v45 = vmul.f32 %v4418_v4, %v9145_v18  ;;  %v4822_v32 = vrot.slane %v4493_v33, 1  ;;  %vm9849_vm10 = vmmov %vm9845_vm6 }
 0xbe4   : > { %6711 = vmatpush1.bf16.msra.mxu1 %v9212_v11  ;;  %5701 = vmatprep.mubr.msk.bf16.mxu0 %vm7785_vm4, %v5700_v55  ;;  %v5704_v53 = vpack.c.bf16 %v4843_v62, %v4844_v23  ;;  %v4478_v36 = vmul.f32 0.01, %v4446_v54  ;;  %v4422_v11 = vrot.slane %v7021_v41, %v7570_v15  ;;  %v4821_v60 = vrot.slane %v4492_v20, 1 }
 0xbe5   : > { %6696 = vmatprep.subr.bf16.mxu1 %v9215_v52  ;;  %5097 = vmatmul.mubr.bf16.vlgmr.msra.gmra.mrb[88].mxu0 %v4503_v25  ;;  %vm4462_vm4 = vcmp.ge.f32.partialorder %v4446_v54, 0.0  ;;  %v4479_v19 = vmul.f32 0.01, %v4447_v45  ;;  %vm4463_vm13 = vcmp.ge.f32.partialorder %v4447_v45, 0.0  ;;  %v4448_v2 = vmul.f32 %v4418_v4, %v9148_v24 }
 0xbe6   : > { %5705 = vmatprep.mubr.msk.bf16.mxu0 %vm7804_vm9, %v5704_v53  ;;  %v4841_v18 = vsel %vm9845_vm6, %v4821_v60, %v4822_v32  ;;  %v4494_v52 = vsel %vm4462_vm4, %v4446_v54, %v4478_v36  ;;  %v4449_v10 = vmul.f32 %v4422_v11, %v9151_v0  ;;  %vm9846_vm9 = vmmov %vm9845_vm6  ;;  %v4382_v59 = vadd.f32 1e-05, %v4366_v29  ;;  %v9858_v54 = vld [vmem:[#allocation16_spill] sm:$0xff]  ;;  %v9859_v53 = vld [vmem:[#allocation14_spill] sm:$0xff] }
 0xbe7   : > { %4746 = vmatmul.mubr.bf16.gmra.mrb[76].mxu1 %v4504_v13  ;;  %v4495_v25 = vsel %vm4463_vm13, %v4447_v45, %v4479_v19  ;;  %v4823_v1 = vrot.slane %v4494_v52, 1  ;;  %v4426_v14 = vrot.slane %v7023_v22, %v7570_v15  ;;  %vm4464_vm5 = vcmp.ge.f32.partialorder %v4448_v2, 0.0  ;;  %v9860_v45 = vld [vmem:[#allocation24_spill] sm:$0xff]  ;;  %v9861_v36 = vld [vmem:[#allocation17_spill] sm:$0xff]  ;;  %v9863_v29 = vld [vmem:[#allocation19_spill] sm:$0xff] }
 0xbe8   : > { %6712 = vmatpush1.bf16.msra.mxu1 %v9218_v35  ;;  %4755 = vmatprep.mubr.bf16.mxu1 %v8904_v61  ;;  %v4842_v61 = vsel %vm9846_vm9, %v4820_v40, %v4821_v60  ;;  %v4481_v0 = vmul.f32 0.01, %v4449_v10  ;;  %vm4465_vm8 = vcmp.ge.f32.partialorder %v4449_v10, 0.0  ;;  %7024 = vrsqrt.f32 %v4382_v59 }
 0xbe9   : > { %6697 = vmatprep.subr.bf16.mxu1 %v9221_v46  ;;  %v5708_v35 = vpack.c.bf16 %v4841_v18, %v4842_v61  ;;  %v4505_v46 = vpack.c.bf16 %v4492_v20, %v4491_v3  ;;  %v4840_v3 = vsel %vm9848_vm7, %v4822_v32, %v4823_v1  ;;  %v4450_v57 = vmul.f32 %v4422_v11, %v9154_v26  ;;  %v9862_v18 = vld [vmem:[#allocation25_spill] sm:$0xff] }
 0xbea   : > { %v4497_v38 = vsel %vm4465_vm8, %v4449_v10, %v4481_v0  ;;  %v4452_v62 = vmul.f32 %v4426_v14, %v9160_v43  ;;  %v9864_v10 = vld [vmem:[#allocation26_spill] sm:$0xff] }
 0xbeb   : > { %v4826_v28 = vrot.slane %v4497_v38, 1  ;;  %v4482_v40 = vmul.f32 0.01, %v4450_v57 }
 0xbec   : > { %6713 = vmatpush1.bf16.msra.mxu1 %v9224_v16  ;;  %v4824_v16 = vrot.slane %v4495_v25, 1 }
 0xbed   : > { %6698 = vmatprep.subr.bf16.mxu1 %v9227_v30  ;;  %5107 = vmatmul.mubr.bf16.gmra.mrb[92].mxu0 %v4504_v13  ;;  %v4480_v30 = vmul.f32 0.01, %v4448_v2  ;;  %v9857_v13 = vld [vmem:[#allocation18_spill] sm:$0xff] }
 0xbee   : > { %5709 = vmatprep.mubr.msk.bf16.mxu0 %vm7847_vm14, %v5708_v35  ;;  %v4839_v24 = vsel %vm9847_vm15, %v4823_v1, %v4824_v16  ;;  %vm4466_vm14 = vcmp.ge.f32.partialorder %v4450_v57, 0.0  ;;  %v9866_v35 = vld [vmem:[#allocation27_spill] sm:$0xff] }
 0xbef   : > { %4756 = vmatmul.mubr.bf16.gmra.mrb[80].mxu1 %v4505_v46  ;;  %v4496_v4 = vsel %vm4464_vm5, %v4448_v2, %v4480_v30 }
 0xbf0   : > { %6714 = vmatpush1.bf16.msra.mxu1 %v9230_v51  ;;  %4765 = vmatprep.mubr.bf16.mxu1 %v8946_v48  ;;  %v4451_v51 = vmul.f32 %v4426_v14, %v9157_v31  ;;  %v5712_v48 = vpack.c.bf16 %v4839_v24, %v4840_v3  ;;  %v4825_v26 = vrot.slane %v4496_v4, 1  ;;  %v9869_v14 = vld [vmem:[#allocation29_spill] sm:$0xff]  ;;  %v9874_v3 = vld [vmem:[#allocation31_spill] sm:$0xff] }
 0xbf1   : > { %6699 = vmatprep.subr.bf16.mxu1 %v9233_v47  ;;  %v4506_v47 = vpack.c.bf16 %v4494_v52, %v4493_v33  ;;  %v9854_v33 = vld [vmem:[#allocation15_spill] sm:$0xff] }
 0xbf2   : > { %v4483_v58 = vmul.f32 0.01, %v4451_v51  ;;  %vm4467_vm11 = vcmp.ge.f32.partialorder %v4451_v51, 0.0  ;;  %v4837_v31 = vsel %vm9849_vm10, %v4825_v26, %v4826_v28  ;;  %v7025_v37 = vpop.eup %7024 }
 0xbf4   : > { %6715 = vmatpush1.bf16.msra.mxu1 %v9236_v42  ;;  %v4498_v42 = vsel %vm4466_vm14, %v4450_v57, %v4482_v40 }
 0xbf5   : > { %6700 = vmatprep.subr.bf16.mxu1 %v9239_v6  ;;  %5117 = vmatmul.mubr.bf16.gmra.mrb[96].mxu0 %v4505_v46  ;;  %v4499_v6 = vsel %vm4467_vm11, %v4451_v51, %v4483_v58  ;;  %v4827_v44 = vrot.slane %v4498_v42, 1  ;;  %v9867_v46 = vld [vmem:[#allocation28_spill] sm:$0xff] }
 0xbf6   : > { %5713 = vmatprep.mubr.msk.bf16.mxu0 %vm7909_vm1, %v5712_v48  ;;  %vm9850_vm1 = vmmov %vm9845_vm6  ;;  %v4828_v55 = vrot.slane %v4499_v6, 1 }
 0xbf7   : > { %4766 = vmatmul.mubr.bf16.gmra.mrb[84].mxu1 %v4506_v47  ;;  %v4838_v21 = vsel %vm9850_vm1, %v4824_v16, %v4825_v26  ;;  %vm9851_vm4 = vmmov %vm9850_vm1  ;;  %v9871_v16 = vld [vmem:[#allocation30_spill] sm:$0xff] }
 0xbf8   : > { %6716 = vmatpush1.bf16.msra.mxu1 %v9242_v9  ;;  %4775 = vmatprep.mubr.bf16.mxu1 %v8975_v63  ;;  %v5716_v9 = vpack.c.bf16 %v4837_v31, %v4838_v21  ;;  %v4507_v63 = vpack.c.bf16 %v4496_v4, %v4495_v25  ;;  %vm9852_vm6 = vmmov %vm9850_vm1 }
 0xbf9   : > { %6701 = vmatprep.subr.bf16.mxu1 %v9245_v27  ;;  %v4430_v27 = vrot.slane %v7025_v37, %v7570_v15  ;;  %v4484_v15 = vmul.f32 0.01, %v4452_v62  ;;  %vm9865_vm9 = vmmov %vm9850_vm1 }
 0xbfa   : > { %vm9868_vm8 = vmmov %vm9850_vm1 }
 0xbfb   : > { %v4453_v23 = vmul.f32 %v4430_v27, %v9853_v12  ;;  %v4454_v20 = vmul.f32 %v4430_v27, %v9859_v53  ;;  %vm9872_vm15 = vmmov %vm9850_vm1 }
 0xbfc   : > { %6717 = vmatpush1.bf16.msra.mxu1 %v9248_v5  ;;  %v4835_v5 = vsel %vm9851_vm4, %v4827_v44, %v4828_v55  ;;  %vm9873_vm7 = vmmov %vm9850_vm1 }
 0xbfd   : > { %6702 = vmatprep.subr.bf16.mxu1 %v9252_v34  ;;  %5127 = vmatmul.mubr.bf16.gmra.mrb[100].mxu0 %v4506_v47  ;;  %v4836_v34 = vsel %vm9852_vm6, %v4826_v28, %v4827_v44  ;;  %v4485_v43 = vmul.f32 0.01, %v4453_v23  ;;  %vm4469_vm13 = vcmp.ge.f32.partialorder %v4453_v23, 0.0  ;;  %v4486_v60 = vmul.f32 0.01, %v4454_v20 }
 0xbfe   : > { %5717 = vmatprep.mubr.msk.bf16.mxu0 %vm7929_vm2, %v5716_v9  ;;  %vm4468_vm2 = vcmp.ge.f32.partialorder %v4452_v62, 0.0 }
 0xbff   : > { %4776 = vmatmul.mubr.bf16.gmra.mrb[88].mxu1 %v4507_v63  ;;  %v4501_v32 = vsel %vm4469_vm13, %v4453_v23, %v4485_v43 }
 0xc00   : > { %6718 = vmatpush1.bf16.msra.mxu1 %v9254_v50  ;;  %4785 = vmatprep.mubr.bf16.mxu1 %v8997_v17  ;;  %v5720_v50 = vpack.c.bf16 %v4835_v5, %v4836_v34  ;;  %v4508_v17 = vpack.c.bf16 %v4498_v42, %v4497_v38  ;;  %v4830_v19 = vrot.slane %v4501_v32, 1 }
 0xc01   : > { %6703 = vmatprep.subr.bf16.mxu1 %v9258_v8  ;;  %v9856_v8 = vld [vmem:[#allocation21_spill] sm:$0xff] }
 0xc04   : > { %6719 = vmatpush1.bf16.msra.mxu1 %v9260_v49  ;;  %v4500_v49 = vsel %vm4468_vm2, %v4452_v62, %v4484_v15 }
 0xc05   : > { %6704 = vmatprep.subr.bf16.mxu1 %v9854_v33  ;;  %5137 = vmatmul.mubr.bf16.gmra.mrb[104].mxu0 %v4507_v63  ;;  %v4509_v11 = vpack.c.bf16 %v4500_v49, %v4499_v6  ;;  %v4829_v52 = vrot.slane %v4500_v49, 1 }
 0xc06   : > { %5721 = vmatprep.mubr.msk.bf16.mxu0 %vm7984_vm0, %v5720_v50  ;;  %vm4470_vm0 = vcmp.ge.f32.partialorder %v4454_v20, 0.0 }
 0xc07   : > { %4786 = vmatmul.mubr.bf16.gmra.mrb[92].mxu1 %v4508_v17  ;;  %v4502_v22 = vsel %vm4470_vm0, %v4454_v20, %v4486_v60  ;;  %v4833_v61 = vsel %vm9865_vm9, %v4829_v52, %v4830_v19  ;;  %v4834_v2 = vsel %vm9868_vm8, %v4828_v55, %v4829_v52 }
 0xc08   : > { %6720 = vmatpush1.bf16.msra.mxu1 %v9856_v8  ;;  %4795 = vmatprep.mubr.bf16.mxu1 %v9857_v13  ;;  %v4510_v25 = vpack.c.bf16 %v4502_v22, %v4501_v32  ;;  %v5724_v1 = vpack.c.bf16 %v4833_v61, %v4834_v2  ;;  %v4831_v59 = vrot.slane %v4502_v22, 1 }
 0xc09   : > { %6705 = vmatprep.subr.bf16.mxu1 %v9858_v54 }
 0xc0a   : > { %v4832_v30 = vsel %vm9872_vm15, %v4830_v19, %v4831_v59  ;;  %v4847_v24 = vsel %vm9873_vm7, %v4831_v59, %v4816_v56 }
 0xc0b   : > { %v5728_v38 = vpack.c.bf16 %v4847_v24, %v4832_v30 }
 0xc0c   : > { %6721 = vmatpush1.bf16.msra.mxu1 %v9860_v45 }
 0xc0d   : > { %6706 = vmatprep.subr.bf16.mxu1 %v9861_v36  ;;  %5147 = vmatmul.mubr.bf16.gmra.mrb[108].mxu0 %v4508_v17 }
 0xc0f   : > { %4796 = vmatmul.mubr.bf16.gmra.mrb[96].mxu1 %v4509_v11 }
 0xc10   : > { %6722 = vmatpush1.bf16.msra.mxu1 %v9862_v18  ;;  %4805 = vmatprep.mubr.bf16.mxu1 %v9863_v29 }
 0xc11   : > { %6707 = vmatprep.subr.bf16.mxu1 %v9864_v10 }
 0xc14   : > { %6723 = vmatpush1.bf16.msra.mxu1 %v9866_v35 }
 0xc15   : > { %6708 = vmatprep.subr.bf16.mxu1 %v9867_v46 }
 0xc17   : > { %4806 = vmatmul.mubr.bf16.gmra.mrb[100].mxu1 %v4510_v25 }
 0xc18   : > { %6724 = vmatpush1.bf16.msra.mxu1 %v9869_v14  ;;  %5725 = vmatprep.mubr.msk.bf16.mxu1 %vm9782_vm12, %v5724_v1 }
 0xc19   : > { %6709 = vmatprep.subr.bf16.mxu1 %v9871_v16 }
 0xc1c   : > { %6725 = vmatpush1.bf16.msra.mxu1 %v9874_v3 }
 0xc1f   : > { %5157 = vmatmul.mubr.bf16.vlgmr.msra.gmra.mrb[104].mxu1 %v4509_v11 }
 0xc20   : > { %5729 = vmatprep.mubr.msk.bf16.mxu1 %vm9789_vm3, %v5728_v38 }
 0xc27   : > { %5167 = vmatmul.mubr.bf16.gmra.mrb[108].mxu1 %v4510_v25 }
 0xcb2   : > { %v4737_v7 = vpop.f32.mrb[72].mxu1 }
 0xcb3   : > { %5177 = vst [vmem:[%s9435_s9] sm:$0xff] %v4737_v7  ;;  %v4739_v39 = vpop.f32.mrb[73].mxu1 }
 0xcb4   : > { %5178 = vst [vmem:[%s9435_s9 + $0x8] sm:$0xff] %v4739_v39  ;;  %v4741_v56 = vpop.f32.mrb[74].mxu1 }
 0xcb5   : > { %5181 = vst [vmem:[%s9435_s9 + $0x20] sm:$0xff] %v4741_v56  ;;  %v4743_v51 = vpop.f32.mrb[75].mxu1 }
 0xcb6   : > { %5182 = vst [vmem:[%s9435_s9 + $0x28] sm:$0xff] %v4743_v51 }
 0xcb8   : > { %v5098_v48 = vpop.f32.mrb[88].mxu0 }
 0xcb9   : > { %5179 = vst [vmem:[%s9435_s9 + $0x10] sm:$0xff] %v5098_v48  ;;  %v5100_v47 = vpop.f32.mrb[89].mxu0 }
 0xcba   : > { %v4747_v4 = vpop.f32.mrb[76].mxu1  ;;  %5180 = vst [vmem:[%s9435_s9 + $0x18] sm:$0xff] %v5100_v47  ;;  %v5102_v28 = vpop.f32.mrb[90].mxu0 }
 0xcbb   : > { %5185 = vst [vmem:[%s9435_s9 + $0x40] sm:$0xff] %v4747_v4  ;;  %v4749_v40 = vpop.f32.mrb[77].mxu1  ;;  %5183 = vst [vmem:[%s9435_s9 + $0x30] sm:$0xff] %v5102_v28  ;;  %v5104_v58 = vpop.f32.mrb[91].mxu0 }
 0xcbc   : > { %5186 = vst [vmem:[%s9435_s9 + $0x48] sm:$0xff] %v4749_v40  ;;  %v4751_v26 = vpop.f32.mrb[78].mxu1  ;;  %5184 = vst [vmem:[%s9435_s9 + $0x38] sm:$0xff] %v5104_v58 }
 0xcbd   : > { %5189 = vst [vmem:[%s9435_s9 + $0x60] sm:$0xff] %v4751_v26  ;;  %v4753_v31 = vpop.f32.mrb[79].mxu1 }
 0xcbe   : > { %5190 = vst [vmem:[%s9435_s9 + $0x68] sm:$0xff] %v4753_v31 }
 0xcc0   : > { %v5108_v42 = vpop.f32.mrb[92].mxu0 }
 0xcc1   : > { %5187 = vst [vmem:[%s9435_s9 + $0x50] sm:$0xff] %v5108_v42  ;;  %v5110_v6 = vpop.f32.mrb[93].mxu0 }
 0xcc2   : > { %v4757_v21 = vpop.f32.mrb[80].mxu1  ;;  %5188 = vst [vmem:[%s9435_s9 + $0x58] sm:$0xff] %v5110_v6  ;;  %v5112_v37 = vpop.f32.mrb[94].mxu0 }
 0xcc3   : > { %5193 = vst [vmem:[%s9435_s9 + $0x80] sm:$0xff] %v4757_v21  ;;  %v4759_v9 = vpop.f32.mrb[81].mxu1  ;;  %5191 = vst [vmem:[%s9435_s9 + $0x70] sm:$0xff] %v5112_v37  ;;  %v5114_v63 = vpop.f32.mrb[95].mxu0 }
 0xcc4   : > { %5194 = vst [vmem:[%s9435_s9 + $0x88] sm:$0xff] %v4759_v9  ;;  %v4761_v44 = vpop.f32.mrb[82].mxu1  ;;  %5192 = vst [vmem:[%s9435_s9 + $0x78] sm:$0xff] %v5114_v63 }
 0xcc5   : > { %5197 = vst [vmem:[%s9435_s9 + $0xa0] sm:$0xff] %v4761_v44  ;;  %v4763_v55 = vpop.f32.mrb[83].mxu1 }
 0xcc6   : > { %5198 = vst [vmem:[%s9435_s9 + $0xa8] sm:$0xff] %v4763_v55 }
 0xcc8   : > { %v5118_v27 = vpop.f32.mrb[96].mxu0 }
 0xcc9   : > { %5195 = vst [vmem:[%s9435_s9 + $0x90] sm:$0xff] %v5118_v27  ;;  %v5120_v5 = vpop.f32.mrb[97].mxu0 }
 0xcca   : > { %v4767_v34 = vpop.f32.mrb[84].mxu1  ;;  %5196 = vst [vmem:[%s9435_s9 + $0x98] sm:$0xff] %v5120_v5  ;;  %v5122_v62 = vpop.f32.mrb[98].mxu0 }
 0xccb   : > { %5201 = vst [vmem:[%s9435_s9 + $0xc0] sm:$0xff] %v4767_v34  ;;  %v4769_v12 = vpop.f32.mrb[85].mxu1  ;;  %5199 = vst [vmem:[%s9435_s9 + $0xb0] sm:$0xff] %v5122_v62  ;;  %v5124_v23 = vpop.f32.mrb[99].mxu0 }
 0xccc   : > { %5202 = vst [vmem:[%s9435_s9 + $0xc8] sm:$0xff] %v4769_v12  ;;  %v4771_v33 = vpop.f32.mrb[86].mxu1  ;;  %5200 = vst [vmem:[%s9435_s9 + $0xb8] sm:$0xff] %v5124_v23 }
 0xccd   : > { %5205 = vst [vmem:[%s9435_s9 + $0xe0] sm:$0xff] %v4771_v33  ;;  %v4773_v50 = vpop.f32.mrb[87].mxu1 }
 0xcce   : > { %5206 = vst [vmem:[%s9435_s9 + $0xe8] sm:$0xff] %v4773_v50 }
 0xcd0   : > { %v5128_v17 = vpop.f32.mrb[100].mxu0 }
 0xcd1   : > { %5203 = vst [vmem:[%s9435_s9 + $0xd0] sm:$0xff] %v5128_v17  ;;  %v5130_v15 = vpop.f32.mrb[101].mxu0 }
 0xcd2   : > { %v4777_v41 = vpop.f32.mrb[88].mxu1  ;;  %5204 = vst [vmem:[%s9435_s9 + $0xd8] sm:$0xff] %v5130_v15  ;;  %v5132_v8 = vpop.f32.mrb[102].mxu0 }
 0xcd3   : > { %5209 = vst [vmem:[%s9435_s9 + $0x100] sm:$0xff] %v4777_v41  ;;  %v4779_v13 = vpop.f32.mrb[89].mxu1  ;;  %5207 = vst [vmem:[%s9435_s9 + $0xf0] sm:$0xff] %v5132_v8  ;;  %v5134_v43 = vpop.f32.mrb[103].mxu0 }
 0xcd4   : > { %5210 = vst [vmem:[%s9435_s9 + $0x108] sm:$0xff] %v4779_v13  ;;  %v4781_v54 = vpop.f32.mrb[90].mxu1  ;;  %5208 = vst [vmem:[%s9435_s9 + $0xf8] sm:$0xff] %v5134_v43 }
 0xcd5   : > { %5213 = vst [vmem:[%s9435_s9 + $0x120] sm:$0xff] %v4781_v54  ;;  %v4783_v49 = vpop.f32.mrb[91].mxu1 }
 0xcd6   : > { %5214 = vst [vmem:[%s9435_s9 + $0x128] sm:$0xff] %v4783_v49 }
 0xcd8   : > { %v5138_v53 = vpop.f32.mrb[104].mxu0 }
 0xcd9   : > { %5211 = vst [vmem:[%s9435_s9 + $0x110] sm:$0xff] %v5138_v53  ;;  %v5140_v20 = vpop.f32.mrb[105].mxu0 }
 0xcda   : > { %v4787_v45 = vpop.f32.mrb[92].mxu1  ;;  %5212 = vst [vmem:[%s9435_s9 + $0x118] sm:$0xff] %v5140_v20  ;;  %v5142_v32 = vpop.f32.mrb[106].mxu0 }
 0xcdb   : > { %5217 = vst [vmem:[%s9435_s9 + $0x140] sm:$0xff] %v4787_v45  ;;  %v4789_v36 = vpop.f32.mrb[93].mxu1  ;;  %5215 = vst [vmem:[%s9435_s9 + $0x130] sm:$0xff] %v5142_v32  ;;  %v5144_v11 = vpop.f32.mrb[107].mxu0 }
 0xcdc   : > { %5218 = vst [vmem:[%s9435_s9 + $0x148] sm:$0xff] %v4789_v36  ;;  %v4791_v60 = vpop.f32.mrb[94].mxu1  ;;  %5216 = vst [vmem:[%s9435_s9 + $0x138] sm:$0xff] %v5144_v11 }
 0xcdd   : > { %5221 = vst [vmem:[%s9435_s9 + $0x160] sm:$0xff] %v4791_v60  ;;  %v4793_v19 = vpop.f32.mrb[95].mxu1 }
 0xcde   : > { %5222 = vst [vmem:[%s9435_s9 + $0x168] sm:$0xff] %v4793_v19 }
 0xce0   : > { %v5148_v18 = vpop.f32.mrb[108].mxu0 }
 0xce1   : > { %5219 = vst [vmem:[%s9435_s9 + $0x150] sm:$0xff] %v5148_v18  ;;  %v5150_v29 = vpop.f32.mrb[109].mxu0 }
 0xce2   : > { %v4797_v52 = vpop.f32.mrb[96].mxu1  ;;  %5220 = vst [vmem:[%s9435_s9 + $0x158] sm:$0xff] %v5150_v29  ;;  %v5152_v10 = vpop.f32.mrb[110].mxu0 }
 0xce3   : > { %5225 = vst [vmem:[%s9435_s9 + $0x180] sm:$0xff] %v4797_v52  ;;  %v4799_v22 = vpop.f32.mrb[97].mxu1  ;;  %5223 = vst [vmem:[%s9435_s9 + $0x170] sm:$0xff] %v5152_v10  ;;  %v5154_v61 = vpop.f32.mrb[111].mxu0 }
 0xce4   : > { %5226 = vst [vmem:[%s9435_s9 + $0x188] sm:$0xff] %v4799_v22  ;;  %v4801_v35 = vpop.f32.mrb[98].mxu1  ;;  %5224 = vst [vmem:[%s9435_s9 + $0x178] sm:$0xff] %v5154_v61 }
 0xce5   : > { %5229 = vst [vmem:[%s9435_s9 + $0x1a0] sm:$0xff] %v4801_v35  ;;  %v4803_v46 = vpop.f32.mrb[99].mxu1 }
 0xce6   : > { %5230 = vst [vmem:[%s9435_s9 + $0x1a8] sm:$0xff] %v4803_v46 }
 0xcea   : > { %v4807_v25 = vpop.f32.mrb[100].mxu1 }
 0xceb   : > { %5233 = vst [vmem:[%s9435_s9 + $0x1c0] sm:$0xff] %v4807_v25  ;;  %v4809_v2 = vpop.f32.mrb[101].mxu1 }
 0xcec   : > { %5234 = vst [vmem:[%s9435_s9 + $0x1c8] sm:$0xff] %v4809_v2  ;;  %v4811_v1 = vpop.f32.mrb[102].mxu1 }
 0xced   : > { %5237 = vst [vmem:[%s9435_s9 + $0x1e0] sm:$0xff] %v4811_v1  ;;  %v4813_v59 = vpop.f32.mrb[103].mxu1 }
 0xcee   : > { %5238 = vst [vmem:[%s9435_s9 + $0x1e8] sm:$0xff] %v4813_v59 }
 0xcf2   : > { %v5158_v14 = vpop.f32.mrb[104].mxu1 }
 0xcf3   : > { %5227 = vst [vmem:[%s9435_s9 + $0x190] sm:$0xff] %v5158_v14  ;;  %v5160_v0 = vpop.f32.mrb[105].mxu1 }
 0xcf4   : > { %5228 = vst [vmem:[%s9435_s9 + $0x198] sm:$0xff] %v5160_v0  ;;  %v5162_v16 = vpop.f32.mrb[106].mxu1 }
 0xcf5   : > { %5231 = vst [vmem:[%s9435_s9 + $0x1b0] sm:$0xff] %v5162_v16  ;;  %v5164_v30 = vpop.f32.mrb[107].mxu1 }
 0xcf6   : > { %5232 = vst [vmem:[%s9435_s9 + $0x1b8] sm:$0xff] %v5164_v30 }
 0xcfa   : > { %v5168_v24 = vpop.f32.mrb[108].mxu1 }
 0xcfb   : > { %5235 = vst [vmem:[%s9435_s9 + $0x1d0] sm:$0xff] %v5168_v24  ;;  %v5170_v3 = vpop.f32.mrb[109].mxu1 }
 0xcfc   : > { %5236 = vst [vmem:[%s9435_s9 + $0x1d8] sm:$0xff] %v5170_v3  ;;  %v5172_v38 = vpop.f32.mrb[110].mxu1 }
 0xcfd   : > { %5239 = vst [vmem:[%s9435_s9 + $0x1f0] sm:$0xff] %v5172_v38  ;;  %v5174_v57 = vpop.f32.mrb[111].mxu1 }
 0xcfe   : > { %5240 = vst [vmem:[%s9435_s9 + $0x1f8] sm:$0xff] %v5174_v57 }
 0xcff PF: > { %s19_s21 = sadd.s32 1, %s7200_s21  }
 0xd00   : > { %p16_p2 = scmp.ge.s32.totalorder %s19_s21, 4  }
 0xd02   :  { %18 = sbr.rel (!%p16_p2) target bundleno = 3 (0x3), region = 96 }
 0xd09   :  { %5265 = vsyncpa [#allocation3], 1 }
 0xd0a   :  { %5267 = vsyncpa [#allocation3 + $0x1], 1 }
 0xd0b   :  { %5268 = vsyncpa [#allocation5], 1 }
 0xd0c   :  { %5269 = vsyncpa [#allocation8], 1 }

</bundles_post_ra>
